<compile_context>
chip_gen: v5e
topology: v5e:2x2
jax: 0.10.0
libtpu: 0.0.40
codegen_flags: <defaults>
</compile_context>

<pallas_src>
import math

import jax
import jax.numpy as jnp
import numpy as np
from jax import lax
from jax.experimental import pallas as pl
from jax.experimental.pallas import tpu as pltpu


# ----------------------------------------------------------------------------
# Gaussian kernel parameters (same as KNRM.kernel_mus / kernel_sigmas)
# ----------------------------------------------------------------------------
def kernel_mus(n_kernels: int):
    l_mu = [1.0]
    if n_kernels == 1:
        return l_mu
    bin_size = 2.0 / (n_kernels - 1)
    l_mu.append(1 - bin_size / 2)
    for i in range(1, n_kernels - 1):
        l_mu.append(l_mu[i] - bin_size)
    return l_mu


def kernel_sigmas(n_kernels: int):
    bin_size = 2.0 / (n_kernels - 1)
    l_sigma = [0.0001]
    if n_kernels == 1:
        return l_sigma
    l_sigma += [0.5 * bin_size] * (n_kernels - 1)
    return l_sigma


def _round_up(x, m):
    return ((x + m - 1) // m) * m


def _chain_plan(mus, sigmas):
    """Decide whether the shared-sigma factorized exp chain is safe in f32.

    KNRM kernels 1..K-1 share sigma and have evenly spaced mus, so
        exp(-a(mm-mu_j)^2) = exp(-a(mm-mu_i)^2) * exp(+-2*a*bin*mm) * const
    for adjacent kernels.  Chaining outward from the kernel whose mu is closest
    to 0 keeps every live chain value >= exp(-a*(1+|mu_c|)^2); only enable the
    chain when that bound stays comfortably inside normal f32 range (so an
    underflowed chain value can never be followed by a non-negligible one).
    """
    K = len(mus)
    if K < 3:
        return False, None
    sig = sigmas[1]
    if any(abs(s - sig) > 1e-12 for s in sigmas[1:]):
        return False, None
    bins = [mus[i] - mus[i + 1] for i in range(1, K - 1)]
    if any(abs(b - bins[0]) > 1e-9 for b in bins):
        return False, None
    a = 1.0 / (2.0 * sig * sig)
    center = min(range(1, K), key=lambda i: abs(mus[i]))
    if a * (1.0 + abs(mus[center])) ** 2 > 80.0:   # exp(-80) ~ 1.8e-35, normal f32
        return False, None
    return True, center


# ----------------------------------------------------------------------------
# Pallas kernel
# ----------------------------------------------------------------------------
def make_knrm_kernel(mus, sigmas, *, TB, Qp, Dp):
    K = len(mus)
    use_chain, center = _chain_plan(mus, sigmas)

    def kernel(qd_ref, qm_ref, dm_ref, w_ref, b_ref, ws_ref, bs_ref, o_ref):
        # qd_ref : (TB*(Qp+Dp), E)  fused query|doc embedding rows of TB examples
        # qm_ref : (TB, Qp, 1)      query pad mask
        # dm_ref : (TB, 1, Dp)      doc pad mask
        # w_ref  : (E, Hp), b_ref : (1, Hp)   shared linear layer (H zero-padded)
        # ws_ref : (K,)  SMEM,  bs_ref : (1,) SMEM   scoring layer
        # o_ref  : (TB, 1, 1)
        S = Qp + Dp
        Hp = w_ref.shape[1]

        # ---- fused linear projection: one MXU matmul for query + doc rows ----
        qd = qd_ref[...]                                                 # (TB*S, E)
        proj = jnp.dot(qd, w_ref[...],
                       preferred_element_type=jnp.float32) + b_ref[...]  # (TB*S, Hp)

        # ---- L2 normalization along H (rsqrt instead of sqrt + divide) -------
        inv_norm = lax.rsqrt(jnp.sum(proj * proj, axis=1, keepdims=True))
        nrm = (proj * inv_norm).reshape(TB, S, Hp)
        nq = nrm[:, :Qp, :]                                              # (TB, Qp, Hp)
        nd = nrm[:, Qp:, :]                                              # (TB, Dp, Hp)

        # ---- cosine match matrix: contract trailing H dims (no transpose) ----
        mm = lax.dot_general(nq, nd, (((2,), (2,)), ((0,), (0,))),
                             preferred_element_type=jnp.float32)         # (TB, Qp, Dp)
        mm = jnp.where(jnp.isnan(mm), 0.0, mm)   # all-zero rows -> 0, as in torch

        qm = qm_ref[...]                                                 # (TB, Qp, 1)
        dm = dm_ref[...]                                                 # (TB, 1, Dp)

        # ---- Gaussian kernel pooling + scoring --------------------------------
        def accumulate(sk, k, score):
            # sk already carries the doc pad mask; the query mask applied after
            # the log is mathematically identical to the torch q*d mask.
            sum_d = jnp.sum(sk, axis=2, keepdims=True)                   # (TB, Qp, 1)
            lg = jnp.log(jnp.maximum(sum_d, 1e-10)) * 0.01
            feat = jnp.sum(lg * qm, axis=1, keepdims=True)               # (TB, 1, 1)
            return score + feat * ws_ref[k]                              # SMEM scalar

        score = jnp.full((TB, 1, 1), bs_ref[0], dtype=jnp.float32)

        # exact-match kernel (k = 0, sigma = 1e-4): always a direct exp
        a0 = 1.0 / (2.0 * sigmas[0] * sigmas[0])
        score = accumulate(jnp.exp(-a0 * (mm - mus[0]) ** 2) * dm, 0, score)

        if use_chain:
            a = 1.0 / (2.0 * sigmas[1] * sigmas[1])
            bin_ = mus[1] - mus[2]
            two_ab = 2.0 * a * bin_
            # masked once; every chained kernel inherits the mask multiplicatively
            anchor = jnp.exp(-a * (mm - mus[center]) ** 2) * dm
            score = accumulate(anchor, center, score)
            if center > 1:                       # chain towards larger mu
                up = jnp.exp(two_ab * mm)
                t = anchor
                for i in range(center, 1, -1):
                    j = i - 1
                    t = (t * up) * math.exp(a * (mus[i] ** 2 - mus[j] ** 2))
                    score = accumulate(t, j, score)
            if center < K - 1:                   # chain towards smaller mu
                dn = jnp.exp(-two_ab * mm)
                t = anchor
                for i in range(center, K - 1):
                    j = i + 1
                    t = (t * dn) * math.exp(a * (mus[i] ** 2 - mus[j] ** 2))
                    score = accumulate(t, j, score)
        else:
            # generic fallback: direct exp per kernel
            for k in range(1, K):
                a_k = 1.0 / (2.0 * sigmas[k] * sigmas[k])
                score = accumulate(jnp.exp(-a_k * (mm - mus[k]) ** 2) * dm, k, score)

        o_ref[...] = jnp.tanh(score)

    return kernel


# ----------------------------------------------------------------------------
# wrapper
# ----------------------------------------------------------------------------
def knrm_forward(query_emb, doc_emb, query_pad_mask, doc_pad_mask,
                 W, b_lin, w_score, b_score, mus, sigmas, *, block_b=8):
    B, Q, E = query_emb.shape
    _, D, _ = doc_emb.shape
    H = W.shape[1]
    K = len(mus)
    f32 = jnp.float32

    # ---- lane / sublane friendly padding (all padding is inert) --------------
    Qp = _round_up(Q, 8)       # sublane axis of the match matrix
    Dp = _round_up(D, 128)     # lane axis of the match matrix / kernel pooling
    Hp = _round_up(H, 128)     # lane axis of projection, contraction dim of mm
    TB = max(1, min(block_b, B))
    Bp = _round_up(B, TB)      # batch-blocked grid
    S = Qp + Dp
    # NOTE: for realistic sizes (Q=30, D=180, E=300, H=128) per-step VMEM is a
    # few MB at TB=8; on v7x (64 MiB VMEM) keep block_b moderate (<=16) or add
    # a D-tiling grid axis before increasing it further.

    q = jnp.zeros((Bp, Qp, E), f32).at[:B, :Q, :].set(query_emb.astype(f32))
    d = jnp.zeros((Bp, Dp, E), f32).at[:B, :D, :].set(doc_emb.astype(f32))
    qm = jnp.zeros((Bp, Qp, 1), f32).at[:B, :Q, 0].set(query_pad_mask.astype(f32))
    dm = jnp.zeros((Bp, 1, Dp), f32).at[:B, 0, :D].set(doc_pad_mask.astype(f32))
    Wp = jnp.zeros((E, Hp), f32).at[:, :H].set(W.astype(f32))
    bp = jnp.zeros((1, Hp), f32).at[0, :H].set(b_lin.astype(f32).reshape(H))
    ws = w_score.astype(f32).reshape(K)
    bs = b_score.astype(f32).reshape(1)

    # fused projection operand: query and doc rows of each batch element stacked,
    # flattened to 2-D so the kernel does a single plain MXU matmul per step.
    qd = jnp.concatenate([q, d], axis=1).reshape(Bp * S, E)

    kernel = make_knrm_kernel(tuple(float(m) for m in mus),
                              tuple(float(s) for s in sigmas),
                              TB=TB, Qp=Qp, Dp=Dp)

    out = pl.pallas_call(
        kernel,
        out_shape=jax.ShapeDtypeStruct((Bp, 1, 1), f32),
        grid_spec=pltpu.PrefetchScalarGridSpec(
            num_scalar_prefetch=0,
            grid=(Bp // TB,),
            in_specs=[
                pl.BlockSpec((TB * S, E), lambda b: (b, 0)),        # fused q|d embeddings
                pl.BlockSpec((TB, Qp, 1), lambda b: (b, 0, 0)),     # query mask
                pl.BlockSpec((TB, 1, Dp), lambda b: (b, 0, 0)),     # doc mask
                pl.BlockSpec((E, Hp), lambda b: (0, 0)),            # linear weight
                pl.BlockSpec((1, Hp), lambda b: (0, 0)),            # linear bias
                pl.BlockSpec(memory_space=pltpu.MemorySpace.SMEM),  # scoring weight (K,)
                pl.BlockSpec(memory_space=pltpu.MemorySpace.SMEM),  # scoring bias (1,)
            ],
            out_specs=pl.BlockSpec((TB, 1, 1), lambda b: (b, 0, 0)),
        ),
        compiler_params=pltpu.CompilerParams(
            # each batch block is independent -> both TensorCores can run on v7x
            dimension_semantics=("parallel",),
        ),
    )(qd, qm, dm, Wp, bp, ws, bs)
    return out[:B, :, 0]


# ----------------------------------------------------------------------------
# pure-JAX reference (mirrors the PyTorch forward exactly)
# ----------------------------------------------------------------------------
def knrm_reference(query_emb, doc_emb, query_pad_mask, doc_pad_mask,
                   W, b_lin, w_score, b_score, mus, sigmas):
    qh = query_emb @ W + b_lin
    dh = doc_emb @ W + b_lin
    mask = query_pad_mask[:, :, None] * doc_pad_mask[:, None, :]      # (B,Q,D)
    nq = qh / jnp.sqrt(jnp.sum(qh ** 2, axis=2, keepdims=True))
    nd = dh / jnp.sqrt(jnp.sum(dh ** 2, axis=2, keepdims=True))
    mm = jnp.einsum("bqh,bdh->bqd", nq, nd)
    mm = jnp.where(jnp.isnan(mm), 0.0, mm)
    mu = jnp.asarray(mus, jnp.float32)[None, None, None, :]
    sig = jnp.asarray(sigmas, jnp.float32)[None, None, None, :]
    ks = jnp.exp(-((mm[..., None] - mu) ** 2) / (2.0 * sig ** 2))
    ks = ks * mask[..., None]
    ks = jnp.sum(ks, axis=2)                                          # (B,Q,K)
    ks = jnp.log(jnp.maximum(ks, 1e-10)) * 0.01
    ks = ks * query_pad_mask[:, :, None]
    feats = jnp.sum(ks, axis=1)                                       # (B,K)
    return jnp.tanh(feats @ w_score.reshape(-1, 1) + b_score.reshape(1, 1))


# ----------------------------------------------------------------------------
if __name__ == "__main__":
    # small shapes consistent with the module (query_max/doc_max/hidden scaled down)
    B, Q, D, E, H, K = 6, 7, 20, 32, 32, 11

    mus = kernel_mus(K)
    sigmas = kernel_sigmas(K)

    key = jax.random.PRNGKey(0)
    k1, k2, k3, k4, k5 = jax.random.split(key, 5)

    # deterministic synthetic parameters (no checkpoint)
    W = jax.random.normal(k1, (E, H), jnp.float32) / math.sqrt(E)
    b_lin = jax.random.normal(k2, (H,), jnp.float32) * 0.01
    w_score = jax.random.normal(k3, (K,), jnp.float32) / math.sqrt(K)
    b_score = jnp.array([0.1], jnp.float32)

    # inputs (padding exercised on batch, query, doc and hidden axes)
    query_emb = jax.random.normal(k4, (B, Q, E), jnp.float32)
    doc_emb = jax.random.normal(k5, (B, D, E), jnp.float32)
    q_lens = jnp.array([3, 7, 5, 2, 6, 4])
    d_lens = jnp.array([12, 20, 7, 16, 9, 20])
    query_pad_mask = (jnp.arange(Q)[None, :] < q_lens[:, None]).astype(jnp.float32)
    doc_pad_mask = (jnp.arange(D)[None, :] < d_lens[:, None]).astype(jnp.float32)

    out = knrm_forward(query_emb, doc_emb, query_pad_mask, doc_pad_mask,
                       W, b_lin, w_score, b_score, mus, sigmas, block_b=4)
    out = jax.block_until_ready(out)

    ref = knrm_reference(query_emb, doc_emb, query_pad_mask, doc_pad_mask,
                         W, b_lin, w_score, b_score, mus, sigmas)
    ref = jax.block_until_ready(ref)

    assert out.shape == (B, 1)
    # rsqrt-norm and the factorized-exp chain differ from the reference by a
    # few ulps per element -> slightly loose rtol.
    np.testing.assert_allclose(np.asarray(out), np.asarray(ref),
                               rtol=1e-3, atol=1e-5)
    print("KERNEL_OK")
</pallas_src>

<mosaic_0001>
module attributes {stable_mosaic.version = 11 : i64} {
  func.func @kernel(%arg0: i32, %arg1: memref<544x32xf32, #tpu.memory_space<vmem>>, %arg2: memref<4x8x1xf32, #tpu.memory_space<vmem>>, %arg3: memref<4x1x128xf32, #tpu.memory_space<vmem>>, %arg4: memref<32x128xf32, #tpu.memory_space<vmem>>, %arg5: memref<1x128xf32, #tpu.memory_space<vmem>>, %arg6: memref<11xf32, #tpu.memory_space<smem>>, %arg7: memref<1xf32, #tpu.memory_space<smem>>, %arg8: memref<4x1x1xf32, #tpu.memory_space<vmem>>) attributes {dimension_semantics = [#tpu.dimension_semantics<parallel>], iteration_bounds = array<i64: 2>, scalar_prefetch = 0 : i64, scratch_operands = 0 : i64, tpu.core_type = #tpu.core_type<tc>, window_params = [{transform_indices = @transform_0, window_bounds = array<i64: 544, 32>}, {transform_indices = @transform_1, window_bounds = array<i64: 4, 8, 1>}, {transform_indices = @transform_2, window_bounds = array<i64: 4, 1, 128>}, {pipeline_mode = #tpu.pipeline_mode<synchronous>, transform_indices = @transform_3, window_bounds = array<i64: 32, 128>}, {pipeline_mode = #tpu.pipeline_mode<synchronous>, transform_indices = @transform_4, window_bounds = array<i64: 1, 128>}, {transform_indices = @transform_5, window_bounds = array<i64: 11>}, {transform_indices = @transform_6, window_bounds = array<i64: 1>}, {transform_indices = @transform_7, window_bounds = array<i64: 4, 1, 1>}]} {
    %c0 = arith.constant 0 : index
    %c0_0 = arith.constant 0 : index
    %0 = vector.load %arg1[%c0, %c0_0] : memref<544x32xf32, #tpu.memory_space<vmem>>, vector<544x32xf32>
    %c0_1 = arith.constant 0 : index
    %c0_2 = arith.constant 0 : index
    %1 = vector.load %arg4[%c0_1, %c0_2] : memref<32x128xf32, #tpu.memory_space<vmem>>, vector<32x128xf32>
    %cst = arith.constant dense<0.000000e+00> : vector<544x128xf32>
    %2 = tpu.matmul %0, %1, %cst {dimension_numbers = #tpu.dot_dimension_numbers<[1], [0], [0], [1], [0, 0, 1, 1], [], []>} : vector<544x32xf32>, vector<32x128xf32>, vector<544x128xf32> -> vector<544x128xf32>
    %c0_3 = arith.constant 0 : index
    %c0_4 = arith.constant 0 : index
    %3 = vector.load %arg5[%c0_3, %c0_4] : memref<1x128xf32, #tpu.memory_space<vmem>>, vector<1x128xf32>
    %4 = vector.broadcast %3 : vector<1x128xf32> to vector<544x128xf32>
    %5 = arith.addf %2, %4 : vector<544x128xf32>
    %6 = arith.mulf %5, %5 : vector<544x128xf32>
    %cst_5 = arith.constant dense<0.000000e+00> : vector<544xf32>
    %7 = vector.multi_reduction <add>, %6, %cst_5 [1] : vector<544x128xf32> to vector<544xf32>
    %8 = vector.shape_cast %7 : vector<544xf32> to vector<544x1xf32>
    %9 = math.rsqrt %8 : vector<544x1xf32>
    %10 = vector.broadcast %9 : vector<544x1xf32> to vector<544x128xf32>
    %11 = arith.mulf %5, %10 : vector<544x128xf32>
    %12 = vector.shape_cast %11 : vector<544x128xf32> to vector<4x136x128xf32>
    %13 = vector.extract_strided_slice %12 {offsets = [0, 0, 0], sizes = [4, 8, 128], strides = [1, 1, 1]} : vector<4x136x128xf32> to vector<4x8x128xf32>
    %14 = vector.extract_strided_slice %12 {offsets = [0, 8, 0], sizes = [4, 128, 128], strides = [1, 1, 1]} : vector<4x136x128xf32> to vector<4x128x128xf32>
    %cst_6 = arith.constant dense<0.000000e+00> : vector<4x8x128xf32>
    %15 = tpu.matmul %13, %14, %cst_6 {dimension_numbers = #tpu.dot_dimension_numbers<[2], [2], [1], [1], [0, 0, 0, 1, 1, 1], [0], [0]>} : vector<4x8x128xf32>, vector<4x128x128xf32>, vector<4x8x128xf32> -> vector<4x8x128xf32>
    %16 = arith.cmpf one, %15, %15 : vector<4x8x128xf32>
    %cst_7 = arith.constant 0.000000e+00 : f32
    %17 = vector.broadcast %cst_7 : f32 to vector<4x8x128xf32>
    %18 = arith.select %16, %17, %15 : vector<4x8x128xi1>, vector<4x8x128xf32>
    %c0_8 = arith.constant 0 : index
    %c0_9 = arith.constant 0 : index
    %c0_10 = arith.constant 0 : index
    %19 = vector.load %arg2[%c0_8, %c0_9, %c0_10] : memref<4x8x1xf32, #tpu.memory_space<vmem>>, vector<4x8x1xf32>
    %c0_11 = arith.constant 0 : index
    %c0_12 = arith.constant 0 : index
    %c0_13 = arith.constant 0 : index
    %20 = vector.load %arg3[%c0_11, %c0_12, %c0_13] : memref<4x1x128xf32, #tpu.memory_space<vmem>>, vector<4x1x128xf32>
    %c0_14 = arith.constant 0 : index
    %21 = memref.load %arg7[%c0_14] : memref<1xf32, #tpu.memory_space<smem>>
    %22 = vector.broadcast %21 : f32 to vector<4x1x1xf32>
    %cst_15 = arith.constant 1.000000e+00 : f32
    %23 = vector.broadcast %cst_15 : f32 to vector<4x8x128xf32>
    %24 = arith.subf %18, %23 : vector<4x8x128xf32>
    %25 = arith.mulf %24, %24 : vector<4x8x128xf32>
    %cst_16 = arith.constant -5.000000e+07 : f32
    %26 = vector.broadcast %cst_16 : f32 to vector<4x8x128xf32>
    %27 = arith.mulf %26, %25 : vector<4x8x128xf32>
    %28 = math.exp %27 : vector<4x8x128xf32>
    %29 = vector.broadcast %20 : vector<4x1x128xf32> to vector<4x8x128xf32>
    %30 = arith.mulf %28, %29 : vector<4x8x128xf32>
    %cst_17 = arith.constant dense<0.000000e+00> : vector<4x8xf32>
    %31 = vector.multi_reduction <add>, %30, %cst_17 [2] : vector<4x8x128xf32> to vector<4x8xf32>
    %32 = vector.shape_cast %31 : vector<4x8xf32> to vector<4x8x1xf32>
    %cst_18 = arith.constant 1.000000e-10 : f32
    %33 = vector.broadcast %cst_18 : f32 to vector<4x8x1xf32>
    %34 = arith.maximumf %32, %33 : vector<4x8x1xf32>
    %35 = math.log %34 : vector<4x8x1xf32>
    %cst_19 = arith.constant 0.00999999977 : f32
    %36 = vector.broadcast %cst_19 : f32 to vector<4x8x1xf32>
    %37 = arith.mulf %35, %36 : vector<4x8x1xf32>
    %38 = arith.mulf %37, %19 : vector<4x8x1xf32>
    %cst_20 = arith.constant dense<0.000000e+00> : vector<4x1xf32>
    %39 = vector.multi_reduction <add>, %38, %cst_20 [1] : vector<4x8x1xf32> to vector<4x1xf32>
    %40 = vector.shape_cast %39 : vector<4x1xf32> to vector<4x1x1xf32>
    %c0_21 = arith.constant 0 : index
    %41 = memref.load %arg6[%c0_21] : memref<11xf32, #tpu.memory_space<smem>>
    %42 = vector.broadcast %41 : f32 to vector<4x1x1xf32>
    %43 = arith.mulf %40, %42 : vector<4x1x1xf32>
    %44 = arith.addf %22, %43 : vector<4x1x1xf32>
    %cst_22 = arith.constant 1.000000e-01 : f32
    %45 = vector.broadcast %cst_22 : f32 to vector<4x8x128xf32>
    %46 = arith.subf %18, %45 : vector<4x8x128xf32>
    %47 = arith.mulf %46, %46 : vector<4x8x128xf32>
    %cst_23 = arith.constant -5.000000e+01 : f32
    %48 = vector.broadcast %cst_23 : f32 to vector<4x8x128xf32>
    %49 = arith.mulf %48, %47 : vector<4x8x128xf32>
    %50 = math.exp %49 : vector<4x8x128xf32>
    %51 = vector.broadcast %20 : vector<4x1x128xf32> to vector<4x8x128xf32>
    %52 = arith.mulf %50, %51 : vector<4x8x128xf32>
    %cst_24 = arith.constant dense<0.000000e+00> : vector<4x8xf32>
    %53 = vector.multi_reduction <add>, %52, %cst_24 [2] : vector<4x8x128xf32> to vector<4x8xf32>
    %54 = vector.shape_cast %53 : vector<4x8xf32> to vector<4x8x1xf32>
    %cst_25 = arith.constant 1.000000e-10 : f32
    %55 = vector.broadcast %cst_25 : f32 to vector<4x8x1xf32>
    %56 = arith.maximumf %54, %55 : vector<4x8x1xf32>
    %57 = math.log %56 : vector<4x8x1xf32>
    %cst_26 = arith.constant 0.00999999977 : f32
    %58 = vector.broadcast %cst_26 : f32 to vector<4x8x1xf32>
    %59 = arith.mulf %57, %58 : vector<4x8x1xf32>
    %60 = arith.mulf %59, %19 : vector<4x8x1xf32>
    %cst_27 = arith.constant dense<0.000000e+00> : vector<4x1xf32>
    %61 = vector.multi_reduction <add>, %60, %cst_27 [1] : vector<4x8x1xf32> to vector<4x1xf32>
    %62 = vector.shape_cast %61 : vector<4x1xf32> to vector<4x1x1xf32>
    %c5 = arith.constant 5 : index
    %63 = memref.load %arg6[%c5] : memref<11xf32, #tpu.memory_space<smem>>
    %64 = vector.broadcast %63 : f32 to vector<4x1x1xf32>
    %65 = arith.mulf %62, %64 : vector<4x1x1xf32>
    %66 = arith.addf %44, %65 : vector<4x1x1xf32>
    %cst_28 = arith.constant 2.000000e+01 : f32
    %67 = vector.broadcast %cst_28 : f32 to vector<4x8x128xf32>
    %68 = arith.mulf %67, %18 : vector<4x8x128xf32>
    %69 = math.exp %68 : vector<4x8x128xf32>
    %70 = arith.mulf %52, %69 : vector<4x8x128xf32>
    %cst_29 = arith.constant 0.0183156393 : f32
    %71 = vector.broadcast %cst_29 : f32 to vector<4x8x128xf32>
    %72 = arith.mulf %70, %71 : vector<4x8x128xf32>
    %cst_30 = arith.constant dense<0.000000e+00> : vector<4x8xf32>
    %73 = vector.multi_reduction <add>, %72, %cst_30 [2] : vector<4x8x128xf32> to vector<4x8xf32>
    %74 = vector.shape_cast %73 : vector<4x8xf32> to vector<4x8x1xf32>
    %cst_31 = arith.constant 1.000000e-10 : f32
    %75 = vector.broadcast %cst_31 : f32 to vector<4x8x1xf32>
    %76 = arith.maximumf %74, %75 : vector<4x8x1xf32>
    %77 = math.log %76 : vector<4x8x1xf32>
    %cst_32 = arith.constant 0.00999999977 : f32
    %78 = vector.broadcast %cst_32 : f32 to vector<4x8x1xf32>
    %79 = arith.mulf %77, %78 : vector<4x8x1xf32>
    %80 = arith.mulf %79, %19 : vector<4x8x1xf32>
    %cst_33 = arith.constant dense<0.000000e+00> : vector<4x1xf32>
    %81 = vector.multi_reduction <add>, %80, %cst_33 [1] : vector<4x8x1xf32> to vector<4x1xf32>
    %82 = vector.shape_cast %81 : vector<4x1xf32> to vector<4x1x1xf32>
    %c4 = arith.constant 4 : index
    %83 = memref.load %arg6[%c4] : memref<11xf32, #tpu.memory_space<smem>>
    %84 = vector.broadcast %83 : f32 to vector<4x1x1xf32>
    %85 = arith.mulf %82, %84 : vector<4x1x1xf32>
    %86 = arith.addf %66, %85 : vector<4x1x1xf32>
    %87 = arith.mulf %72, %69 : vector<4x8x128xf32>
    %cst_34 = arith.constant 3.35462624E-4 : f32
    %88 = vector.broadcast %cst_34 : f32 to vector<4x8x128xf32>
    %89 = arith.mulf %87, %88 : vector<4x8x128xf32>
    %cst_35 = arith.constant dense<0.000000e+00> : vector<4x8xf32>
    %90 = vector.multi_reduction <add>, %89, %cst_35 [2] : vector<4x8x128xf32> to vector<4x8xf32>
    %91 = vector.shape_cast %90 : vector<4x8xf32> to vector<4x8x1xf32>
    %cst_36 = arith.constant 1.000000e-10 : f32
    %92 = vector.broadcast %cst_36 : f32 to vector<4x8x1xf32>
    %93 = arith.maximumf %91, %92 : vector<4x8x1xf32>
    %94 = math.log %93 : vector<4x8x1xf32>
    %cst_37 = arith.constant 0.00999999977 : f32
    %95 = vector.broadcast %cst_37 : f32 to vector<4x8x1xf32>
    %96 = arith.mulf %94, %95 : vector<4x8x1xf32>
    %97 = arith.mulf %96, %19 : vector<4x8x1xf32>
    %cst_38 = arith.constant dense<0.000000e+00> : vector<4x1xf32>
    %98 = vector.multi_reduction <add>, %97, %cst_38 [1] : vector<4x8x1xf32> to vector<4x1xf32>
    %99 = vector.shape_cast %98 : vector<4x1xf32> to vector<4x1x1xf32>
    %c3 = arith.constant 3 : index
    %100 = memref.load %arg6[%c3] : memref<11xf32, #tpu.memory_space<smem>>
    %101 = vector.broadcast %100 : f32 to vector<4x1x1xf32>
    %102 = arith.mulf %99, %101 : vector<4x1x1xf32>
    %103 = arith.addf %86, %102 : vector<4x1x1xf32>
    %104 = arith.mulf %89, %69 : vector<4x8x128xf32>
    %cst_39 = arith.constant 6.14421242E-6 : f32
    %105 = vector.broadcast %cst_39 : f32 to vector<4x8x128xf32>
    %106 = arith.mulf %104, %105 : vector<4x8x128xf32>
    %cst_40 = arith.constant dense<0.000000e+00> : vector<4x8xf32>
    %107 = vector.multi_reduction <add>, %106, %cst_40 [2] : vector<4x8x128xf32> to vector<4x8xf32>
    %108 = vector.shape_cast %107 : vector<4x8xf32> to vector<4x8x1xf32>
    %cst_41 = arith.constant 1.000000e-10 : f32
    %109 = vector.broadcast %cst_41 : f32 to vector<4x8x1xf32>
    %110 = arith.maximumf %108, %109 : vector<4x8x1xf32>
    %111 = math.log %110 : vector<4x8x1xf32>
    %cst_42 = arith.constant 0.00999999977 : f32
    %112 = vector.broadcast %cst_42 : f32 to vector<4x8x1xf32>
    %113 = arith.mulf %111, %112 : vector<4x8x1xf32>
    %114 = arith.mulf %113, %19 : vector<4x8x1xf32>
    %cst_43 = arith.constant dense<0.000000e+00> : vector<4x1xf32>
    %115 = vector.multi_reduction <add>, %114, %cst_43 [1] : vector<4x8x1xf32> to vector<4x1xf32>
    %116 = vector.shape_cast %115 : vector<4x1xf32> to vector<4x1x1xf32>
    %c2 = arith.constant 2 : index
    %117 = memref.load %arg6[%c2] : memref<11xf32, #tpu.memory_space<smem>>
    %118 = vector.broadcast %117 : f32 to vector<4x1x1xf32>
    %119 = arith.mulf %116, %118 : vector<4x1x1xf32>
    %120 = arith.addf %103, %119 : vector<4x1x1xf32>
    %121 = arith.mulf %106, %69 : vector<4x8x128xf32>
    %cst_44 = arith.constant 1.12535176E-7 : f32
    %122 = vector.broadcast %cst_44 : f32 to vector<4x8x128xf32>
    %123 = arith.mulf %121, %122 : vector<4x8x128xf32>
    %cst_45 = arith.constant dense<0.000000e+00> : vector<4x8xf32>
    %124 = vector.multi_reduction <add>, %123, %cst_45 [2] : vector<4x8x128xf32> to vector<4x8xf32>
    %125 = vector.shape_cast %124 : vector<4x8xf32> to vector<4x8x1xf32>
    %cst_46 = arith.constant 1.000000e-10 : f32
    %126 = vector.broadcast %cst_46 : f32 to vector<4x8x1xf32>
    %127 = arith.maximumf %125, %126 : vector<4x8x1xf32>
    %128 = math.log %127 : vector<4x8x1xf32>
    %cst_47 = arith.constant 0.00999999977 : f32
    %129 = vector.broadcast %cst_47 : f32 to vector<4x8x1xf32>
    %130 = arith.mulf %128, %129 : vector<4x8x1xf32>
    %131 = arith.mulf %130, %19 : vector<4x8x1xf32>
    %cst_48 = arith.constant dense<0.000000e+00> : vector<4x1xf32>
    %132 = vector.multi_reduction <add>, %131, %cst_48 [1] : vector<4x8x1xf32> to vector<4x1xf32>
    %133 = vector.shape_cast %132 : vector<4x1xf32> to vector<4x1x1xf32>
    %c1 = arith.constant 1 : index
    %134 = memref.load %arg6[%c1] : memref<11xf32, #tpu.memory_space<smem>>
    %135 = vector.broadcast %134 : f32 to vector<4x1x1xf32>
    %136 = arith.mulf %133, %135 : vector<4x1x1xf32>
    %137 = arith.addf %120, %136 : vector<4x1x1xf32>
    %cst_49 = arith.constant -2.000000e+01 : f32
    %138 = vector.broadcast %cst_49 : f32 to vector<4x8x128xf32>
    %139 = arith.mulf %138, %18 : vector<4x8x128xf32>
    %140 = math.exp %139 : vector<4x8x128xf32>
    %141 = arith.mulf %52, %140 : vector<4x8x128xf32>
    %cst_50 = arith.constant 1.000000e+00 : f32
    %142 = vector.broadcast %cst_50 : f32 to vector<4x8x128xf32>
    %143 = arith.mulf %141, %142 : vector<4x8x128xf32>
    %cst_51 = arith.constant dense<0.000000e+00> : vector<4x8xf32>
    %144 = vector.multi_reduction <add>, %143, %cst_51 [2] : vector<4x8x128xf32> to vector<4x8xf32>
    %145 = vector.shape_cast %144 : vector<4x8xf32> to vector<4x8x1xf32>
    %cst_52 = arith.constant 1.000000e-10 : f32
    %146 = vector.broadcast %cst_52 : f32 to vector<4x8x1xf32>
    %147 = arith.maximumf %145, %146 : vector<4x8x1xf32>
    %148 = math.log %147 : vector<4x8x1xf32>
    %cst_53 = arith.constant 0.00999999977 : f32
    %149 = vector.broadcast %cst_53 : f32 to vector<4x8x1xf32>
    %150 = arith.mulf %148, %149 : vector<4x8x1xf32>
    %151 = arith.mulf %150, %19 : vector<4x8x1xf32>
    %cst_54 = arith.constant dense<0.000000e+00> : vector<4x1xf32>
    %152 = vector.multi_reduction <add>, %151, %cst_54 [1] : vector<4x8x1xf32> to vector<4x1xf32>
    %153 = vector.shape_cast %152 : vector<4x1xf32> to vector<4x1x1xf32>
    %c6 = arith.constant 6 : index
    %154 = memref.load %arg6[%c6] : memref<11xf32, #tpu.memory_space<smem>>
    %155 = vector.broadcast %154 : f32 to vector<4x1x1xf32>
    %156 = arith.mulf %153, %155 : vector<4x1x1xf32>
    %157 = arith.addf %137, %156 : vector<4x1x1xf32>
    %158 = arith.mulf %143, %140 : vector<4x8x128xf32>
    %cst_55 = arith.constant 0.0183156393 : f32
    %159 = vector.broadcast %cst_55 : f32 to vector<4x8x128xf32>
    %160 = arith.mulf %158, %159 : vector<4x8x128xf32>
    %cst_56 = arith.constant dense<0.000000e+00> : vector<4x8xf32>
    %161 = vector.multi_reduction <add>, %160, %cst_56 [2] : vector<4x8x128xf32> to vector<4x8xf32>
    %162 = vector.shape_cast %161 : vector<4x8xf32> to vector<4x8x1xf32>
    %cst_57 = arith.constant 1.000000e-10 : f32
    %163 = vector.broadcast %cst_57 : f32 to vector<4x8x1xf32>
    %164 = arith.maximumf %162, %163 : vector<4x8x1xf32>
    %165 = math.log %164 : vector<4x8x1xf32>
    %cst_58 = arith.constant 0.00999999977 : f32
    %166 = vector.broadcast %cst_58 : f32 to vector<4x8x1xf32>
    %167 = arith.mulf %165, %166 : vector<4x8x1xf32>
    %168 = arith.mulf %167, %19 : vector<4x8x1xf32>
    %cst_59 = arith.constant dense<0.000000e+00> : vector<4x1xf32>
    %169 = vector.multi_reduction <add>, %168, %cst_59 [1] : vector<4x8x1xf32> to vector<4x1xf32>
    %170 = vector.shape_cast %169 : vector<4x1xf32> to vector<4x1x1xf32>
    %c7 = arith.constant 7 : index
    %171 = memref.load %arg6[%c7] : memref<11xf32, #tpu.memory_space<smem>>
    %172 = vector.broadcast %171 : f32 to vector<4x1x1xf32>
    %173 = arith.mulf %170, %172 : vector<4x1x1xf32>
    %174 = arith.addf %157, %173 : vector<4x1x1xf32>
    %175 = arith.mulf %160, %140 : vector<4x8x128xf32>
    %cst_60 = arith.constant 3.35462624E-4 : f32
    %176 = vector.broadcast %cst_60 : f32 to vector<4x8x128xf32>
    %177 = arith.mulf %175, %176 : vector<4x8x128xf32>
    %cst_61 = arith.constant dense<0.000000e+00> : vector<4x8xf32>
    %178 = vector.multi_reduction <add>, %177, %cst_61 [2] : vector<4x8x128xf32> to vector<4x8xf32>
    %179 = vector.shape_cast %178 : vector<4x8xf32> to vector<4x8x1xf32>
    %cst_62 = arith.constant 1.000000e-10 : f32
    %180 = vector.broadcast %cst_62 : f32 to vector<4x8x1xf32>
    %181 = arith.maximumf %179, %180 : vector<4x8x1xf32>
    %182 = math.log %181 : vector<4x8x1xf32>
    %cst_63 = arith.constant 0.00999999977 : f32
    %183 = vector.broadcast %cst_63 : f32 to vector<4x8x1xf32>
    %184 = arith.mulf %182, %183 : vector<4x8x1xf32>
    %185 = arith.mulf %184, %19 : vector<4x8x1xf32>
    %cst_64 = arith.constant dense<0.000000e+00> : vector<4x1xf32>
    %186 = vector.multi_reduction <add>, %185, %cst_64 [1] : vector<4x8x1xf32> to vector<4x1xf32>
    %187 = vector.shape_cast %186 : vector<4x1xf32> to vector<4x1x1xf32>
    %c8 = arith.constant 8 : index
    %188 = memref.load %arg6[%c8] : memref<11xf32, #tpu.memory_space<smem>>
    %189 = vector.broadcast %188 : f32 to vector<4x1x1xf32>
    %190 = arith.mulf %187, %189 : vector<4x1x1xf32>
    %191 = arith.addf %174, %190 : vector<4x1x1xf32>
    %192 = arith.mulf %177, %140 : vector<4x8x128xf32>
    %cst_65 = arith.constant 6.14421242E-6 : f32
    %193 = vector.broadcast %cst_65 : f32 to vector<4x8x128xf32>
    %194 = arith.mulf %192, %193 : vector<4x8x128xf32>
    %cst_66 = arith.constant dense<0.000000e+00> : vector<4x8xf32>
    %195 = vector.multi_reduction <add>, %194, %cst_66 [2] : vector<4x8x128xf32> to vector<4x8xf32>
    %196 = vector.shape_cast %195 : vector<4x8xf32> to vector<4x8x1xf32>
    %cst_67 = arith.constant 1.000000e-10 : f32
    %197 = vector.broadcast %cst_67 : f32 to vector<4x8x1xf32>
    %198 = arith.maximumf %196, %197 : vector<4x8x1xf32>
    %199 = math.log %198 : vector<4x8x1xf32>
    %cst_68 = arith.constant 0.00999999977 : f32
    %200 = vector.broadcast %cst_68 : f32 to vector<4x8x1xf32>
    %201 = arith.mulf %199, %200 : vector<4x8x1xf32>
    %202 = arith.mulf %201, %19 : vector<4x8x1xf32>
    %cst_69 = arith.constant dense<0.000000e+00> : vector<4x1xf32>
    %203 = vector.multi_reduction <add>, %202, %cst_69 [1] : vector<4x8x1xf32> to vector<4x1xf32>
    %204 = vector.shape_cast %203 : vector<4x1xf32> to vector<4x1x1xf32>
    %c9 = arith.constant 9 : index
    %205 = memref.load %arg6[%c9] : memref<11xf32, #tpu.memory_space<smem>>
    %206 = vector.broadcast %205 : f32 to vector<4x1x1xf32>
    %207 = arith.mulf %204, %206 : vector<4x1x1xf32>
    %208 = arith.addf %191, %207 : vector<4x1x1xf32>
    %209 = arith.mulf %194, %140 : vector<4x8x128xf32>
    %cst_70 = arith.constant 1.12535176E-7 : f32
    %210 = vector.broadcast %cst_70 : f32 to vector<4x8x128xf32>
    %211 = arith.mulf %209, %210 : vector<4x8x128xf32>
    %cst_71 = arith.constant dense<0.000000e+00> : vector<4x8xf32>
    %212 = vector.multi_reduction <add>, %211, %cst_71 [2] : vector<4x8x128xf32> to vector<4x8xf32>
    %213 = vector.shape_cast %212 : vector<4x8xf32> to vector<4x8x1xf32>
    %cst_72 = arith.constant 1.000000e-10 : f32
    %214 = vector.broadcast %cst_72 : f32 to vector<4x8x1xf32>
    %215 = arith.maximumf %213, %214 : vector<4x8x1xf32>
    %216 = math.log %215 : vector<4x8x1xf32>
    %cst_73 = arith.constant 0.00999999977 : f32
    %217 = vector.broadcast %cst_73 : f32 to vector<4x8x1xf32>
    %218 = arith.mulf %216, %217 : vector<4x8x1xf32>
    %219 = arith.mulf %218, %19 : vector<4x8x1xf32>
    %cst_74 = arith.constant dense<0.000000e+00> : vector<4x1xf32>
    %220 = vector.multi_reduction <add>, %219, %cst_74 [1] : vector<4x8x1xf32> to vector<4x1xf32>
    %221 = vector.shape_cast %220 : vector<4x1xf32> to vector<4x1x1xf32>
    %c10 = arith.constant 10 : index
    %222 = memref.load %arg6[%c10] : memref<11xf32, #tpu.memory_space<smem>>
    %223 = vector.broadcast %222 : f32 to vector<4x1x1xf32>
    %224 = arith.mulf %221, %223 : vector<4x1x1xf32>
    %225 = arith.addf %208, %224 : vector<4x1x1xf32>
    %226 = math.tanh %225 : vector<4x1x1xf32>
    %c0_75 = arith.constant 0 : index
    %c0_76 = arith.constant 0 : index
    %c0_77 = arith.constant 0 : index
    %227 = vector.load %arg8[%c0_75, %c0_76, %c0_77] : memref<4x1x1xf32, #tpu.memory_space<vmem>>, vector<4x1x1xf32>
    tpu.vector_store %arg8[%c0_75, %c0_76, %c0_77], %226 {strides = array<i32>} : memref<4x1x1xf32, #tpu.memory_space<vmem>>, vector<4x1x1xf32>,
    return
  }
  func.func @transform_0(%arg0: i32) -> (i32, i32) {
    %c0_i32 = arith.constant 0 : i32
    %c0_i32_0 = arith.constant 0 : i32
    return %arg0, %c0_i32 : i32, i32
  }
  func.func @transform_1(%arg0: i32) -> (i32, i32, i32) {
    %c0_i32 = arith.constant 0 : i32
    %c0_i32_0 = arith.constant 0 : i32
    %c0_i32_1 = arith.constant 0 : i32
    return %arg0, %c0_i32, %c0_i32_0 : i32, i32, i32
  }
  func.func @transform_2(%arg0: i32) -> (i32, i32, i32) {
    %c0_i32 = arith.constant 0 : i32
    %c0_i32_0 = arith.constant 0 : i32
    %c0_i32_1 = arith.constant 0 : i32
    return %arg0, %c0_i32, %c0_i32_0 : i32, i32, i32
  }
  func.func @transform_3(%arg0: i32) -> (i32, i32) {
    %c0_i32 = arith.constant 0 : i32
    %c0_i32_0 = arith.constant 0 : i32
    %c0_i32_1 = arith.constant 0 : i32
    return %c0_i32, %c0_i32_0 : i32, i32
  }
  func.func @transform_4(%arg0: i32) -> (i32, i32) {
    %c0_i32 = arith.constant 0 : i32
    %c0_i32_0 = arith.constant 0 : i32
    %c0_i32_1 = arith.constant 0 : i32
    return %c0_i32, %c0_i32_0 : i32, i32
  }
  func.func @transform_5(%arg0: i32) -> i32 {
    %c0_i32 = arith.constant 0 : i32
    %c0_i32_0 = arith.constant 0 : i32
    return %c0_i32 : i32
  }
  func.func @transform_6(%arg0: i32) -> i32 {
    %c0_i32 = arith.constant 0 : i32
    %c0_i32_0 = arith.constant 0 : i32
    return %c0_i32 : i32
  }
  func.func @transform_7(%arg0: i32) -> (i32, i32, i32) {
    %c0_i32 = arith.constant 0 : i32
    %c0_i32_0 = arith.constant 0 : i32
    %c0_i32_1 = arith.constant 0 : i32
    return %arg0, %c0_i32, %c0_i32_0 : i32, i32, i32
  }
}

</mosaic_0001>

<bundles_post_ra>
// kernel: tpu_custom_call.1
= control target key start
LH: loop header
LB: loop body
LE: loop exit
PB: predicated region body
PF: predicated region fallthrough
CT: control target
= control target key end

     0   :  { %s5606_s0 = inlined_call_operand.vmem [shape: f32[1088,32], index: 0, kind: input, shape index: {}]   ;;  %s5607_s1 = inlined_call_operand.vmem [shape: f32[8,8,1], index: 1, kind: input, shape index: {}]   ;;  %s5608_s2 = inlined_call_operand.vmem [shape: f32[8,1,128], index: 2, kind: input, shape index: {}]   ;;  %s5609_s3 = inlined_call_operand.vmem [shape: f32[32,128], index: 3, kind: input, shape index: {}]   ;;  %s5610_s4 = inlined_call_operand.vmem [shape: f32[1,128], index: 4, kind: input, shape index: {}]   ;;  %s5611_s5 = inlined_call_operand.vmem [shape: f32[11], index: 5, kind: input, shape index: {}]   ;;  %s5612_s6 = inlined_call_operand.<no memory space> [shape: f32[1], index: 6, kind: input, shape index: {}]   ;;  %s5613_s7 = inlined_call_operand.vmem [shape: f32[8,1,1], index: 7, kind: output, shape index: {}]  }
   0x1   :  { %12 = sst [smem:[#allocation2]] %s5612_s6 }
   0x2   :  { %13 = vsyncpa [#allocation4], 0  ;;  %s3328_s26 = smov 0  }
   0x3 LB: > { %s3334_s27 = sadd.s32 4294967295, %s3282_s26   ;;  %p2861_p0 = scmp.ge.s32.totalorder %s3282_s26, 1  ;;  %s3282_s26 = sphi %s3328_s26, %s19_s26  }
   0x4   : > { %p212_p1 = scmp.lt.s32.totalorder %s3282_s26, 3  ;;  %s230_s6 = sshll.u32 %s5611_s5, 4  ;;  %s231_s6 = int_to_ptr.vmem [resolvable:$true] %s230_s6 }
   0x5   : > { %p2975_p3 = scmp.eq.s32.totalorder %s3334_s27, 0  ;;  %s3284_s30 = smov [#allocation3]  }
   0x6   : > { %p213_p2 = pnand %p2861_p0, %p212_p1 }
   0x8   : > { %p2971_p4 = pneg %p213_p2  ;;  %272 = sbr.rel (%p213_p2) target bundleno = 965 (0x3c5), region = 48 }
   0xa   : > { %p2972_p5 = pnand %p2975_p3, %p2971_p4 }
   0xc   : > { %2974 = dma.vmem_to_smem (!%p2972_p5), %s231_s6, 16, %s3284_s30, [#allocation4]  }
   0xd   : > { %3277 = dma.done.wait (%p2975_p3), [#allocation4], 16  }
   0xe   : > { %3279 = vsyncadd (%p2975_p3), [#allocation4], 4294967280 }
   0xf   : > { %279 = sfence }
  0x10   : > { %v407_v0 = vld [vmem:[%s5609_s3 + $0x18] sm:$0xff]  ;;  %v406_v1 = vld [vmem:[%s5609_s3 + $0x10] sm:$0xff]  ;;  %s314_s12 = smul.u32 68, %s3334_s27  ;;  %v405_v2 = vld [vmem:[%s5609_s3 + $0x8] sm:$0xff]  ;;  %vm412_vm0 = vcmask 261120   ;;  %s2867_s25 = sshll.u32 %s3334_s27, 2 }
  0x11   : > { %629 = vmatpush.msra.mxu0 %v407_v0  ;;  %2959 = vmatpush.msra.mxu2 %v407_v0  ;;  %v404_v3 = vld [vmem:[%s5609_s3] sm:$0xff]  ;;  %p321_p7 = scmp.lt.s32.totalorder %s2867_s25, 7  ;;  %s5330_s10 = sld [smem:[#allocation3]] }
  0x12   : > { %2960 = vmatpush.msra.mxu3 %v407_v0  ;;  %p315_p6 = scmp.lt.s32.totalorder %s314_s12, 135  ;;  %v3464_v56 = vld [vmem:[%s5610_s4] ss:$0 sm:$0xff]  ;;  %s5333_s11 = sld [smem:[#allocation3 + $0x5]] }
  0x13   : > { %630 = vmatpush.msra.mxu0 %v406_v1  ;;  %2961 = vmatpush.msra.mxu2 %v406_v1  ;;  %s5933_s25 = smov (!%p321_p7, %s2867_s25), 7  ;;  %s2952_s13 = sld [smem:[#allocation3 + $0x6]] }
  0x14   : > { %2962 = vmatpush.msra.mxu3 %v406_v1  ;;  %s5931_s12 = smov (!%p315_p6, %s314_s12), 135  ;;  %s5261_s29 = scalar_lea.vmem %s5608_s2, %s5933_s25 }
  0x15   : > { %631 = vmatpush.msra.mxu0 %v405_v2  ;;  %2963 = vmatpush.msra.mxu2 %v405_v2  ;;  %s2866_s17 = sshll.u32 %s5931_s12, 3  ;;  %s2868_s6 = sshll.u32 %s5933_s25, 3 }
  0x16   : > { %2964 = vmatpush.msra.mxu3 %v405_v2  ;;  %s3358_s20 = scalar_lea.vmem %s5606_s0, %s2866_s17  ;;  %s5321_s9 = scalar_lea.vmem %s5607_s1, %s2868_s6 }
  0x17   : > { %632 = vmatpush.msra.mxu0 %v404_v3  ;;  %2965 = vmatpush.msra.mxu2 %v404_v3  ;;  %v336_v4 = vld [vmem:[%s3358_s20] sm:$0xff]  ;;  %v381_v6 = vld [vmem:[%s3358_s20 + $0x168] sm:$0xff]  ;;  %v382_v9 = vld [vmem:[%s3358_s20 + $0x170] sm:$0xff]  ;;  %s5335_s12 = sld [smem:[#allocation2]]  ;;  %s334_s24 = scalar_lea.vmem %s5613_s7, %s5933_s25 }
  0x18   : > { %2966 = vmatpush.msra.mxu3 %v404_v3  ;;  %v360_v5 = vld [vmem:[%s3358_s20 + $0xc0] sm:$0xff]  ;;  %2871 = vmatmul.msk.f32.vlgmr.msra.gmra.mxu0 %vm412_vm0, %v336_v4  ;;  %v337_v7 = vld [vmem:[%s3358_s20 + $0x8] sm:$0xff]  ;;  %v338_v10 = vld [vmem:[%s3358_s20 + $0x10] sm:$0xff]  ;;  %s5354_s14 = sld [smem:[#allocation3 + $0x4]] }
  0x19   : > { %2895 = vmatmul.msk.f32.vlgmr.msra.gmra.mxu2 %vm412_vm0, %v360_v5  ;;  %2916 = vmatmul.msk.f32.vlgmr.msra.gmra.mxu3 %vm412_vm0, %v381_v6  ;;  %v361_v8 = vld [vmem:[%s3358_s20 + $0xc8] sm:$0xff]  ;;  %v362_v11 = vld [vmem:[%s3358_s20 + $0xd0] sm:$0xff]  ;;  %v383_v12 = vld [vmem:[%s3358_s20 + $0x178] sm:$0xff]  ;;  %s5359_s15 = sld [smem:[#allocation3 + $0x3]] }
  0x1a   : > { %v339_v13 = vld [vmem:[%s3358_s20 + $0x18] sm:$0xff]  ;;  %v384_v15 = vld [vmem:[%s3358_s20 + $0x180] sm:$0xff]  ;;  %v385_v18 = vld [vmem:[%s3358_s20 + $0x188] sm:$0xff]  ;;  %s5369_s16 = sld [smem:[#allocation3 + $0x7]] }
  0x1b   : > { %v363_v14 = vld [vmem:[%s3358_s20 + $0xd8] sm:$0xff]  ;;  %v340_v16 = vld [vmem:[%s3358_s20 + $0x20] sm:$0xff]  ;;  %v341_v19 = vld [vmem:[%s3358_s20 + $0x28] sm:$0xff]  ;;  %s5375_s17 = sld [smem:[#allocation3 + $0x8]] }
  0x1c   : > { %v364_v17 = vld [vmem:[%s3358_s20 + $0xe0] sm:$0xff]  ;;  %v365_v20 = vld [vmem:[%s3358_s20 + $0xe8] sm:$0xff]  ;;  %v386_v21 = vld [vmem:[%s3358_s20 + $0x190] sm:$0xff]  ;;  %s5380_s18 = sld [smem:[#allocation3 + $0x1]] }
  0x1d   : > { %v342_v22 = vld [vmem:[%s3358_s20 + $0x30] sm:$0xff]  ;;  %v387_v24 = vld [vmem:[%s3358_s20 + $0x198] sm:$0xff]  ;;  %v388_v27 = vld [vmem:[%s3358_s20 + $0x1a0] sm:$0xff]  ;;  %s5383_s19 = sld [smem:[#allocation3 + $0x2]] }
  0x1e   : > { %v366_v23 = vld [vmem:[%s3358_s20 + $0xf0] sm:$0xff]  ;;  %v343_v25 = vld [vmem:[%s3358_s20 + $0x38] sm:$0xff]  ;;  %v344_v28 = vld [vmem:[%s3358_s20 + $0x40] sm:$0xff]  ;;  %s5577_s21 = sld [smem:[#allocation3 + $0xa]] }
  0x1f   : > { %v367_v26 = vld [vmem:[%s3358_s20 + $0xf8] sm:$0xff]  ;;  %v368_v29 = vld [vmem:[%s3358_s20 + $0x100] sm:$0xff]  ;;  %v389_v30 = vld [vmem:[%s3358_s20 + $0x1a8] sm:$0xff] }
  0x20   : > { %2872 = vmatmul.msk.f32.gmra.mxu0 %vm412_vm0, %v337_v7  ;;  %v345_v31 = vld [vmem:[%s3358_s20 + $0x48] sm:$0xff]  ;;  %v390_v33 = vld [vmem:[%s3358_s20 + $0x1b0] sm:$0xff]  ;;  %v391_v36 = vld [vmem:[%s3358_s20 + $0x1b8] sm:$0xff] }
  0x21   : > { %2896 = vmatmul.msk.f32.gmra.mxu2 %vm412_vm0, %v361_v8  ;;  %2917 = vmatmul.msk.f32.gmra.mxu3 %vm412_vm0, %v382_v9  ;;  %v369_v32 = vld [vmem:[%s3358_s20 + $0x108] sm:$0xff]  ;;  %v346_v34 = vld [vmem:[%s3358_s20 + $0x50] sm:$0xff]  ;;  %v347_v37 = vld [vmem:[%s3358_s20 + $0x58] sm:$0xff] }
  0x22   : > { %v370_v35 = vld [vmem:[%s3358_s20 + $0x110] sm:$0xff]  ;;  %v371_v38 = vld [vmem:[%s3358_s20 + $0x118] sm:$0xff]  ;;  %v392_v39 = vld [vmem:[%s3358_s20 + $0x1c0] sm:$0xff] }
  0x23   : > { %v348_v40 = vld [vmem:[%s3358_s20 + $0x60] sm:$0xff]  ;;  %v393_v42 = vld [vmem:[%s3358_s20 + $0x1c8] sm:$0xff]  ;;  %v394_v45 = vld [vmem:[%s3358_s20 + $0x1d0] sm:$0xff] }
  0x24   : > { %v372_v41 = vld [vmem:[%s3358_s20 + $0x120] sm:$0xff]  ;;  %v349_v43 = vld [vmem:[%s3358_s20 + $0x68] sm:$0xff]  ;;  %v350_v46 = vld [vmem:[%s3358_s20 + $0x70] sm:$0xff] }
  0x25   : > { %v373_v44 = vld [vmem:[%s3358_s20 + $0x128] sm:$0xff]  ;;  %v374_v47 = vld [vmem:[%s3358_s20 + $0x130] sm:$0xff]  ;;  %v395_v48 = vld [vmem:[%s3358_s20 + $0x1d8] sm:$0xff] }
  0x26   : > { %v351_v49 = vld [vmem:[%s3358_s20 + $0x78] sm:$0xff]  ;;  %v396_v51 = vld [vmem:[%s3358_s20 + $0x1e0] sm:$0xff]  ;;  %v397_v55 = vld [vmem:[%s3358_s20 + $0x1e8] sm:$0xff] }
  0x27   : > { %v375_v50 = vld [vmem:[%s3358_s20 + $0x138] sm:$0xff]  ;;  %v352_v53 = vld [vmem:[%s3358_s20 + $0x80] sm:$0xff]  ;;  %v353_v62 = vld [vmem:[%s3358_s20 + $0x88] sm:$0xff] }
  0x28   : > { %2873 = vmatmul.msk.f32.gmra.mxu0 %vm412_vm0, %v338_v10  ;;  %v376_v54 = vld [vmem:[%s3358_s20 + $0x140] sm:$0xff]  ;;  %v398_v63 = vld [vmem:[%s3358_s20 + $0x1f0] sm:$0xff]  ;;  %v377_v2 = vld [vmem:[%s3358_s20 + $0x148] sm:$0xff] }
  0x29   : > { %2897 = vmatmul.msk.f32.gmra.mxu2 %vm412_vm0, %v362_v11  ;;  %2918 = vmatmul.msk.f32.gmra.mxu3 %vm412_vm0, %v383_v12  ;;  %v354_v8 = vld [vmem:[%s3358_s20 + $0x90] sm:$0xff]  ;;  %v399_v9 = vld [vmem:[%s3358_s20 + $0x1f8] sm:$0xff] }
  0x2a   : > { %v378_v12 = vld [vmem:[%s3358_s20 + $0x150] sm:$0xff] }
  0x30   : > { %2874 = vmatmul.msk.f32.gmra.mxu0 %vm412_vm0, %v339_v13 }
  0x31   : > { %2898 = vmatmul.msk.f32.gmra.mxu2 %vm412_vm0, %v363_v14  ;;  %2919 = vmatmul.msk.f32.gmra.mxu3 %vm412_vm0, %v384_v15 }
  0x38   : > { %2875 = vmatmul.msk.f32.gmra.mxu0 %vm412_vm0, %v340_v16 }
  0x39   : > { %2899 = vmatmul.msk.f32.gmra.mxu2 %vm412_vm0, %v364_v17  ;;  %2920 = vmatmul.msk.f32.gmra.mxu3 %vm412_vm0, %v385_v18  ;;  %v355_v18 = vld [vmem:[%s3358_s20 + $0x98] sm:$0xff] }
  0x40   : > { %2876 = vmatmul.msk.f32.gmra.mxu0 %vm412_vm0, %v341_v19  ;;  %v400_v19 = vld [vmem:[%s3358_s20 + $0x200] sm:$0xff] }
  0x41   : > { %2900 = vmatmul.msk.f32.gmra.mxu2 %vm412_vm0, %v365_v20  ;;  %2921 = vmatmul.msk.f32.gmra.mxu3 %vm412_vm0, %v386_v21 }
  0x48   : > { %2877 = vmatmul.msk.f32.gmra.mxu0 %vm412_vm0, %v342_v22  ;;  %v379_v22 = vld [vmem:[%s3358_s20 + $0x158] sm:$0xff] }
  0x49   : > { %2901 = vmatmul.msk.f32.gmra.mxu2 %vm412_vm0, %v366_v23  ;;  %2922 = vmatmul.msk.f32.gmra.mxu3 %vm412_vm0, %v387_v24 }
  0x50   : > { %2878 = vmatmul.msk.f32.gmra.mxu0 %vm412_vm0, %v343_v25 }
  0x51   : > { %2902 = vmatmul.msk.f32.gmra.mxu2 %vm412_vm0, %v367_v26  ;;  %2923 = vmatmul.msk.f32.gmra.mxu3 %vm412_vm0, %v388_v27 }
  0x58   : > { %2879 = vmatmul.msk.f32.gmra.mxu0 %vm412_vm0, %v344_v28  ;;  %v356_v28 = vld [vmem:[%s3358_s20 + $0xa0] sm:$0xff] }
  0x59   : > { %2903 = vmatmul.msk.f32.gmra.mxu2 %vm412_vm0, %v368_v29  ;;  %2924 = vmatmul.msk.f32.gmra.mxu3 %vm412_vm0, %v389_v30  ;;  %v401_v30 = vld [vmem:[%s3358_s20 + $0x208] sm:$0xff] }
  0x60   : > { %2880 = vmatmul.msk.f32.gmra.mxu0 %vm412_vm0, %v345_v31 }
  0x61   : > { %2904 = vmatmul.msk.f32.gmra.mxu2 %vm412_vm0, %v369_v32  ;;  %2925 = vmatmul.msk.f32.gmra.mxu3 %vm412_vm0, %v390_v33  ;;  %v380_v33 = vld [vmem:[%s3358_s20 + $0x160] sm:$0xff] }
  0x68   : > { %2881 = vmatmul.msk.f32.gmra.mxu0 %vm412_vm0, %v346_v34 }
  0x69   : > { %2905 = vmatmul.msk.f32.gmra.mxu2 %vm412_vm0, %v370_v35  ;;  %2926 = vmatmul.msk.f32.gmra.mxu3 %vm412_vm0, %v391_v36 }
  0x70   : > { %2882 = vmatmul.msk.f32.gmra.mxu0 %vm412_vm0, %v347_v37 }
  0x71   : > { %2906 = vmatmul.msk.f32.gmra.mxu2 %vm412_vm0, %v371_v38  ;;  %2927 = vmatmul.msk.f32.gmra.mxu3 %vm412_vm0, %v392_v39 }
  0x78   : > { %2883 = vmatmul.msk.f32.gmra.mxu0 %vm412_vm0, %v348_v40  ;;  %v357_v40 = vld [vmem:[%s3358_s20 + $0xa8] sm:$0xff] }
  0x79   : > { %2907 = vmatmul.msk.f32.gmra.mxu2 %vm412_vm0, %v372_v41  ;;  %2928 = vmatmul.msk.f32.gmra.mxu3 %vm412_vm0, %v393_v42  ;;  %v402_v42 = vld [vmem:[%s3358_s20 + $0x210] sm:$0xff] }
  0x80   : > { %2884 = vmatmul.msk.f32.gmra.mxu0 %vm412_vm0, %v349_v43 }
  0x81   : > { %2908 = vmatmul.msk.f32.gmra.mxu2 %vm412_vm0, %v373_v44  ;;  %2929 = vmatmul.msk.f32.gmra.mxu3 %vm412_vm0, %v394_v45 }
  0x88   : > { %2885 = vmatmul.msk.f32.gmra.mxu0 %vm412_vm0, %v350_v46 }
  0x89   : > { %2909 = vmatmul.msk.f32.gmra.mxu2 %vm412_vm0, %v374_v47  ;;  %2930 = vmatmul.msk.f32.gmra.mxu3 %vm412_vm0, %v395_v48 }
  0x90   : > { %2886 = vmatmul.msk.f32.gmra.mxu0 %vm412_vm0, %v351_v49 }
  0x91   : > { %2910 = vmatmul.msk.f32.gmra.mxu2 %vm412_vm0, %v375_v50  ;;  %2931 = vmatmul.msk.f32.gmra.mxu3 %vm412_vm0, %v396_v51  ;;  %v358_v51 = vld [vmem:[%s3358_s20 + $0xb0] sm:$0xff] }
  0x95   : > { %v3456_v52 = vpop.f32.mrf.mxu0 }
  0x98   : > { %2887 = vmatmul.msk.f32.gmra.mxu0 %vm412_vm0, %v352_v53 }
  0x99   : > { %2911 = vmatmul.msk.f32.gmra.mxu2 %vm412_vm0, %v376_v54  ;;  %2932 = vmatmul.msk.f32.gmra.mxu3 %vm412_vm0, %v397_v55  ;;  %v403_v54 = vld [vmem:[%s3358_s20 + $0x218] sm:$0xff] }
  0x9c   : > { %v706_v57 = vpop.f32.mrf.mxu2  ;;  %v769_v59 = vpop.f32.mrf.mxu3 }
  0x9d   : > { %v3470_v58 = vadd.f32 %v3464_v56, %v706_v57  ;;  %v3473_v60 = vadd.f32 %v3464_v56, %v769_v59  ;;  %v3475_v61 = vpop.f32.mrf.mxu0 }
  0x9f   : > { %5683 = vst [vmem:[#allocation6_spill] sm:$0xff] %v3470_v58  ;;  %v862_v0 = vmul.f32 %v3470_v58, %v3470_v58  ;;  %v883_v1 = vmul.f32 %v3473_v60, %v3473_v60 }
  0xa0   : > { %2888 = vmatmul.msk.f32.gmra.mxu0 %vm412_vm0, %v353_v62 }
  0xa1   : > { %954 = vadd.xlane.f32.xlu2 %v862_v0  ;;  %2933 = vmatmul.msk.f32.gmra.mxu3 %vm412_vm0, %v398_v63 }
  0xa2   : > { %996 = vadd.xlane.f32.xlu0 %v883_v1  ;;  %2912 = vmatmul.msk.f32.gmra.mxu2 %vm412_vm0, %v377_v2  ;;  %v359_v2 = vld [vmem:[%s3358_s20 + $0xb8] sm:$0xff]  ;;  %s5441_s20 = sld [smem:[#allocation3 + $0x9]] }
  0xa4   : > { %v709_v3 = vpop.f32.mrf.mxu2  ;;  %v772_v5 = vpop.f32.mrf.mxu3 }
  0xa5   : > { %v3488_v4 = vadd.f32 %v3464_v56, %v709_v3  ;;  %v3491_v6 = vadd.f32 %v3464_v56, %v772_v5  ;;  %v3493_v7 = vpop.f32.mrf.mxu0 }
  0xa7   : > { %5684 = vst [vmem:[#allocation7_spill] sm:$0xff] %v3488_v4  ;;  %v863_v10 = vmul.f32 %v3488_v4, %v3488_v4  ;;  %v884_v11 = vmul.f32 %v3491_v6, %v3491_v6 }
  0xa8   : > { %2889 = vmatmul.msk.f32.gmra.mxu0 %vm412_vm0, %v354_v8 }
  0xa9   : > { %956 = vadd.xlane.f32.xlu1 %v863_v10  ;;  %2934 = vmatmul.msk.f32.gmra.mxu3 %vm412_vm0, %v399_v9 }
  0xaa   : > { %998 = vadd.xlane.f32.xlu2 %v884_v11  ;;  %2913 = vmatmul.msk.f32.gmra.mxu2 %vm412_vm0, %v378_v12 }
  0xac   : > { %v712_v13 = vpop.f32.mrf.mxu2  ;;  %v775_v15 = vpop.f32.mrf.mxu3 }
  0xad   : > { %v3506_v14 = vadd.f32 %v3464_v56, %v712_v13  ;;  %v3509_v16 = vadd.f32 %v3464_v56, %v775_v15  ;;  %v3511_v17 = vpop.f32.mrf.mxu0 }
  0xaf   : > { %5685 = vst [vmem:[#allocation8_spill] sm:$0xff] %v3506_v14  ;;  %v864_v20 = vmul.f32 %v3506_v14, %v3506_v14  ;;  %v885_v21 = vmul.f32 %v3509_v16, %v3509_v16 }
  0xb0   : > { %2890 = vmatmul.msk.f32.gmra.mxu0 %vm412_vm0, %v355_v18 }
  0xb1   : > { %958 = vadd.xlane.f32.xlu0 %v864_v20  ;;  %2935 = vmatmul.msk.f32.gmra.mxu3 %vm412_vm0, %v400_v19 }
  0xb2   : > { %1000 = vadd.xlane.f32.xlu1 %v885_v21  ;;  %2914 = vmatmul.msk.f32.gmra.mxu2 %vm412_vm0, %v379_v22 }
  0xb4   : > { %v715_v23 = vpop.f32.mrf.mxu2  ;;  %v778_v25 = vpop.f32.mrf.mxu3 }
  0xb5   : > { %v3524_v24 = vadd.f32 %v3464_v56, %v715_v23  ;;  %v3527_v26 = vadd.f32 %v3464_v56, %v778_v25  ;;  %v646_v27 = vpop.f32.mrf.mxu0 }
  0xb6   : > { %v3531_v29 = vadd.f32 %v3464_v56, %v646_v27 }
  0xb7   : > { %5686 = vst [vmem:[#allocation9_spill] sm:$0xff] %v3524_v24  ;;  %v865_v31 = vmul.f32 %v3524_v24, %v3524_v24  ;;  %v886_v32 = vmul.f32 %v3527_v26, %v3527_v26 }
  0xb8   : > { %5687 = vst [vmem:[#allocation10_spill] sm:$0xff] %v3531_v29  ;;  %v842_v34 = vmul.f32 %v3531_v29, %v3531_v29  ;;  %2891 = vmatmul.msk.f32.gmra.mxu0 %vm412_vm0, %v356_v28 }
  0xb9   : > { %960 = vadd.xlane.f32.xlu2 %v865_v31  ;;  %2936 = vmatmul.msk.f32.gmra.mxu3 %vm412_vm0, %v401_v30 }
  0xba   : > { %1002 = vadd.xlane.f32.xlu0 %v886_v32  ;;  %914 = vadd.xlane.f32.xlu1 %v842_v34 }
  0xbb   : > { %2915 = vmatmul.msk.f32.gmra.mxu2 %vm412_vm0, %v380_v33 }
  0xbc   : > { %v718_v35 = vpop.f32.mrf.mxu2  ;;  %v781_v37 = vpop.f32.mrf.mxu3 }
  0xbd   : > { %v3545_v36 = vadd.f32 %v3464_v56, %v718_v35  ;;  %v3548_v38 = vadd.f32 %v3464_v56, %v781_v37  ;;  %v649_v39 = vpop.f32.mrf.mxu0 }
  0xbe   : > { %v3552_v41 = vadd.f32 %v3464_v56, %v649_v39 }
  0xbf   : > { %5688 = vst [vmem:[#allocation11_spill] sm:$0xff] %v3545_v36  ;;  %v866_v43 = vmul.f32 %v3545_v36, %v3545_v36  ;;  %v887_v44 = vmul.f32 %v3548_v38, %v3548_v38 }
  0xc0   : > { %5689 = vst [vmem:[#allocation12_spill] sm:$0xff] %v3552_v41  ;;  %v843_v45 = vmul.f32 %v3552_v41, %v3552_v41  ;;  %2892 = vmatmul.msk.f32.gmra.mxu0 %vm412_vm0, %v357_v40 }
  0xc1   : > { %2937 = vmatmul.msk.f32.gmra.mxu3 %vm412_vm0, %v402_v42  ;;  %1004 = vadd.xlane.f32.xlu2 %v887_v44 }
  0xc2   : > { %916 = vadd.xlane.f32.xlu0 %v843_v45  ;;  %962 = vadd.xlane.f32.xlu1 %v866_v43 }
  0xc4   : > { %v721_v46 = vpop.f32.mrf.mxu2  ;;  %v784_v48 = vpop.f32.mrf.mxu3 }
  0xc5   : > { %v3564_v47 = vadd.f32 %v3464_v56, %v721_v46  ;;  %v3567_v49 = vadd.f32 %v3464_v56, %v784_v48  ;;  %v652_v50 = vpop.f32.mrf.mxu0 }
  0xc6   : > { %v3571_v53 = vadd.f32 %v3464_v56, %v652_v50 }
  0xc7   : > { %5690 = vst [vmem:[#allocation13_spill] sm:$0xff] %v3564_v47  ;;  %v867_v55 = vmul.f32 %v3564_v47, %v3564_v47  ;;  %v888_v59 = vmul.f32 %v3567_v49, %v3567_v49 }
  0xc8   : > { %5691 = vst [vmem:[#allocation14_spill] sm:$0xff] %v3571_v53  ;;  %v844_v57 = vmul.f32 %v3571_v53, %v3571_v53  ;;  %2893 = vmatmul.msk.f32.gmra.mxu0 %vm412_vm0, %v358_v51 }
  0xc9   : > { %2938 = vmatmul.msk.f32.gmra.mxu3 %vm412_vm0, %v403_v54 }
  0xca   : > { %918 = vadd.xlane.f32.xlu2 %v844_v57  ;;  %964 = vadd.xlane.f32.xlu0 %v867_v55 }
  0xcb   : > { %1006 = vadd.xlane.f32.xlu1 %v888_v59 }
  0xcc   : > { %v724_v62 = vpop.f32.mrf.mxu2  ;;  %v3585_v0 = vpop.f32.mrf.mxu3 }
  0xcd   : > { %v3583_v63 = vadd.f32 %v3464_v56, %v724_v62  ;;  %5692 = vst [vmem:[#allocation15_spill] sm:$0xff] %v3585_v0  ;;  %v655_v1 = vpop.f32.mrf.mxu0 }
  0xce   : > { %v3589_v3 = vadd.f32 %v3464_v56, %v655_v1 }
  0xcf   : > { %v868_v5 = vmul.f32 %v3583_v63, %v3583_v63 }
  0xd0   : > { %5693 = vst [vmem:[#allocation16_spill] sm:$0xff] %v3589_v3  ;;  %v845_v8 = vmul.f32 %v3589_v3, %v3589_v3  ;;  %2894 = vmatmul.msk.f32.gmra.mxu0 %vm412_vm0, %v359_v2 }
  0xd2   : > { %966 = vadd.xlane.f32.xlu2 %v868_v5 }
  0xd3   : > { %920 = vadd.xlane.f32.xlu1 %v845_v8 }
  0xd4   : > { %v727_v9 = vpop.f32.mrf.mxu2  ;;  %v3599_v11 = vpop.f32.mrf.mxu3 }
  0xd5   : > { %v3597_v10 = vadd.f32 %v3464_v56, %v727_v9  ;;  %5694 = vst [vmem:[#allocation17_spill] sm:$0xff] %v3599_v11  ;;  %v658_v12 = vpop.f32.mrf.mxu0 }
  0xd6   : > { %v3602_v13 = vadd.f32 %v3464_v56, %v658_v12 }
  0xd7   : > { %v869_v15 = vmul.f32 %v3597_v10, %v3597_v10 }
  0xd8   : > { %5695 = vst [vmem:[#allocation18_spill] sm:$0xff] %v3602_v13  ;;  %v846_v18 = vmul.f32 %v3602_v13, %v3602_v13 }
  0xda   : > { %922 = vadd.xlane.f32.xlu0 %v846_v18 }
  0xdb   : > { %968 = vadd.xlane.f32.xlu1 %v869_v15 }
  0xdc   : > { %v730_v19 = vpop.f32.mrf.mxu2  ;;  %v3611_v21 = vpop.f32.mrf.mxu3 }
  0xdd   : > { %v3609_v20 = vadd.f32 %v3464_v56, %v730_v19  ;;  %5696 = vst [vmem:[#allocation19_spill] sm:$0xff] %v3611_v21  ;;  %v661_v22 = vpop.f32.mrf.mxu0 }
  0xde   : > { %v3616_v25 = vadd.f32 %v3464_v56, %v661_v22 }
  0xdf   : > { %v870_v23 = vmul.f32 %v3609_v20, %v3609_v20 }
  0xe0   : > { %5697 = vst [vmem:[#allocation20_spill] sm:$0xff] %v3616_v25  ;;  %v847_v31 = vmul.f32 %v3616_v25, %v3616_v25 }
  0xe1   : > { %970 = vadd.xlane.f32.xlu2 %v870_v23 }
  0xe4   : > { %v733_v27 = vpop.f32.mrf.mxu2  ;;  %v3621_v30 = vpop.f32.mrf.mxu3 }
  0xe5   : > { %v3619_v28 = vadd.f32 %v3464_v56, %v733_v27  ;;  %v664_v32 = vpop.f32.mrf.mxu0 }
  0xe6   : > { %v3626_v33 = vadd.f32 %v3464_v56, %v664_v32 }
  0xe7   : > { %v871_v34 = vmul.f32 %v3619_v28, %v3619_v28 }
  0xe8   : > { %5698 = vst [vmem:[#allocation21_spill] sm:$0xff] %v3626_v33  ;;  %v848_v35 = vmul.f32 %v3626_v33, %v3626_v33 }
  0xe9   : > { %924 = vadd.xlane.f32.xlu2 %v847_v31  ;;  %972 = vadd.xlane.f32.xlu0 %v871_v34 }
  0xea   : > { %926 = vadd.xlane.f32.xlu1 %v848_v35 }
  0xec   : > { %v3632_v37 = vpop.f32.mrf.mxu2  ;;  %v3634_v39 = vpop.f32.mrf.mxu3 }
  0xed   : > { %5699 = vst [vmem:[#allocation22_spill] sm:$0xff] %v3632_v37  ;;  %v667_v40 = vpop.f32.mrf.mxu0 }
  0xee   : > { %v3637_v42 = vadd.f32 %v3464_v56, %v667_v40 }
  0xf0   : > { %5700 = vst [vmem:[#allocation23_spill] sm:$0xff] %v3637_v42  ;;  %v849_v43 = vmul.f32 %v3637_v42, %v3637_v42 }
  0xf2   : > { %928 = vadd.xlane.f32.xlu0 %v849_v43 }
  0xf4   : > { %v3641_v44 = vpop.f32.mrf.mxu2  ;;  %v3643_v45 = vpop.f32.mrf.mxu3 }
  0xf5   : > { %v670_v46 = vpop.f32.mrf.mxu0 }
  0xf6   : > { %v3646_v48 = vadd.f32 %v3464_v56, %v670_v46 }
  0xf8   : > { %5701 = vst [vmem:[#allocation24_spill] sm:$0xff] %v3646_v48  ;;  %v850_v50 = vmul.f32 %v3646_v48, %v3646_v48 }
  0xfa   : > { %930 = vadd.xlane.f32.xlu2 %v850_v50 }
  0xfc   : > { %v3650_v51 = vpop.f32.mrf.mxu2  ;;  %v3652_v54 = vpop.f32.mrf.mxu3 }
  0xfd   : > { %v673_v55 = vpop.f32.mrf.mxu0  ;;  %v3814_v24 = vadd.f32 %v3464_v56, %v3652_v54 }
  0xfe   : > { %v3655_v57 = vadd.f32 %v3464_v56, %v673_v55 }
  0xff   : > { %5725 = vst [vmem:[#allocation48_spill] sm:$0xff] %v3814_v24 }
 0x100   : > { %5702 = vst [vmem:[#allocation25_spill] sm:$0xff] %v3655_v57  ;;  %v851_v59 = vmul.f32 %v3655_v57, %v3655_v57 }
 0x102   : > { %932 = vadd.xlane.f32.xlu1 %v851_v59 }
 0x104   : > { %v3659_v62 = vpop.f32.mrf.mxu2  ;;  %v808_v1 = vpop.f32.mrf.mxu3 }
 0x105   : > { %v3662_v2 = vadd.f32 %v3464_v56, %v808_v1  ;;  %v676_v5 = vpop.f32.mrf.mxu0 }
 0x106   : > { %v3665_v8 = vadd.f32 %v3464_v56, %v676_v5 }
 0x107   : > { %5703 = vst [vmem:[#allocation26_spill] sm:$0xff] %v3662_v2  ;;  %v896_v9 = vmul.f32 %v3662_v2, %v3662_v2 }
 0x108   : > { %5704 = vst [vmem:[#allocation27_spill] sm:$0xff] %v3665_v8  ;;  %v852_v12 = vmul.f32 %v3665_v8, %v3665_v8 }
 0x109   : > { %1022 = vadd.xlane.f32.xlu2 %v896_v9 }
 0x10a   : > { %934 = vadd.xlane.f32.xlu0 %v852_v12 }
 0x10c   : > { %v3671_v15 = vpop.f32.mrf.mxu2  ;;  %v811_v18 = vpop.f32.mrf.mxu3 }
 0x10d   : > { %v3674_v19 = vadd.f32 %v3464_v56, %v811_v18  ;;  %v679_v22 = vpop.f32.mrf.mxu0 }
 0x10e   : > { %v3679_v27 = vadd.f32 %v3464_v56, %v679_v22 }
 0x10f   : > { %5705 = vst [vmem:[#allocation28_spill] sm:$0xff] %v3674_v19  ;;  %v897_v23 = vmul.f32 %v3674_v19, %v3674_v19 }
 0x110   : > { %5706 = vst [vmem:[#allocation29_spill] sm:$0xff] %v3679_v27  ;;  %v853_v35 = vmul.f32 %v3679_v27, %v3679_v27 }
 0x111   : > { %1024 = vadd.xlane.f32.xlu1 %v897_v23 }
 0x114   : > { %v751_v31 = vpop.f32.mrf.mxu2  ;;  %v814_v32 = vpop.f32.mrf.mxu3 }
 0x115   : > { %v3682_v34 = vadd.f32 %v3464_v56, %v814_v32  ;;  %v682_v40 = vpop.f32.mrf.mxu0  ;;  %v3688_v46 = vpop.xlane.xlu2 %954  ;;  %v3691_v50 = vadd.f32 %v3464_v56, %v751_v31 }
 0x116   : > { %v3705_v22 = vadd.f32 %v3464_v56, %v682_v40  ;;  %v3710_v31 = vpop.xlane.xlu0 %996 }
 0x117   : > { %5707 = vst [vmem:[#allocation30_spill] sm:$0xff] %v3682_v34  ;;  %v898_v43 = vmul.f32 %v3682_v34, %v3682_v34  ;;  %v877_v9 = vmul.f32 %v3691_v50, %v3691_v50 }
 0x118   : > { %5708 = vst [vmem:[#allocation31_spill] sm:$0xff] %v3691_v50  ;;  %v854_v40 = vmul.f32 %v3705_v22, %v3705_v22 }
 0x119   : > { %1026 = vadd.xlane.f32.xlu0 %v898_v43  ;;  %936 = vadd.xlane.f32.xlu1 %v853_v35  ;;  %5710 = vst [vmem:[#allocation33_spill] sm:$0xff] %v3705_v22 }
 0x11c   : > { %v3693_v55 = vpop.xlane.xlu1 %956  ;;  %v754_v59 = vpop.f32.mrf.mxu2 }
 0x11d   : > { %v817_v1 = vpop.f32.mrf.mxu3  ;;  %v3700_v12 = vpop.f32.mrf.mxu0  ;;  %v3708_v23 = vadd.f32 %v3464_v56, %v754_v59 }
 0x11e   : > { %v3696_v5 = vadd.f32 %v3464_v56, %v817_v1  ;;  %v3712_v32 = vpop.xlane.xlu2 %998 }
 0x11f   : > { %5711 = vst [vmem:[#allocation34_spill] sm:$0xff] %v3708_v23  ;;  %v878_v2 = vmul.f32 %v3708_v23, %v3708_v23  ;;  %vm1508_vm14 = vweird.f32 %v3712_v32 }
 0x120   : > { %5709 = vst [vmem:[#allocation32_spill] sm:$0xff] %v3696_v5  ;;  %v899_v18 = vmul.f32 %v3696_v5, %v3696_v5 }
 0x121   : > { %984 = vadd.xlane.f32.xlu0 %v877_v9 }
 0x122   : > { %1028 = vadd.xlane.f32.xlu2 %v899_v18 }
 0x124   : > { %v3732_v34 = vpop.xlane.xlu0 %958 }
 0x125   : > { %v820_v35 = vpop.f32.mrf.mxu3  ;;  %v3714_v43 = vpop.xlane.xlu1 %1000 }
 0x126   : > { %v3717_v1 = vadd.f32 %v3464_v56, %v820_v35  ;;  %v757_v9 = vpop.f32.mrf.mxu2  ;;  %v3723_v18 = vpop.f32.mrf.mxu0  ;;  %vm1518_vm11 = vweird.f32 %v3714_v43 }
 0x127   : > { %v3728_v19 = vadd.f32 %v3464_v56, %v757_v9 }
 0x128   : > { %5712 = vst [vmem:[#allocation35_spill] sm:$0xff] %v3717_v1  ;;  %v900_v59 = vmul.f32 %v3717_v1, %v3717_v1 }
 0x129   : > { %938 = vadd.xlane.f32.xlu0 %v854_v40  ;;  %5713 = vst [vmem:[#allocation36_spill] sm:$0xff] %v3728_v19  ;;  %v879_v1 = vmul.f32 %v3728_v19, %v3728_v19 }
 0x12a   : > { %986 = vadd.xlane.f32.xlu2 %v878_v2  ;;  %1030 = vadd.xlane.f32.xlu1 %v900_v59 }
 0x12c   : > { %v3730_v35 = vpop.xlane.xlu2 %960 }
 0x12d   : > { %v823_v5 = vpop.f32.mrf.mxu3  ;;  %v3737_v50 = vpop.xlane.xlu1 %914 }
 0x12e   : > { %v3735_v23 = vadd.f32 %v3464_v56, %v823_v5  ;;  %5715 = vst [vmem:[#allocation38_spill] sm:$0xff] %v3737_v50  ;;  %v760_v25 = vpop.f32.mrf.mxu2  ;;  %v3741_v2 = vpop.f32.mrf.mxu0 }
 0x12f   : > { %v3746_v9 = vadd.f32 %v3464_v56, %v760_v25 }
 0x130   : > { %5714 = vst [vmem:[#allocation37_spill] sm:$0xff] %v3735_v23  ;;  %v901_v40 = vmul.f32 %v3735_v23, %v3735_v23  ;;  %v3759_v23 = vpop.xlane.xlu0 %1002 }
 0x131   : > { %5716 = vst [vmem:[#allocation39_spill] sm:$0xff] %v3746_v9  ;;  %v880_v19 = vmul.f32 %v3746_v9, %v3746_v9  ;;  %vm1528_vm8 = vweird.f32 %v3759_v23 }
 0x132   : > { %1032 = vadd.xlane.f32.xlu0 %v901_v40  ;;  %988 = vadd.xlane.f32.xlu1 %v879_v1 }
 0x134   : > { %v3748_v13 = vpop.xlane.xlu2 %1004 }
 0x135   : > { %v826_v59 = vpop.f32.mrf.mxu3  ;;  %v3753_v33 = vpop.xlane.xlu1 %962  ;;  %2991 = vrsqrt.f32 %v3748_v13  ;;  %vm1538_vm5 = vweird.f32 %v3748_v13 }
 0x136   : > { %v3751_v5 = vadd.f32 %v3464_v56, %v826_v59  ;;  %v3757_v3 = vpop.f32.mrf.mxu0  ;;  %v763_v29 = vpop.f32.mrf.mxu2  ;;  %2993 = vrsqrt.f32 %v3759_v23 }
 0x137   : > { %v3766_v1 = vadd.f32 %v3464_v56, %v763_v29  ;;  %2995 = vrsqrt.f32 %v3714_v43 }
 0x138   : > { %5717 = vst [vmem:[#allocation40_spill] sm:$0xff] %v3751_v5  ;;  %v902_v25 = vmul.f32 %v3751_v5, %v3751_v5 }
 0x139   : > { %5718 = vst [vmem:[#allocation41_spill] sm:$0xff] %v3766_v1  ;;  %v881_v42 = vmul.f32 %v3766_v1, %v3766_v1 }
 0x13a   : > { %990 = vadd.xlane.f32.xlu0 %v880_v19  ;;  %1034 = vadd.xlane.f32.xlu2 %v902_v25  ;;  %v3782_v25 = vpop.xlane.xlu0 %916 }
 0x13b   : > { %v3768_v59 = vpop.eup %2991  ;;  %5720 = vst [vmem:[#allocation43_spill] sm:$0xff] %v3782_v25 }
 0x13c   : > { %v3778_v19 = vpop.eup %2993  ;;  %v1533_v29 = vmul.f32 %v3768_v59, %v3748_v13  ;;  %vm1539_vm2 = vweird.f32 %v3768_v59 }
 0x13d   : > { %v829_v40 = vpop.f32.mrf.mxu3  ;;  %v1523_v1 = vmul.f32 %v3778_v19, %v3759_v23  ;;  %v3794_v8 = vpop.eup %2995  ;;  %vm1529_vm6 = vweird.f32 %v3778_v19  ;;  %vm3847_vm7 = vmor %vm1538_vm5, %vm1539_vm2 }
 0x13e   : > { %v3771_v9 = vadd.f32 %v3464_v56, %v829_v40  ;;  %v1007_v53 = vpop.xlane.xlu1 %1006  ;;  %v3776_v5 = vpop.f32.mrf.mxu0  ;;  %v1534_v27 = vmul.f32 %v3768_v59, %v1533_v29  ;;  %vm3877_vm9 = vmor %vm1528_vm8, %vm1529_vm6  ;;  %vm1519_vm10 = vweird.f32 %v3794_v8 }
 0x13f   : > { %2997 = vrsqrt.f32 %v1007_v53  ;;  %v766_v41 = vpop.f32.mrf.mxu2  ;;  %v3785_v40 = vpop.xlane.xlu2 %918  ;;  %vm1548_vm3 = vweird.f32 %v1007_v53  ;;  %vm3905_vm12 = vmor %vm1518_vm11, %vm1519_vm10 }
 0x140   : > { %5719 = vst [vmem:[#allocation42_spill] sm:$0xff] %v3771_v9  ;;  %2999 = vrsqrt.f32 %v3712_v32  ;;  %v903_v48 = vmul.f32 %v3771_v9, %v3771_v9  ;;  %v3792_v57 = vadd.f32 %v3464_v56, %v766_v41  ;;  %v1535_v58 = vmul.f32 0.5, %v1534_v27 }
 0x141   : > { %5721 = vst [vmem:[#allocation44_spill] sm:$0xff] %v3785_v40  ;;  %3001 = vrsqrt.f32 %v3710_v31 }
 0x142   : > { %992 = vadd.xlane.f32.xlu2 %v881_v42  ;;  %1036 = vadd.xlane.f32.xlu1 %v903_v48  ;;  %5722 = vst [vmem:[#allocation45_spill] sm:$0xff] %v3792_v57  ;;  %v1513_v42 = vmul.f32 %v3794_v8, %v3714_v43  ;;  %v1524_v48 = vmul.f32 %v3778_v19, %v1523_v1  ;;  %v3818_v1 = vpop.xlane.xlu0 %964  ;;  %v1536_v54 = vsub.f32 1.5, %v1535_v58 }
 0x143   : > { %v882_v50 = vmul.f32 %v3792_v57, %v3792_v57 }
 0x144   : > { %v1514_v27 = vmul.f32 %v3794_v8, %v1513_v42  ;;  %v1525_v57 = vmul.f32 0.5, %v1524_v48  ;;  %v1537_v48 = vmul.f32 %v3768_v59, %v1536_v54 }
 0x145   : > { %v832_v22 = vpop.f32.mrf.mxu3  ;;  %v2998_v25 = vpop.eup %2997 }
 0x146   : > { %v3799_v40 = vadd.f32 %v3464_v56, %v832_v22  ;;  %v3801_v9 = vpop.eup %2999  ;;  %v1543_v41 = vmul.f32 %v2998_v25, %v1007_v53  ;;  %v700_v4 = vpop.f32.mrf.mxu0  ;;  %vm1549_vm1 = vweird.f32 %v2998_v25  ;;  %v1515_v42 = vmul.f32 0.5, %v1514_v27 }
 0x147   : > { %v3810_v22 = vpop.xlane.xlu1 %920  ;;  %v1503_v0 = vmul.f32 %v3801_v9, %v3712_v32  ;;  %v3820_v36 = vpop.eup %3001  ;;  %vm1550_vm4 = vmor %vm1548_vm3, %vm1549_vm1  ;;  %v3853_v53 = vadd.f32 %v3464_v56, %v3776_v5  ;;  %v1541_v54 = vsel %vm3847_vm7, %v3768_v59, %v1537_v48  ;;  %vm1509_vm13 = vweird.f32 %v3801_v9 }
 0x148   : > { %5723 = vst [vmem:[#allocation46_spill] sm:$0xff] %v3799_v40  ;;  %v904_v29 = vmul.f32 %v3799_v40, %v3799_v40  ;;  %v1544_v14 = vmul.f32 %v2998_v25, %v1543_v41  ;;  %v3823_v21 = vpop.xlane.xlu2 %966  ;;  %v3826_v41 = vadd.f32 %v3464_v56, %v700_v4  ;;  %vm3928_vm15 = vmor %vm1508_vm14, %vm1509_vm13  ;;  %vm1499_vm0 = vweird.f32 %v3820_v36 }
 0x149   : > { %5724 = vst [vmem:[#allocation47_spill] sm:$0xff] %v3810_v22  ;;  %v1504_v37 = vmul.f32 %v3801_v9, %v1503_v0  ;;  %v859_v59 = vmul.f32 %v3853_v53, %v3853_v53  ;;  %vm1498_vm1 = vweird.f32 %v3710_v31 }
 0x14a   : > { %1038 = vadd.xlane.f32.xlu0 %v904_v29  ;;  %v1545_v40 = vmul.f32 0.5, %v1544_v14  ;;  %994 = vadd.xlane.f32.xlu1 %v882_v50  ;;  %v1493_v29 = vmul.f32 %v3820_v36, %v3710_v31  ;;  %v895_v14 = vmul.f32 %v3814_v24, %v3814_v24  ;;  %v1526_v50 = vsub.f32 1.5, %v1525_v57  ;;  %vm3958_vm2 = vmor %vm1498_vm1, %vm1499_vm0 }
 0x14b   : > { %v860_v58 = vmul.f32 %v3826_v41, %v3826_v41  ;;  %v1516_v24 = vsub.f32 1.5, %v1515_v42 }
 0x14c   : > { %v1546_v11 = vsub.f32 1.5, %v1545_v40  ;;  %v1494_v0 = vmul.f32 %v3820_v36, %v1493_v29  ;;  %v1527_v5 = vmul.f32 %v3778_v19, %v1526_v50  ;;  %v3871_v29 = vadd.f32 %v3464_v56, %v3671_v15 }
 0x14d   : > { %v835_v22 = vpop.f32.mrf.mxu3  ;;  %v3844_v57 = vpop.xlane.xlu0 %922  ;;  %v1517_v42 = vmul.f32 %v3794_v8, %v1516_v24 }
 0x14e   : > { %v3829_v47 = vadd.f32 %v3464_v56, %v835_v22  ;;  %v1547_v40 = vmul.f32 %v2998_v25, %v1546_v11  ;;  %v1505_v22 = vmul.f32 0.5, %v1504_v37  ;;  %v1531_v23 = vsel %vm3877_vm9, %v3778_v19, %v1527_v5 }
 0x14f   : > { %v3855_v11 = vpop.xlane.xlu1 %968  ;;  %v876_v50 = vmul.f32 %v3871_v29, %v3871_v29  ;;  %v3903_v19 = vadd.f32 %v3464_v56, %v3511_v17  ;;  %v1521_v17 = vsel %vm3905_vm12, %v3794_v8, %v1517_v42  ;;  %vm1348_vm12 = vweird.f32 %v3823_v21 }
 0x150   : > { %5726 = vst [vmem:[#allocation49_spill] sm:$0xff] %v3829_v47  ;;  %v905_v4 = vmul.f32 %v3829_v47, %v3829_v47  ;;  %v1551_v27 = vsel %vm1550_vm4, %v2998_v25, %v1547_v40  ;;  %v3862_v25 = vadd.f32 %v3464_v56, %v3757_v3  ;;  %v1506_v3 = vsub.f32 1.5, %v1505_v22 }
 0x151   : > { %v1772_v13 = vmul.f32 %v1551_v27, %v3567_v49  ;;  %v1495_v49 = vmul.f32 0.5, %v1494_v0  ;;  %v1771_v47 = vmul.f32 %v1541_v54, %v3548_v38  ;;  %v1770_v40 = vmul.f32 %v1531_v23, %v3527_v26  ;;  %v703_v54 = vpop.f32.mrf.mxu0 }
 0x152   : > { %1040 = vadd.xlane.f32.xlu2 %v905_v4  ;;  %1020 = vadd.xlane.f32.xlu0 %v895_v14  ;;  %5729 = vst [vmem:[#allocation50_spill] sm:$0xff] %v3862_v25  ;;  %v858_v15 = vmul.f32 %v3862_v25, %v3862_v25  ;;  %v3899_v4 = vadd.f32 %v3464_v56, %v3493_v7  ;;  %vm1358_vm9 = vweird.f32 %v3855_v11 }
 0x153   : > { %950 = vadd.xlane.f32.xlu1 %v860_v58  ;;  %1830 = vmatpush.xpose.msrb.mxu3 %v1772_v13  ;;  %v1496_v24 = vsub.f32 1.5, %v1495_v49  ;;  %v1507_v0 = vmul.f32 %v3801_v9, %v1506_v3  ;;  %v3923_v22 = vadd.f32 %v3464_v56, %v3643_v45  ;;  %v1769_v27 = vmul.f32 %v1521_v17, %v3509_v16 }
 0x154   : > { %v3858_v37 = vpop.xlane.xlu2 %970  ;;  %v841_v45 = vmul.f32 %v3903_v19, %v3903_v19  ;;  %v840_v13 = vmul.f32 %v3899_v4, %v3899_v4  ;;  %v3951_v14 = vadd.f32 %v3464_v56, %v3659_v62  ;;  %v3974_v58 = vadd.f32 %v3464_v56, %v3741_v2 }
 0x155   : > { %3003 = vrsqrt.f32 %v3858_v37  ;;  %5734 = vst [vmem:[#allocation51_spill] sm:$0xff] %v3923_v22  ;;  %v1511_v49 = vsel %vm3928_vm15, %v3801_v9, %v1507_v0  ;;  %v1497_v3 = vmul.f32 %v3820_v36, %v1496_v24  ;;  %v894_v16 = vmul.f32 %v3923_v22, %v3923_v22 }
 0x156   : > { %3005 = vrsqrt.f32 %v3855_v11  ;;  %v1768_v62 = vmul.f32 %v1511_v49, %v3491_v6  ;;  %5739 = vst [vmem:[#allocation52_spill] sm:$0xff] %v3974_v58  ;;  %v875_v6 = vmul.f32 %v3951_v14, %v3951_v14  ;;  %vm1368_vm5 = vweird.f32 %v3858_v37 }
 0x157   : > { %1831 = vmatpush.xpose.msrb.mxu3 %v1771_v47  ;;  %3007 = vrsqrt.f32 %v3823_v21  ;;  %v3956_v47 = vadd.f32 %v3464_v56, %v703_v54  ;;  %v1501_v24 = vsel %vm3958_vm2, %v3820_v36, %v1497_v3  ;;  %vm1338_vm15 = vweird.f32 %v3818_v1 }
 0x158   : > { %v1767_v26 = vmul.f32 %v1501_v24, %v3473_v60  ;;  %vm1328_vm2 = vweird.f32 %v3753_v33 }
 0x15a   : > { %948 = vadd.xlane.f32.xlu2 %v859_v59  ;;  %946 = vadd.xlane.f32.xlu0 %v858_v15 }
 0x15b   : > { %v3893_v38 = vpop.eup %3003  ;;  %982 = vadd.xlane.f32.xlu1 %v876_v50  ;;  %1832 = vmatpush.xpose.msrb.mxu3 %v1770_v40 }
 0x15c   : > { %v3910_v43 = vpop.xlane.xlu0 %972  ;;  %v3912_v48 = vpop.eup %3005  ;;  %v1363_v7 = vmul.f32 %v3893_v38, %v3858_v37  ;;  %vm1369_vm6 = vweird.f32 %v3893_v38 }
 0x15d   : > { %3009 = vrsqrt.f32 %v3910_v43  ;;  %v1353_v8 = vmul.f32 %v3912_v48, %v3855_v11  ;;  %v3939_v5 = vpop.eup %3007  ;;  %vm1378_vm3 = vweird.f32 %v3910_v43  ;;  %vm4017_vm8 = vmor %vm1368_vm5, %vm1369_vm6  ;;  %vm1359_vm10 = vweird.f32 %v3912_v48 }
 0x15e   : > { %3011 = vrsqrt.f32 %v3818_v1  ;;  %v1364_v32 = vmul.f32 %v3893_v38, %v1363_v7  ;;  %v1343_v15 = vmul.f32 %v3939_v5, %v3823_v21  ;;  %v861_v7 = vmul.f32 %v3956_v47, %v3956_v47  ;;  %vm4040_vm11 = vmor %vm1358_vm9, %vm1359_vm10 }
 0x15f   : > { %1833 = vmatpush.xpose.msrb.mxu3 %v1769_v27  ;;  %3013 = vrsqrt.f32 %v3753_v33  ;;  %v1354_v23 = vmul.f32 %v3912_v48, %v1353_v8  ;;  %vm1349_vm13 = vweird.f32 %v3939_v5  ;;  %vm1318_vm5 = vweird.f32 %v3730_v35 }
 0x160   : > { %v1365_v42 = vmul.f32 0.5, %v1364_v32  ;;  %3015 = vrsqrt.f32 %v3730_v35  ;;  %v1344_v0 = vmul.f32 %v3939_v5, %v1343_v15  ;;  %vm4071_vm14 = vmor %vm1348_vm12, %vm1349_vm13 }
 0x161   : > { %v1355_v36 = vmul.f32 0.5, %v1354_v23  ;;  %3017 = vrsqrt.f32 %v3732_v34 }
 0x162   : > { %912 = vadd.xlane.f32.xlu2 %v841_v45  ;;  %910 = vadd.xlane.f32.xlu0 %v840_v13  ;;  %v1366_v8 = vsub.f32 1.5, %v1365_v42  ;;  %v3990_v45 = vadd.f32 %v3464_v56, %v3634_v39  ;;  %v857_v13 = vmul.f32 %v3974_v58, %v3974_v58  ;;  %v1345_v3 = vmul.f32 0.5, %v1344_v0 }
 0x163   : > { %v3010_v9 = vpop.eup %3009  ;;  %1018 = vadd.xlane.f32.xlu1 %v894_v16  ;;  %1834 = vmatpush.xpose.msrb.mxu3 %v1768_v62  ;;  %v1356_v16 = vsub.f32 1.5, %v1355_v36  ;;  %3019 = vrsqrt.f32 %v3693_v55  ;;  %v4048_v0 = vadd.f32 %v3464_v56, %v3621_v30 }
 0x164   : > { %v3966_v31 = vpop.eup %3011  ;;  %v1373_v50 = vmul.f32 %v3010_v9, %v3910_v43  ;;  %vm1379_vm4 = vweird.f32 %v3010_v9  ;;  %5740 = vst [vmem:[#allocation53_spill] sm:$0xff] %v3990_v45  ;;  %v3999_v43 = vadd.f32 %v3464_v56, %v3650_v51  ;;  %v1367_v15 = vmul.f32 %v3893_v38, %v1366_v8 }
 0x165   : > { %v1333_v17 = vmul.f32 %v3966_v31, %v3818_v1  ;;  %v3985_v2 = vpop.eup %3013  ;;  %vm4004_vm7 = vmor %vm1378_vm3, %vm1379_vm4  ;;  %v4013_v51 = vadd.f32 %v3464_v56, %v3475_v61  ;;  %v893_v62 = vmul.f32 %v3990_v45, %v3990_v45  ;;  %5747 = vst [vmem:[#allocation54_spill] sm:$0xff] %v4048_v0  ;;  %3021 = vrsqrt.f32 %v3688_v46  ;;  %v4087_v1 = vpop.xlane.xlu1 %926 }
 0x166   : > { %v1374_v40 = vmul.f32 %v3010_v9, %v1373_v50  ;;  %v1323_v39 = vmul.f32 %v3985_v2, %v3753_v33  ;;  %v4008_v49 = vpop.eup %3015  ;;  %v874_v24 = vmul.f32 %v3999_v43, %v3999_v43  ;;  %v1371_v11 = vsel %vm4017_vm8, %v3893_v38, %v1367_v15 }
 0x167   : > { %1835 = vmatpush.xpose.msrb.mxu3 %v1767_v26  ;;  %v1334_v54 = vmul.f32 %v3966_v31, %v1333_v17  ;;  %v1313_v61 = vmul.f32 %v4008_v49, %v3730_v35  ;;  %v4058_v26 = vadd.f32 %v3464_v56, %v3723_v18  ;;  %v1754_v30 = vmul.f32 %v1371_v11, %v3609_v20  ;;  %v5756_v11 = vld [vmem:[#allocation22_spill] sm:$0xff]  ;;  %v5760_v17 = vld [vmem:[#allocation13_spill] sm:$0xff] }
 0x168   : > { %v1375_v27 = vmul.f32 0.5, %v1374_v40  ;;  %v1324_v37 = vmul.f32 %v3985_v2, %v1323_v39  ;;  %v4034_v40 = vpop.eup %3017  ;;  %v4069_v39 = vadd.f32 %v3464_v56, %v3641_v44  ;;  %vm1339_vm0 = vweird.f32 %v3966_v31  ;;  %v5763_v18 = vld [vmem:[#allocation17_spill] sm:$0xff] }
 0x169   : > { %v1303_v38 = vmul.f32 %v4034_v40, %v3732_v34  ;;  %v1314_v36 = vmul.f32 %v4008_v49, %v1313_v61  ;;  %5748 = vst [vmem:[#allocation55_spill] sm:$0xff] %v4058_v26  ;;  %v4061_v8 = vpop.eup %3019  ;;  %v892_v20 = vmul.f32 %v4048_v0, %v4048_v0  ;;  %v856_v32 = vmul.f32 %v4058_v26, %v4058_v26  ;;  %vm4093_vm1 = vmor %vm1338_vm15, %vm1339_vm0 }
 0x16a   : > { %980 = vadd.xlane.f32.xlu2 %v875_v6  ;;  %v1376_v60 = vsub.f32 1.5, %v1375_v27  ;;  %952 = vadd.xlane.f32.xlu0 %v861_v7  ;;  %v1335_v6 = vmul.f32 0.5, %v1334_v54  ;;  %v1346_v7 = vsub.f32 1.5, %v1345_v3  ;;  %v1325_v27 = vmul.f32 0.5, %v1324_v37  ;;  %5749 = vst [vmem:[#allocation56_spill] sm:$0xff] %v4069_v39 }
 0x16b   : > { %944 = vadd.xlane.f32.xlu1 %v857_v13  ;;  %v1304_v54 = vmul.f32 %v4034_v40, %v1303_v38  ;;  %v4085_v3 = vpop.eup %3021  ;;  %vm1329_vm3 = vweird.f32 %v3985_v2  ;;  %v4110_v37 = vadd.f32 %v3464_v56, %v3700_v12  ;;  %vm1319_vm6 = vweird.f32 %v4008_v49 }
 0x16c   : > { %v1377_v59 = vmul.f32 %v3010_v9, %v1376_v60  ;;  %v1336_v13 = vsub.f32 1.5, %v1335_v6  ;;  %v1347_v60 = vmul.f32 %v3939_v5, %v1346_v7  ;;  %v4113_v6 = vpop.xlane.xlu0 %928  ;;  %vm4123_vm4 = vmor %vm1328_vm2, %vm1329_vm3  ;;  %vm1308_vm8 = vweird.f32 %v3732_v34 }
 0x16d   : > { %5755 = vst [vmem:[#allocation58_spill] sm:$0xff] %v4110_v37  ;;  %vm1309_vm9 = vweird.f32 %v4034_v40  ;;  %vm1299_vm12 = vweird.f32 %v4061_v8  ;;  %vm1289_vm15 = vweird.f32 %v4085_v3 }
 0x16e   : > { %v1381_v42 = vsel %vm4004_vm7, %v3010_v9, %v1377_v59  ;;  %v1357_v9 = vmul.f32 %v3912_v48, %v1356_v16  ;;  %v1315_v16 = vmul.f32 0.5, %v1314_v36  ;;  %v1326_v59 = vsub.f32 1.5, %v1325_v27  ;;  %vm4141_vm7 = vmor %vm1318_vm5, %vm1319_vm6 }
 0x16f   : > { %v1755_v50 = vmul.f32 %v1381_v42, %v3619_v28  ;;  %v839_v28 = vmul.f32 %v4013_v51, %v4013_v51  ;;  %v1351_v15 = vsel %vm4071_vm14, %v3939_v5, %v1347_v60  ;;  %v1337_v23 = vmul.f32 %v3966_v31, %v1336_v13  ;;  %vm4174_vm10 = vmor %vm1308_vm8, %vm1309_vm9 }
 0x170   : > { %v1361_v21 = vsel %vm4040_vm11, %v3912_v48, %v1357_v9  ;;  %v1293_v48 = vmul.f32 %v4061_v8, %v3693_v55  ;;  %v4101_v42 = vadd.f32 %v3464_v56, %v3456_v52  ;;  %v1283_v5 = vmul.f32 %v4085_v3, %v3688_v46 }
 0x171   : > { %1810 = vmatpush.xpose.msrb.mxu2 %v1755_v50  ;;  %v1753_v44 = vmul.f32 %v1361_v21, %v3597_v10  ;;  %v873_v10 = vmul.f32 %v4069_v39, %v4069_v39  ;;  %v1752_v50 = vmul.f32 %v1351_v15, %v3583_v63  ;;  %v1316_v52 = vsub.f32 1.5, %v1315_v16 }
 0x172   : > { %1016 = vadd.xlane.f32.xlu2 %v893_v62  ;;  %978 = vadd.xlane.f32.xlu0 %v874_v24  ;;  %5754 = vst [vmem:[#allocation57_spill] sm:$0xff] %v4101_v42  ;;  %v1294_v61 = vmul.f32 %v4061_v8, %v1293_v48  ;;  %v1305_v24 = vmul.f32 0.5, %v1304_v54  ;;  %v1341_v33 = vsel %vm4093_vm1, %v3966_v31, %v1337_v23  ;;  %v4157_v54 = vpop.xlane.xlu2 %924  ;;  %vm1298_vm11 = vweird.f32 %v3693_v55 }
 0x173   : > { %908 = vadd.xlane.f32.xlu1 %v839_v28  ;;  %v1327_v7 = vmul.f32 %v3985_v2, %v1326_v59  ;;  %v4121_v9 = vadd.f32 %v3464_v56, %v5756_v11  ;;  %v1284_v63 = vmul.f32 %v4085_v3, %v1283_v5  ;;  %v1751_v28 = vmul.f32 %v1341_v33, %v5760_v17  ;;  %vm1300_vm13 = vmor %vm1298_vm11, %vm1299_vm12 }
 0x174   : > { %v855_v31 = vmul.f32 %v4110_v37, %v4110_v37  ;;  %v838_v38 = vmul.f32 %v4101_v42, %v4101_v42  ;;  %v1295_v36 = vmul.f32 0.5, %v1294_v61  ;;  %v1317_v13 = vmul.f32 %v4008_v49, %v1316_v52 }
 0x175   : > { %1811 = vmatpush.xpose.msrb.mxu2 %v1754_v30  ;;  %5757 = vst [vmem:[#allocation22_spill] sm:$0xff] %v4121_v9  ;;  %v1306_v30 = vsub.f32 1.5, %v1305_v24  ;;  %v4135_v27 = vpop.xlane.xlu1 %932  ;;  %v1331_v35 = vsel %vm4123_vm4, %v3985_v2, %v1327_v7  ;;  %v872_v60 = vmul.f32 %v4121_v9, %v4121_v9  ;;  %v5765_v2 = vld [vmem:[#allocation19_spill] sm:$0xff]  ;;  %v1285_v16 = vmul.f32 0.5, %v1284_v63  ;;  %v5774_v63 = vld [vmem:[#allocation8_spill] sm:$0xff] }
 0x176   : > { %v4155_v48 = vadd.f32 %v3464_v56, %v5765_v2  ;;  %v1296_v59 = vsub.f32 1.5, %v1295_v36  ;;  %v1321_v23 = vsel %vm4141_vm7, %v4008_v49, %v1317_v13  ;;  %v5772_v49 = vld [vmem:[#allocation9_spill] sm:$0xff]  ;;  %vm1288_vm14 = vweird.f32 %v3688_v46  ;;  %v5778_v13 = vld [vmem:[#allocation6_spill] sm:$0xff]  ;;  %v5780_v2 = vld [vmem:[#allocation43_spill] sm:$0xff] }
 0x177   : > { %v1307_v62 = vmul.f32 %v4034_v40, %v1306_v30  ;;  %v1286_v52 = vsub.f32 1.5, %v1285_v16  ;;  %vm1290_vm0 = vmor %vm1288_vm14, %vm1289_vm15  ;;  %vm1098_vm4 = vweird.f32 %v5780_v2 }
 0x178   : > { %5766 = vst [vmem:[#allocation17_spill] sm:$0xff] %v4155_v48  ;;  %v891_v24 = vmul.f32 %v4155_v48, %v4155_v48  ;;  %v1297_v11 = vmul.f32 %v4061_v8, %v1296_v59 }
 0x179   : > { %1812 = vmatpush.xpose.msrb.mxu2 %v1753_v44  ;;  %v5767_v44 = vld [vmem:[#allocation11_spill] sm:$0xff]  ;;  %v1311_v7 = vsel %vm4174_vm10, %v4034_v40, %v1307_v62 }
 0x17a   : > { %942 = vadd.xlane.f32.xlu2 %v856_v32  ;;  %1014 = vadd.xlane.f32.xlu0 %v892_v20  ;;  %v4151_v20 = vadd.f32 %v3464_v56, %v5763_v18  ;;  %v1750_v32 = vmul.f32 %v1331_v35, %v5767_v44  ;;  %v3255_v56 = vld [vmem:[%s5610_s4] ss:$0 sm:$0xff]  ;;  %v4195_v12 = vpop.xlane.xlu2 %930  ;;  %v1748_v17 = vmul.f32 %v1311_v7, %v5774_v63 }
 0x17b   : > { %976 = vadd.xlane.f32.xlu1 %v873_v10  ;;  %v5768_v10 = vld [vmem:[#allocation15_spill] sm:$0xff]  ;;  %v1301_v40 = vsel %vm1300_vm13, %v4061_v8, %v1297_v11  ;;  %v5779_v8 = vld [vmem:[#allocation38_spill] sm:$0xff] }
 0x17c   : > { %5764 = vst [vmem:[#allocation13_spill] sm:$0xff] %v4151_v20  ;;  %v4170_v5 = vadd.f32 %v3255_v56, %v5768_v10  ;;  %v890_v34 = vmul.f32 %v4151_v20, %v4151_v20  ;;  %v5782_v10 = vld [vmem:[#allocation44_spill] sm:$0xff]  ;;  %vm1088_vm1 = vweird.f32 %v5779_v8 }
 0x17d   : > { %1813 = vmatpush.xpose.msrb.mxu2 %v1752_v50  ;;  %v4160_v15 = vpop.xlane.xlu0 %934  ;;  %v1749_v50 = vmul.f32 %v1321_v23, %v5772_v49  ;;  %vm1108_vm13 = vweird.f32 %v5782_v10 }
 0x17e   : > { %5769 = vst [vmem:[#allocation19_spill] sm:$0xff] %v4170_v5  ;;  %v889_v55 = vmul.f32 %v4170_v5, %v4170_v5  ;;  %vm1188_vm10 = vweird.f32 %v4160_v15 }
 0x181   : > { %1814 = vmatpush.xpose.msrb.mxu2 %v1751_v28 }
 0x182   : > { %906 = vadd.xlane.f32.xlu2 %v838_v38  ;;  %940 = vadd.xlane.f32.xlu0 %v855_v31  ;;  %v1287_v31 = vmul.f32 %v4085_v3, %v1286_v52  ;;  %v5776_v38 = vld [vmem:[#allocation7_spill] sm:$0xff]  ;;  %v4206_v35 = vpop.xlane.xlu2 %1022 }
 0x183   : > { %974 = vadd.xlane.f32.xlu1 %v872_v60  ;;  %v1747_v36 = vmul.f32 %v1301_v40, %v5776_v38  ;;  %5777 = vst [vmem:[#allocation9_spill] sm:$0xff] %v4206_v35 }
 0x184   : > { %v4183_v33 = vpop.xlane.xlu1 %1024  ;;  %v1291_v46 = vsel %vm1290_vm0, %v4085_v3, %v1287_v31  ;;  %vm1178_vm0 = vweird.f32 %v4135_v27 }
 0x185   : > { %1815 = vmatpush.xpose.msrb.mxu2 %v1750_v32  ;;  %5773 = vst [vmem:[#allocation11_spill] sm:$0xff] %v4183_v33  ;;  %v1746_v21 = vmul.f32 %v1291_v46, %v5778_v13 }
 0x189   : > { %1816 = vmatpush.xpose.msrb.mxu2 %v1749_v50 }
 0x18a   : > { %1012 = vadd.xlane.f32.xlu2 %v891_v24  ;;  %1010 = vadd.xlane.f32.xlu0 %v890_v34  ;;  %v5784_v34 = vld [vmem:[#allocation47_spill] sm:$0xff] }
 0x18b   : > { %1008 = vadd.xlane.f32.xlu1 %v889_v55 }
 0x18c   : > { %v4198_v28 = vpop.xlane.xlu0 %1026  ;;  %v4204_v30 = vpop.xlane.xlu1 %936 }
 0x18d   : > { %5775 = vst [vmem:[#allocation15_spill] sm:$0xff] %v4198_v28  ;;  %1817 = vmatpush.xpose.msrb.mxu2 %v1748_v17  ;;  %3023 = vrsqrt.f32 %v4204_v30  ;;  %vm1198_vm5 = vweird.f32 %v4204_v30 }
 0x18e   : > { %3025 = vrsqrt.f32 %v4160_v15 }
 0x18f   : > { %3027 = vrsqrt.f32 %v5779_v8 }
 0x190   : > { %3029 = vrsqrt.f32 %v5780_v2 }
 0x191   : > { %1818 = vmatpush.xpose.msrb.mxu2 %v1747_v36  ;;  %3031 = vrsqrt.f32 %v4135_v27 }
 0x193   : > { %v4214_v18 = vpop.eup %3023 }
 0x194   : > { %v4209_v60 = vpop.xlane.xlu0 %984  ;;  %v4222_v32 = vpop.eup %3025  ;;  %v1193_v16 = vmul.f32 %v4214_v18, %v4204_v30  ;;  %vm1199_vm6 = vweird.f32 %v4214_v18 }
 0x195   : > { %1819 = vmatpush.xpose.msrb.mxu2 %v1746_v21  ;;  %v4217_v3 = vpop.xlane.xlu2 %1028  ;;  %v4227_v59 = vpop.eup %3027  ;;  %v1183_v62 = vmul.f32 %v4222_v32, %v4160_v15  ;;  %vm1189_vm11 = vweird.f32 %v4222_v32  ;;  %vm4308_vm12 = vmor %vm1198_vm5, %vm1199_vm6  ;;  %vm1118_vm6 = vweird.f32 %v5784_v34 }
 0x196   : > { %5781 = vst [vmem:[#allocation8_spill] sm:$0xff] %v4217_v3  ;;  %v4230_v23 = vpop.eup %3029  ;;  %v1194_v61 = vmul.f32 %v4214_v18, %v1193_v16  ;;  %v1083_v49 = vmul.f32 %v4227_v59, %v5779_v8  ;;  %vm1089_vm2 = vweird.f32 %v4227_v59  ;;  %vm4326_vm14 = vmor %vm1188_vm10, %vm1189_vm11  ;;  %vm1158_vm10 = vweird.f32 %v4113_v6 }
 0x197   : > { %v4234_v56 = vpop.eup %3031  ;;  %v1093_v24 = vmul.f32 %v4230_v23, %v5780_v2  ;;  %v1184_v11 = vmul.f32 %v4222_v32, %v1183_v62  ;;  %vm1099_vm8 = vweird.f32 %v4230_v23  ;;  %vm4349_vm5 = vmor %vm1088_vm1, %vm1089_vm2 }
 0x198   : > { %v1173_v7 = vmul.f32 %v4234_v56, %v4135_v27  ;;  %v1195_v40 = vmul.f32 0.5, %v1194_v61  ;;  %v1084_v31 = vmul.f32 %v4227_v59, %v1083_v49  ;;  %vm4373_vm2 = vmor %vm1098_vm4, %vm1099_vm8 }
 0x199   : > { %v1094_v46 = vmul.f32 %v4230_v23, %v1093_v24  ;;  %v1185_v62 = vmul.f32 0.5, %v1184_v11 }
 0x19a   : > { %v1174_v16 = vmul.f32 %v4234_v56, %v1173_v7  ;;  %v1196_v61 = vsub.f32 1.5, %v1195_v40 }
 0x19b   : > { %v1095_v0 = vmul.f32 0.5, %v1094_v46 }
 0x19c   : > { %v4220_v44 = vpop.xlane.xlu0 %938  ;;  %v1197_v9 = vmul.f32 %v4214_v18, %v1196_v61 }
 0x19d   : > { %3033 = vrsqrt.f32 %v4220_v44  ;;  %v4243_v52 = vpop.xlane.xlu1 %1030  ;;  %v4249_v55 = vpop.xlane.xlu2 %986  ;;  %vm1208_vm7 = vweird.f32 %v4220_v44  ;;  %v1096_v42 = vsub.f32 1.5, %v1095_v0  ;;  %v5787_v0 = vld [vmem:[#allocation33_spill] sm:$0xff] }
 0x19e   : > { %3035 = vrsqrt.f32 %v4195_v12  ;;  %5783 = vst [vmem:[#allocation7_spill] sm:$0xff] %v4243_v52 }
 0x19f   : > { %3037 = vrsqrt.f32 %v5782_v10 }
 0x1a0   : > { %3039 = vrsqrt.f32 %v4113_v6 }
 0x1a1   : > { %3041 = vrsqrt.f32 %v5784_v34 }
 0x1a2   : > { %3043 = vrsqrt.f32 %v3844_v57 }
 0x1a3   : > { %v3034_v50 = vpop.eup %3033  ;;  %3045 = vrsqrt.f32 %v4087_v1 }
 0x1a4   : > { %v1203_v63 = vmul.f32 %v3034_v50, %v4220_v44  ;;  %v4252_v17 = vpop.eup %3035  ;;  %3047 = vrsqrt.f32 %v4157_v54  ;;  %vm1209_vm3 = vweird.f32 %v3034_v50 }
 0x1a5   : > { %v4256_v36 = vpop.eup %3037  ;;  %v1163_v21 = vmul.f32 %v4252_v17, %v4195_v12  ;;  %v4270_v20 = vpop.xlane.xlu0 %1032  ;;  %vm1210_vm9 = vmor %vm1208_vm7, %vm1209_vm3  ;;  %vm1179_vm3 = vweird.f32 %v4234_v56  ;;  %vm1168_vm7 = vweird.f32 %v4195_v12 }
 0x1a6   : > { %v1204_v38 = vmul.f32 %v3034_v50, %v1203_v63  ;;  %v4260_v13 = vpop.eup %3039  ;;  %v1085_v63 = vmul.f32 0.5, %v1084_v31  ;;  %v1103_v7 = vmul.f32 %v4256_v36, %v5782_v10  ;;  %v1175_v31 = vmul.f32 0.5, %v1174_v16  ;;  %v4287_v46 = vpop.xlane.xlu1 %988  ;;  %vm4364_vm1 = vmor %vm1178_vm0, %vm1179_vm3 }
 0x1a7   : > { %v4266_v49 = vpop.eup %3041  ;;  %v1153_v11 = vmul.f32 %v4260_v13, %v4113_v6  ;;  %v1164_v40 = vmul.f32 %v4252_v17, %v1163_v21  ;;  %vm1109_vm15 = vweird.f32 %v4256_v36  ;;  %vm1159_vm11 = vweird.f32 %v4260_v13 }
 0x1a8   : > { %v1205_v5 = vmul.f32 0.5, %v1204_v38  ;;  %v4272_v48 = vpop.eup %3043  ;;  %v1186_v38 = vsub.f32 1.5, %v1185_v62  ;;  %v1086_v37 = vsub.f32 1.5, %v1085_v63  ;;  %v1113_v21 = vmul.f32 %v4266_v49, %v5784_v34 }
 0x1a9   : > { %v4283_v45 = vpop.eup %3045  ;;  %v1123_v16 = vmul.f32 %v4272_v48, %v3844_v57  ;;  %v1104_v61 = vmul.f32 %v4256_v36, %v1103_v7  ;;  %v1165_v58 = vmul.f32 0.5, %v1164_v40  ;;  %v1176_v25 = vsub.f32 1.5, %v1175_v31 }
 0x1aa   : > { %v1206_v24 = vsub.f32 1.5, %v1205_v5  ;;  %v4296_v62 = vpop.eup %3047  ;;  %v1143_v63 = vmul.f32 %v4283_v45, %v4087_v1  ;;  %v1114_v7 = vmul.f32 %v4266_v49, %v1113_v21  ;;  %v4334_v26 = vmul.f32 %v4227_v59, %v1086_v37 }
 0x1ab   : > { %v1124_v30 = vmul.f32 %v4272_v48, %v1123_v16  ;;  %vm1119_vm8 = vweird.f32 %v4266_v49  ;;  %vm1129_vm0 = vweird.f32 %v4272_v48  ;;  %vm1148_vm3 = vweird.f32 %v4087_v1 }
 0x1ac   : > { %v1207_v22 = vmul.f32 %v3034_v50, %v1206_v24  ;;  %v1154_v24 = vmul.f32 %v4260_v13, %v1153_v11  ;;  %v1133_v11 = vmul.f32 %v4296_v62, %v4157_v54  ;;  %v1091_v2 = vsel %vm4349_vm5, %v4227_v59, %v4334_v26  ;;  %v5824_v59 = vld [vmem:[#allocation18_spill] sm:$0xff] }
 0x1ad   : > { %v4281_v5 = vpop.xlane.xlu2 %1034  ;;  %v4337_v31 = vpop.xlane.xlu0 %990  ;;  %vm1438_vm5 = vweird.f32 %v4209_v60 }
 0x1ae   : > { %v1211_v44 = vsel %vm1210_vm9, %v3034_v50, %v1207_v22  ;;  %v1201_v22 = vsel %vm4308_vm12, %v4214_v18, %v1197_v9  ;;  %v1187_v50 = vmul.f32 %v4222_v32, %v1186_v38  ;;  %v1105_v9 = vmul.f32 0.5, %v1104_v61  ;;  %v5790_v38 = vld [vmem:[#allocation29_spill] sm:$0xff] }
 0x1af   : > { %v1738_v39 = vmul.f32 %v1211_v44, %v5787_v0  ;;  %v1144_v18 = vmul.f32 %v4283_v45, %v1143_v63  ;;  %v1737_v21 = vmul.f32 %v1201_v22, %v5790_v38  ;;  %v1155_v37 = vmul.f32 0.5, %v1154_v24 }
 0x1b0   : > { %v1166_v44 = vsub.f32 1.5, %v1165_v58  ;;  %v1191_v63 = vsel %vm4326_vm14, %v4222_v32, %v1187_v50  ;;  %v1177_v0 = vmul.f32 %v4234_v56, %v1176_v25  ;;  %v1125_v22 = vmul.f32 0.5, %v1124_v30  ;;  %v5797_v32 = vld [vmem:[#allocation27_spill] sm:$0xff]  ;;  %vm4417_vm14 = vmor %vm1108_vm13, %vm1109_vm15 }
 0x1b1   : > { %1790 = vmatpush.xpose.msra.mxu1 %v1738_v39  ;;  %v4343_v39 = vmul.f32 %v4230_v23, %v1096_v42  ;;  %v1115_v42 = vmul.f32 0.5, %v1114_v7  ;;  %v1134_v38 = vmul.f32 %v4296_v62, %v1133_v11  ;;  %vm1169_vm9 = vweird.f32 %v4252_v17  ;;  %vm4432_vm13 = vmor %vm1158_vm10, %vm1159_vm11 }
 0x1b2   : > { %v1106_v58 = vsub.f32 1.5, %v1105_v9  ;;  %v1145_v27 = vmul.f32 0.5, %v1144_v18  ;;  %v1736_v24 = vmul.f32 %v1191_v63, %v5797_v32  ;;  %v1156_v50 = vsub.f32 1.5, %v1155_v37  ;;  %vm4391_vm4 = vmor %vm1168_vm7, %vm1169_vm9  ;;  %v5800_v37 = vld [vmem:[#allocation25_spill] sm:$0xff] }
 0x1b3   : > { %v1181_v12 = vsel %vm4364_vm1, %v4234_v56, %v1177_v0  ;;  %v1167_v7 = vmul.f32 %v4252_v17, %v1166_v44  ;;  %v1116_v30 = vsub.f32 1.5, %v1115_v42  ;;  %v1126_v11 = vsub.f32 1.5, %v1125_v22  ;;  %vm4445_vm15 = vmor %vm1118_vm6, %vm1119_vm8 }
 0x1b4   : > { %v1135_v40 = vmul.f32 0.5, %v1134_v38  ;;  %v1101_v18 = vsel %vm4373_vm2, %v4230_v23, %v4343_v39  ;;  %vm1128_vm12 = vweird.f32 %v3844_v57  ;;  %v1735_v44 = vmul.f32 %v1181_v12, %v5800_v37  ;;  %v5810_v12 = vld [vmem:[#allocation12_spill] sm:$0xff] }
 0x1b5   : > { %v4339_v15 = vpop.xlane.xlu2 %992  ;;  %v4353_v61 = vpop.xlane.xlu1 %1036  ;;  %1791 = vmatpush.xpose.msra.mxu1 %v1737_v21  ;;  %v1107_v23 = vmul.f32 %v4256_v36, %v1106_v58  ;;  %v1146_v0 = vsub.f32 1.5, %v1145_v27  ;;  %v1171_v22 = vsel %vm4391_vm4, %v4252_v17, %v1167_v7  ;;  %v1157_v38 = vmul.f32 %v4260_v13, %v1156_v50  ;;  %vm4458_vm2 = vmor %vm1128_vm12, %vm1129_vm0 }
 0x1b6   : > { %3049 = vrsqrt.f32 %v4339_v15  ;;  %v1136_v8 = vsub.f32 1.5, %v1135_v40  ;;  %v1127_v25 = vmul.f32 %v4272_v48, %v1126_v11  ;;  %v1117_v58 = vmul.f32 %v4266_v49, %v1116_v30 }
 0x1b7   : > { %3051 = vrsqrt.f32 %v4209_v60  ;;  %vm1149_vm1 = vweird.f32 %v4283_v45  ;;  %v4467_v7 = vmul.f32 %v1101_v18, %v5810_v12  ;;  %vm1138_vm6 = vweird.f32 %v4157_v54  ;;  %v5819_v12 = vld [vmem:[#allocation10_spill] sm:$0xff] }
 0x1b8   : > { %3053 = vrsqrt.f32 %v4337_v31  ;;  %v1161_v57 = vsel %vm4432_vm13, %v4260_v13, %v1157_v38  ;;  %v1147_v11 = vmul.f32 %v4283_v45, %v1146_v0  ;;  %vm1139_vm7 = vweird.f32 %v4296_v62  ;;  %vm4484_vm9 = vmor %vm1148_vm3, %vm1149_vm1 }
 0x1b9   : > { %1792 = vmatpush.xpose.msra.mxu1 %v1736_v24  ;;  %3055 = vrsqrt.f32 %v4249_v55  ;;  %v5809_v24 = vld [vmem:[#allocation24_spill] sm:$0xff]  ;;  %v1137_v13 = vmul.f32 %v4296_v62, %v1136_v8  ;;  %v1131_v1 = vsel %vm4458_vm2, %v4272_v48, %v1127_v25  ;;  %v1121_v0 = vsel %vm4445_vm15, %v4266_v49, %v1117_v58  ;;  %v5813_v48 = vld [vmem:[#allocation23_spill] sm:$0xff]  ;;  %vm4519_vm4 = vmor %vm1138_vm6, %vm1139_vm7 }
 0x1ba   : > { %3057 = vrsqrt.f32 %v4287_v46  ;;  %v1734_v50 = vmul.f32 %v1171_v22, %v5809_v24  ;;  %v1111_v22 = vsel %vm4417_vm14, %v4256_v36, %v1107_v23  ;;  %v1733_v25 = vmul.f32 %v1161_v57, %v5813_v48  ;;  %v5818_v24 = vld [vmem:[#allocation14_spill] sm:$0xff]  ;;  %v5823_v48 = vld [vmem:[#allocation21_spill] sm:$0xff] }
 0x1bb   : > { %v1151_v58 = vsel %vm4484_vm9, %v4283_v45, %v1147_v11  ;;  %v4548_v57 = vmul.f32 %v1091_v2, %v5819_v12  ;;  %v1730_v26 = vmul.f32 %v1131_v1, %v5824_v59  ;;  %vm1448_vm12 = vweird.f32 %v4249_v55 }
 0x1bc   : > { %v4403_v56 = vpop.eup %3049  ;;  %vm1478_vm14 = vweird.f32 %v4339_v15  ;;  %vm1468_vm3 = vweird.f32 %v4337_v31  ;;  %vm1458_vm7 = vweird.f32 %v4287_v46 }
 0x1bd   : > { %v4407_v21 = vpop.xlane.xlu0 %1038  ;;  %v4411_v39 = vpop.eup %3051  ;;  %1793 = vmatpush.xpose.msra.mxu1 %v1735_v44  ;;  %v1473_v6 = vmul.f32 %v4403_v56, %v4339_v15  ;;  %vm1479_vm0 = vweird.f32 %v4403_v56 }
 0x1be   : > { %v4422_v42 = vpop.xlane.xlu1 %994  ;;  %v4439_v27 = vpop.eup %3053  ;;  %v1433_v34 = vmul.f32 %v4411_v39, %v4209_v60  ;;  %vm1439_vm8 = vweird.f32 %v4411_v39  ;;  %vm4628_vm2 = vmor %vm1478_vm14, %vm1479_vm0 }
 0x1bf   : > { %3059 = vrsqrt.f32 %v4422_v42  ;;  %v4469_v30 = vpop.eup %3055  ;;  %v1463_v18 = vmul.f32 %v4439_v27, %v4337_v31  ;;  %v1474_v37 = vmul.f32 %v4403_v56, %v1473_v6  ;;  %vm1488_vm10 = vweird.f32 %v4422_v42  ;;  %vm4648_vm6 = vmor %vm1438_vm5, %vm1439_vm8 }
 0x1c0   : > { %3061 = vrsqrt.f32 %v4206_v35  ;;  %v4477_v40 = vpop.eup %3057  ;;  %v1434_v8 = vmul.f32 %v4411_v39, %v1433_v34  ;;  %v1443_v10 = vmul.f32 %v4469_v30, %v4249_v55  ;;  %v1141_v34 = vsel %vm4519_vm4, %v4296_v62, %v1137_v13  ;;  %v5843_v55 = vld [vmem:[#allocation39_spill] sm:$0xff] }
 0x1c1   : > { %3063 = vrsqrt.f32 %v4183_v33  ;;  %1794 = vmatpush.xpose.msra.mxu1 %v1734_v50  ;;  %v1453_v49 = vmul.f32 %v4477_v40, %v4287_v46  ;;  %v1464_v54 = vmul.f32 %v4439_v27, %v1463_v18  ;;  %v4540_v50 = vmul.f32 %v1111_v22, %v5818_v24  ;;  %v5821_v18 = vld [vmem:[#allocation16_spill] sm:$0xff] }
 0x1c2   : > { %3065 = vrsqrt.f32 %v4198_v28  ;;  %v1475_v11 = vmul.f32 0.5, %v1474_v37  ;;  %v4555_v62 = vmul.f32 %v1121_v0, %v5821_v18  ;;  %v1435_v22 = vmul.f32 0.5, %v1434_v8 }
 0x1c3   : > { %3067 = vrsqrt.f32 %v4217_v3  ;;  %v1444_v16 = vmul.f32 %v4469_v30, %v1443_v10  ;;  %v1454_v37 = vmul.f32 %v4477_v40, %v1453_v49  ;;  %v1465_v1 = vmul.f32 0.5, %v1464_v54 }
 0x1c4   : > { %3069 = vrsqrt.f32 %v4270_v20  ;;  %v1436_v18 = vsub.f32 1.5, %v1435_v22  ;;  %vm1449_vm13 = vweird.f32 %v4469_v30  ;;  %vm1469_vm1 = vweird.f32 %v4439_v27 }
 0x1c5   : > { %v4493_v44 = vpop.xlane.xlu2 %1040  ;;  %v4504_v38 = vpop.eup %3059  ;;  %3071 = vrsqrt.f32 %v4281_v5  ;;  %1795 = vmatpush.xpose.msra.mxu1 %v1733_v25  ;;  %v1732_v25 = vmul.f32 %v1151_v58, %v5823_v48  ;;  %v1445_v48 = vmul.f32 0.5, %v1444_v16  ;;  %v1466_v16 = vsub.f32 1.5, %v1465_v1  ;;  %vm4676_vm4 = vmor %vm1468_vm3, %vm1469_vm1 }
 0x1c6   : > { %v4510_v6 = vpop.xlane.xlu0 %1020  ;;  %v4513_v32 = vpop.eup %3061  ;;  %v1483_v23 = vmul.f32 %v4504_v38, %v4422_v42  ;;  %3073 = vrsqrt.f32 %v4243_v52  ;;  %vm1489_vm11 = vweird.f32 %v4504_v38  ;;  %vm1459_vm9 = vweird.f32 %v4477_v40  ;;  %vm4710_vm5 = vmor %vm1448_vm12, %vm1449_vm13 }
 0x1c7   : > { %5814 = vst [vmem:[#allocation6_spill] sm:$0xff] %v4513_v32  ;;  %v4528_v63 = vpop.xlane.xlu1 %950  ;;  %v4533_v17 = vpop.eup %3063  ;;  %v4564_v2 = vmul.f32 %v4513_v32, %v4206_v35  ;;  %3075 = vrsqrt.f32 %v4353_v61  ;;  %vm1490_vm15 = vmor %vm1488_vm10, %vm1489_vm11  ;;  %v1467_v15 = vmul.f32 %v4439_v27, %v1466_v16 }
 0x1c8   : > { %5817 = vst [vmem:[#allocation38_spill] sm:$0xff] %v4533_v17  ;;  %v4550_v45 = vpop.eup %3065  ;;  %v1484_v9 = vmul.f32 %v4504_v38, %v1483_v23  ;;  %v5826_v23 = vld [vmem:[#allocation20_spill] sm:$0xff]  ;;  %v4572_v8 = vmul.f32 %v4533_v17, %v4183_v33  ;;  %3077 = vrsqrt.f32 %v4407_v21  ;;  %vm4723_vm8 = vmor %vm1458_vm7, %vm1459_vm9  ;;  %vm1268_vm10 = vweird.f32 %v4528_v63 }
 0x1c9   : > { %5820 = vst [vmem:[#allocation43_spill] sm:$0xff] %v4550_v45  ;;  %v4557_v13 = vpop.eup %3067  ;;  %v1731_v24 = vmul.f32 %v1141_v34, %v5826_v23  ;;  %v4576_v10 = vmul.f32 %v4550_v45, %v4198_v28  ;;  %1796 = vmatpush.xpose.msra.mxu1 %v1732_v25  ;;  %v1476_v34 = vsub.f32 1.5, %v1475_v11  ;;  %v1455_v23 = vmul.f32 0.5, %v1454_v37 }
 0x1ca   : > { %5822 = vst [vmem:[#allocation44_spill] sm:$0xff] %v4557_v13  ;;  %v1485_v36 = vmul.f32 0.5, %v1484_v9  ;;  %v4568_v0 = vpop.eup %3069  ;;  %v1653_v49 = vmul.f32 %v4557_v13, %v4217_v3  ;;  %v1446_v28 = vsub.f32 1.5, %v1445_v48 }
 0x1cb   : > { %5825 = vst [vmem:[#allocation47_spill] sm:$0xff] %v4564_v2  ;;  %v4579_v58 = vpop.eup %3071  ;;  %v1673_v25 = vmul.f32 %v4568_v0, %v4270_v20  ;;  %v1456_v3 = vsub.f32 1.5, %v1455_v23 }
 0x1cc   : > { %v1486_v12 = vsub.f32 1.5, %v1485_v36  ;;  %v4590_v54 = vpop.eup %3073  ;;  %v1683_v22 = vmul.f32 %v4579_v58, %v4281_v5  ;;  %v1477_v36 = vmul.f32 %v4403_v56, %v1476_v34  ;;  %v1654_v35 = vmul.f32 %v4557_v13, %v1653_v49  ;;  %v5835_v13 = vld [vmem:[#allocation41_spill] sm:$0xff] }
 0x1cd   : > { %v4584_v9 = vpop.xlane.xlu2 %948  ;;  %5827 = vst [vmem:[#allocation33_spill] sm:$0xff] %v4590_v54  ;;  %1797 = vmatpush.xpose.msra.mxu1 %v1731_v24  ;;  %v1663_v1 = vmul.f32 %v4590_v54, %v4243_v52  ;;  %v1437_v24 = vmul.f32 %v4411_v39, %v1436_v18  ;;  %v4616_v33 = vpop.eup %3075  ;;  %v5830_v18 = vld [vmem:[#allocation45_spill] sm:$0xff]  ;;  %v1447_v32 = vmul.f32 %v4469_v30, %v1446_v28 }
 0x1ce   : > { %v4588_v59 = vpop.xlane.xlu0 %946  ;;  %v1487_v37 = vmul.f32 %v4504_v38, %v1486_v12  ;;  %v1674_v12 = vmul.f32 %v4568_v0, %v1673_v25  ;;  %v4621_v34 = vpop.eup %3077  ;;  %v1481_v23 = vsel %vm4628_vm2, %v4403_v56, %v1477_v36 }
 0x1cf   : > { %v4596_v11 = vpop.xlane.xlu1 %982  ;;  %v1703_v60 = vmul.f32 %v4621_v34, %v4407_v21  ;;  %v1765_v52 = vmul.f32 %v1481_v23, %v5835_v13  ;;  %vm1709_vm7 = vweird.f32 %v4621_v34 }
 0x1d0   : > { %3079 = vrsqrt.f32 %v4596_v11  ;;  %v1491_v49 = vsel %vm1490_vm15, %v4504_v38, %v1487_v37  ;;  %v1684_v38 = vmul.f32 %v4579_v58, %v1683_v22  ;;  %v1664_v22 = vmul.f32 %v4590_v54, %v1663_v1 }
 0x1d1   : > { %3081 = vrsqrt.f32 %v4528_v63  ;;  %1798 = vmatpush.xpose.msra.mxu1 %v1730_v26  ;;  %v1766_v48 = vmul.f32 %v1491_v49, %v5830_v18  ;;  %v1693_v49 = vmul.f32 %v4616_v33, %v4353_v61  ;;  %v1441_v1 = vsel %vm4648_vm6, %v4411_v39, %v1437_v24 }
 0x1d2   : > { %3083 = vrsqrt.f32 %v4493_v44  ;;  %v1675_v18 = vmul.f32 0.5, %v1674_v12  ;;  %v1685_v2 = vmul.f32 0.5, %v1684_v38  ;;  %v1471_v24 = vsel %vm4676_vm4, %v4439_v27, %v1467_v15 }
 0x1d3   : > { %3085 = vrsqrt.f32 %v4584_v9  ;;  %1836 = vmatpush.xpose.msrb.mxu3 %v1766_v48  ;;  %v1457_v12 = vmul.f32 %v4477_v40, %v1456_v3  ;;  %v4692_v26 = vmul.f32 %v4533_v17, %v4572_v8  ;;  %v4702_v27 = vmul.f32 %v4550_v45, %v4576_v10 }
 0x1d4   : > { %v4704_v3 = vmul.f32 0.5, %v1654_v35  ;;  %v4714_v38 = vmul.f32 0.5, %v1664_v22  ;;  %v1676_v15 = vsub.f32 1.5, %v1675_v18  ;;  %v1764_v10 = vmul.f32 %v1471_v24, %v5843_v55 }
 0x1d5   : > { %v4636_v25 = vpop.xlane.xlu2 %912  ;;  %1799 = vmatpush.xpose.msra.mxu1 %v4555_v62  ;;  %5836 = vst [vmem:[#allocation29_spill] sm:$0xff] %v4692_v26  ;;  %v1694_v62 = vmul.f32 %v4616_v33, %v1693_v49  ;;  %v1451_v22 = vsel %vm4710_vm5, %v4469_v30, %v1447_v32  ;;  %v5844_v49 = vld [vmem:[#allocation31_spill] sm:$0xff]  ;;  %v1686_v18 = vsub.f32 1.5, %v1685_v2  ;;  %vm1428_vm14 = vweird.f32 %v4596_v11 }
 0x1d6   : > { %v4642_v37 = vpop.eup %3079  ;;  %3087 = vrsqrt.f32 %v4636_v25  ;;  %v4657_v56 = vpop.xlane.xlu0 %910  ;;  %5837 = vst [vmem:[#allocation27_spill] sm:$0xff] %v4704_v3  ;;  %v4770_v45 = vmul.f32 %v4568_v0, %v1676_v15  ;;  %vm1078_vm0 = vweird.f32 %v4636_v25  ;;  %vm1708_vm4 = vweird.f32 %v4407_v21  ;;  %v5874_v21 = vld [vmem:[#allocation42_spill] sm:$0xff] }
 0x1d7   : > { %v4659_v16 = vpop.eup %3081  ;;  %v1423_v36 = vmul.f32 %v4642_v37, %v4596_v11  ;;  %v4665_v42 = vpop.xlane.xlu1 %1018  ;;  %3089 = vrsqrt.f32 %v4657_v56  ;;  %1837 = vmatpush.xpose.msrb.mxu3 %v1765_v52  ;;  %5840 = vst [vmem:[#allocation25_spill] sm:$0xff] %v4714_v38  ;;  %v1704_v52 = vmul.f32 %v4621_v34, %v1703_v60  ;;  %v4733_v60 = vmul.f32 %v1441_v1, %v5844_v49 }
 0x1d8   : > { %v4688_v31 = vpop.eup %3083  ;;  %v1263_v28 = vmul.f32 %v4659_v16, %v4528_v63  ;;  %3091 = vrsqrt.f32 %v4588_v59  ;;  %v4744_v24 = vmul.f32 0.5, %v1694_v62  ;;  %v4774_v3 = vmul.f32 %v4579_v58, %v1686_v18 }
 0x1d9   : > { %v1424_v39 = vmul.f32 %v4642_v37, %v1423_v36  ;;  %v4698_v13 = vpop.eup %3085  ;;  %1800 = vmatpush.xpose.msra.mxu1 %v4540_v50  ;;  %v1461_v50 = vsel %vm4723_vm8, %v4477_v40, %v1457_v12  ;;  %v1713_v12 = vmul.f32 %v4688_v31, %v4493_v44  ;;  %vm1429_vm11 = vweird.f32 %v4642_v37 }
 0x1da   : > { %v1264_v30 = vmul.f32 %v4659_v16, %v1263_v28  ;;  %v1253_v62 = vmul.f32 %v4698_v13, %v4584_v9  ;;  %v1696_v26 = vsub.f32 1.5, %v4744_v24  ;;  %vm4805_vm13 = vmor %vm1428_vm14, %vm1429_vm11  ;;  %vm1068_vm1 = vweird.f32 %v4657_v56 }
 0x1db   : > { %v1425_v48 = vmul.f32 0.5, %v1424_v39  ;;  %1838 = vmatpush.xpose.msrb.mxu3 %v1764_v10  ;;  %v4753_v39 = vmul.f32 0.5, %v1704_v52  ;;  %v5845_v52 = vld [vmem:[#allocation36_spill] sm:$0xff]  ;;  %vm1269_vm2 = vweird.f32 %v4659_v16  ;;  %vm1718_vm11 = vweird.f32 %v4493_v44 }
 0x1dc   : > { %v4717_v23 = vpop.eup %3087  ;;  %v1763_v55 = vmul.f32 %v1461_v50, %v5845_v52  ;;  %v1265_v38 = vmul.f32 0.5, %v1264_v30  ;;  %v1254_v50 = vmul.f32 %v4698_v13, %v1253_v62 }
 0x1dd   : > { %v4735_v36 = vpop.eup %3089  ;;  %v1073_v46 = vmul.f32 %v4717_v23, %v4636_v25  ;;  %v4739_v17 = vpop.xlane.xlu2 %980  ;;  %1801 = vmatpush.xpose.msra.mxu1 %v4467_v7  ;;  %v1426_v10 = vsub.f32 1.5, %v1425_v48  ;;  %vm1079_vm12 = vweird.f32 %v4717_v23 }
 0x1de   : > { %v1063_v32 = vmul.f32 %v4735_v36, %v4657_v56  ;;  %3093 = vrsqrt.f32 %v4739_v17  ;;  %v4750_v2 = vpop.xlane.xlu0 %952  ;;  %v4759_v40 = vpop.eup %3091  ;;  %vm1069_vm15 = vweird.f32 %v4735_v36  ;;  %vm1080_vm3 = vmor %vm1078_vm0, %vm1079_vm12  ;;  %vm1418_vm14 = vweird.f32 %v4739_v17 }
 0x1df   : > { %v1074_v8 = vmul.f32 %v4717_v23, %v1073_v46  ;;  %v4756_v35 = vpop.xlane.xlu1 %944  ;;  %3095 = vrsqrt.f32 %v4750_v2  ;;  %v5846_v46 = vld [vmem:[#allocation34_spill] sm:$0xff]  ;;  %1839 = vmatpush.xpose.msrb.mxu3 %v1763_v55  ;;  %v1243_v7 = vmul.f32 %v4759_v40, %v4588_v59  ;;  %v1266_v55 = vsub.f32 1.5, %v1265_v38  ;;  %vm4833_vm6 = vmor %vm1068_vm1, %vm1069_vm15 }
 0x1e0   : > { %v1064_v28 = vmul.f32 %v4735_v36, %v1063_v32  ;;  %v1762_v1 = vmul.f32 %v1451_v22, %v5846_v46  ;;  %v1706_v32 = vsub.f32 1.5, %v4753_v39  ;;  %3097 = vrsqrt.f32 %v4756_v35  ;;  %vm4866_vm12 = vmor %vm1268_vm10, %vm1269_vm2 }
 0x1e1   : > { %v1075_v49 = vmul.f32 0.5, %v1074_v8  ;;  %v1714_v22 = vmul.f32 %v4688_v31, %v1713_v12  ;;  %1802 = vmatpush.xpose.msra.mxu1 %v4548_v57  ;;  %v1427_v12 = vmul.f32 %v4642_v37, %v1426_v10  ;;  %v4814_v38 = vmul.f32 0.5, %v1254_v50 }
 0x1e2   : > { %v1065_v54 = vmul.f32 0.5, %v1064_v28  ;;  %vm1278_vm5 = vweird.f32 %v4750_v2  ;;  %vm1719_vm0 = vweird.f32 %v4688_v31  ;;  %vm1258_vm10 = vweird.f32 %v4584_v9 }
 0x1e3   : > { %v1076_v48 = vsub.f32 1.5, %v1075_v49  ;;  %1840 = vmatpush.xpose.msrb.mxu3 %v1762_v1  ;;  %vm1259_vm15 = vweird.f32 %v4698_v13  ;;  %vm1699_vm1 = vweird.f32 %v4616_v33  ;;  %vm1248_vm2 = vweird.f32 %v4588_v59 }
 0x1e4   : > { %v4781_v15 = vpop.eup %3093  ;;  %v1066_v30 = vsub.f32 1.5, %v1065_v54  ;;  %v1244_v54 = vmul.f32 %v4759_v40, %v1243_v7 }
 0x1e5   : > { %v4788_v18 = vpop.eup %3095  ;;  %v1413_v8 = vmul.f32 %v4781_v15, %v4739_v17  ;;  %v4792_v28 = vpop.xlane.xlu2 %1016  ;;  %v1077_v52 = vmul.f32 %v4717_v23, %v1076_v48  ;;  %v1431_v48 = vsel %vm4805_vm13, %v4642_v37, %v1427_v12  ;;  %v1256_v12 = vsub.f32 1.5, %v4814_v38 }
 0x1e6   : > { %v1273_v57 = vmul.f32 %v4788_v18, %v4750_v2  ;;  %v4800_v62 = vpop.xlane.xlu0 %978  ;;  %v4821_v10 = vpop.eup %3097  ;;  %v1067_v50 = vmul.f32 %v4735_v36, %v1066_v30  ;;  %v4840_v37 = vmul.f32 0.5, %v1244_v54  ;;  %vm1419_vm9 = vweird.f32 %v4781_v15 }
 0x1e7   : > { %v1414_v11 = vmul.f32 %v4781_v15, %v1413_v8  ;;  %3099 = vrsqrt.f32 %v4800_v62  ;;  %v4812_v25 = vpop.xlane.xlu1 %908  ;;  %v1081_v7 = vsel %vm1080_vm3, %v4717_v23, %v1077_v52  ;;  %v4828_v8 = vmul.f32 0.5, %v1714_v22  ;;  %1841 = vmatpush.xpose.msrb.mxu3 %v4733_v60  ;;  %vm4882_vm13 = vmor %vm1418_vm14, %vm1419_vm9 }
 0x1e8   : > { %v1274_v1 = vmul.f32 %v4788_v18, %v1273_v57  ;;  %3101 = vrsqrt.f32 %v4812_v25  ;;  %v1725_v23 = vmul.f32 %v1081_v7, %v3903_v19  ;;  %v1071_v22 = vsel %vm4833_vm6, %v4735_v36, %v1067_v50  ;;  %v5877_v50 = vld [vmem:[#allocation52_spill] sm:$0xff] }
 0x1e9   : > { %v1415_v46 = vmul.f32 0.5, %v1414_v11  ;;  %v1267_v52 = vmul.f32 %v4659_v16, %v1266_v55  ;;  %v1233_v49 = vmul.f32 %v4821_v10, %v4756_v35  ;;  %v1760_v19 = vmul.f32 %v1431_v48, %v3871_v29 }
 0x1ea   : > { %v1275_v57 = vmul.f32 0.5, %v1274_v1  ;;  %1803 = vmatpush.xpose.msra.mxu1 %v1725_v23  ;;  %vm1279_vm8 = vweird.f32 %v4788_v18  ;;  %v1716_v7 = vsub.f32 1.5, %v4828_v8  ;;  %vm1698_vm6 = vweird.f32 %v4353_v61  ;;  %v5870_v61 = vld [vmem:[#allocation46_spill] sm:$0xff] }
 0x1eb   : > { %v1416_v30 = vsub.f32 1.5, %v1415_v46  ;;  %1842 = vmatpush.xpose.msrb.mxu3 %v1760_v19  ;;  %v1724_v46 = vmul.f32 %v1071_v22, %v3899_v4  ;;  %v1234_v4 = vmul.f32 %v4821_v10, %v1233_v49  ;;  %vm4896_vm3 = vmor %vm1278_vm5, %vm1279_vm8  ;;  %v1271_v2 = vsel %vm4866_vm12, %v4659_v16, %v1267_v52 }
 0x1ec   : > { %v1276_v54 = vsub.f32 1.5, %v1275_v57  ;;  %v1257_v19 = vmul.f32 %v4698_v13, %v1256_v12  ;;  %v4921_v16 = vmul.f32 %v4621_v34, %v1706_v32  ;;  %vm1249_vm9 = vweird.f32 %v4759_v40  ;;  %vm4933_vm5 = vmor %vm1258_vm10, %vm1259_vm15 }
 0x1ed   : > { %v4851_v60 = vpop.eup %3099  ;;  %v4856_v36 = vpop.xlane.xlu2 %942  ;;  %v1417_v55 = vmul.f32 %v4781_v15, %v1416_v30  ;;  %v1246_v30 = vsub.f32 1.5, %v4840_v37  ;;  %v1717_v12 = vmul.f32 %v4688_v31, %v1716_v7  ;;  %vm4948_vm8 = vmor %vm1708_vm4, %vm1709_vm7 }
 0x1ee   : > { %v4859_v11 = vpop.eup %3101  ;;  %v1403_v38 = vmul.f32 %v4851_v60, %v4800_v62  ;;  %3103 = vrsqrt.f32 %v4856_v36  ;;  %v4874_v1 = vpop.xlane.xlu0 %1014  ;;  %1804 = vmatpush.xpose.msra.mxu1 %v1724_v46  ;;  %v1277_v57 = vmul.f32 %v4788_v18, %v1276_v54  ;;  %vm1409_vm12 = vweird.f32 %v4851_v60  ;;  %vm4964_vm7 = vmor %vm1718_vm11, %vm1719_vm0 }
 0x1ef   : > { %v1053_v17 = vmul.f32 %v4859_v11, %v4812_v25  ;;  %v4888_v48 = vpop.xlane.xlu1 %976  ;;  %v1421_v23 = vsel %vm4882_vm13, %v4781_v15, %v1417_v55  ;;  %v1247_v7 = vmul.f32 %v4759_v40, %v1246_v30  ;;  %vm1059_vm4 = vweird.f32 %v4859_v11  ;;  %vm4979_vm14 = vmor %vm1248_vm2, %vm1249_vm9 }
 0x1f0   : > { %v1404_v8 = vmul.f32 %v4851_v60, %v1403_v38  ;;  %3105 = vrsqrt.f32 %v4888_v48  ;;  %v1759_v49 = vmul.f32 %v1421_v23, %v3951_v14  ;;  %v1281_v15 = vsel %vm4896_vm3, %v4788_v18, %v1277_v57 }
 0x1f1   : > { %v1054_v56 = vmul.f32 %v4859_v11, %v1053_v17  ;;  %v1235_v14 = vmul.f32 0.5, %v1234_v4  ;;  %v1745_v37 = vmul.f32 %v1281_v15, %v3956_v47  ;;  %v1744_v47 = vmul.f32 %v1271_v2, %v3826_v41 }
 0x1f2   : > { %v1405_v22 = vmul.f32 0.5, %v1404_v8  ;;  %1843 = vmatpush.xpose.msrb.mxu3 %v1759_v49  ;;  %v1261_v41 = vsel %vm4933_vm5, %v4698_v13, %v1257_v19  ;;  %vm1408_vm11 = vweird.f32 %v4800_v62  ;;  %vm1058_vm0 = vweird.f32 %v4812_v25  ;;  %vm5030_vm5 = vmor %vm1698_vm6, %vm1699_vm1 }
 0x1f3   : > { %v1055_v54 = vmul.f32 0.5, %v1054_v56  ;;  %1820 = vmatpush.xpose.msrb.mxu2 %v1745_v37  ;;  %v1236_v4 = vsub.f32 1.5, %v1235_v14  ;;  %vm4988_vm10 = vmor %vm1408_vm11, %vm1409_vm12  ;;  %vm1689_vm13 = vweird.f32 %v4579_v58  ;;  %v1743_v62 = vmul.f32 %v1261_v41, %v3853_v53 }
 0x1f4   : > { %v4923_v52 = vpop.eup %3103  ;;  %v1406_v32 = vsub.f32 1.5, %v1405_v22  ;;  %vm1060_vm15 = vmor %vm1058_vm0, %vm1059_vm4  ;;  %v1721_v25 = vsel %vm4964_vm7, %v4688_v31, %v1717_v12  ;;  %v1711_v23 = vsel %vm4948_vm8, %v4621_v34, %v4921_v16  ;;  %v1697_v2 = vmul.f32 %v4616_v33, %v1696_v26  ;;  %v5896_v12 = vld [vmem:[#allocation7_spill] sm:$0xff] }
 0x1f5   : > { %v1056_v18 = vsub.f32 1.5, %v1055_v54  ;;  %v1223_v55 = vmul.f32 %v4923_v52, %v4856_v36  ;;  %v4939_v29 = vpop.xlane.xlu2 %906  ;;  %v1251_v31 = vsel %vm4979_vm14, %v4759_v40, %v1247_v7  ;;  %vm1688_vm3 = vweird.f32 %v4281_v5  ;;  %v5889_v40 = vld [vmem:[#allocation58_spill] sm:$0xff] }
 0x1f6   : > { %v4942_v38 = vpop.eup %3105  ;;  %v4953_v46 = vpop.xlane.xlu0 %940  ;;  %3107 = vrsqrt.f32 %v4939_v29  ;;  %v1407_v57 = vmul.f32 %v4851_v60, %v1406_v32  ;;  %vm1239_vm2 = vweird.f32 %v4821_v10  ;;  %v1237_v24 = vmul.f32 %v4821_v10, %v1236_v4  ;;  %v5873_v32 = vld [vmem:[#allocation50_spill] sm:$0xff]  ;;  %v5906_v4 = vld [vmem:[#allocation43_spill] sm:$0xff] }
 0x1f7   : > { %v1224_v63 = vmul.f32 %v4923_v52, %v1223_v55  ;;  %v1393_v17 = vmul.f32 %v4942_v38, %v4888_v48  ;;  %3109 = vrsqrt.f32 %v4953_v46  ;;  %v4973_v13 = vpop.xlane.xlu1 %974  ;;  %v1057_v56 = vmul.f32 %v4859_v11, %v1056_v18  ;;  %1821 = vmatpush.xpose.msrb.mxu2 %v1744_v47 }
 0x1f8   : > { %3111 = vrsqrt.f32 %v4973_v13  ;;  %v1411_v53 = vsel %vm4988_vm10, %v4851_v60, %v1407_v57  ;;  %vm1679_vm9 = vweird.f32 %v4568_v0  ;;  %vm1238_vm8 = vweird.f32 %v4756_v35  ;;  %v5907_v57 = vld [vmem:[#allocation15_spill] sm:$0xff] }
 0x1f9   : > { %v1225_v8 = vmul.f32 0.5, %v1224_v63  ;;  %v1394_v59 = vmul.f32 %v4942_v38, %v1393_v17  ;;  %v1061_v22 = vsel %vm1060_vm15, %v4859_v11, %v1057_v56  ;;  %v1758_v26 = vmul.f32 %v1411_v53, %v3999_v43  ;;  %v5869_v43 = vld [vmem:[#allocation49_spill] sm:$0xff]  ;;  %vm5048_vm1 = vmor %vm1238_vm8, %vm1239_vm2 }
 0x1fa   : > { %v1723_v34 = vmul.f32 %v1061_v22, %v4013_v51  ;;  %v1789_v54 = vmul.f32 %v1721_v25, %v5869_v43  ;;  %v1788_v14 = vmul.f32 %v1711_v23, %v5870_v61  ;;  %v1701_v37 = vsel %vm5030_vm5, %v4616_v33, %v1697_v2  ;;  %vm5086_vm15 = vmor %vm1688_vm3, %vm1689_vm13  ;;  %v5886_v22 = vld [vmem:[#allocation27_spill] sm:$0xff] }
 0x1fb   : > { %v1395_v30 = vmul.f32 0.5, %v1394_v59  ;;  %v1226_v60 = vsub.f32 1.5, %v1225_v8  ;;  %1822 = vmatpush.xpose.msrb.mxu2 %v1743_v62  ;;  %vm1399_vm6 = vweird.f32 %v4942_v38  ;;  %1844 = vmatpush.xpose.msrb.mxu3 %v1758_v26  ;;  %v1742_v18 = vmul.f32 %v1251_v31, %v5873_v32  ;;  %v5878_v59 = vld [vmem:[#allocation56_spill] sm:$0xff]  ;;  %v5888_v26 = vld [vmem:[#allocation57_spill] sm:$0xff]  ;;  %v5894_v61 = vld [vmem:[#allocation47_spill] sm:$0xff] }
 0x1fc   : > { %v5016_v49 = vpop.eup %3107  ;;  %1805 = vmatpush.xpose.msra.mxu1 %v1723_v34  ;;  %vm1229_vm12 = vweird.f32 %v4923_v52  ;;  %vm1398_vm7 = vweird.f32 %v4888_v48  ;;  %v1241_v55 = vsel %vm5048_vm1, %v4821_v10, %v1237_v24  ;;  %3113 = vrsqrt.f32 %v4510_v6  ;;  %v5887_v31 = vld [vmem:[#allocation40_spill] sm:$0xff] }
 0x1fd   : > { %v5023_v11 = vpop.eup %3109  ;;  %v1396_v19 = vsub.f32 1.5, %v1395_v30  ;;  %v1043_v51 = vmul.f32 %v5016_v49, %v4939_v29  ;;  %v1227_v7 = vmul.f32 %v4923_v52, %v1226_v60  ;;  %vm1228_vm4 = vweird.f32 %v4856_v36  ;;  %vm1400_vm14 = vmor %vm1398_vm7, %vm1399_vm6 }
 0x1fe   : > { %v5037_v15 = vpop.eup %3111  ;;  %v1213_v16 = vmul.f32 %v5023_v11, %v4953_v46  ;;  %v1787_v63 = vmul.f32 %v1701_v37, %v5874_v21  ;;  %vm1049_vm11 = vweird.f32 %v5016_v49  ;;  %vm5075_vm0 = vmor %vm1228_vm4, %vm1229_vm12  ;;  %vm1219_vm10 = vweird.f32 %v5023_v11 }
 0x1ff   : > { %v1383_v35 = vmul.f32 %v5037_v15, %v4973_v13  ;;  %v1044_v39 = vmul.f32 %v5016_v49, %v1043_v51  ;;  %v1397_v41 = vmul.f32 %v4942_v38, %v1396_v19  ;;  %1823 = vmatpush.xpose.msrb.mxu2 %v1742_v18  ;;  %v1741_v8 = vmul.f32 %v1241_v55, %v5877_v50  ;;  %v5901_v55 = vld [vmem:[#allocation44_spill] sm:$0xff] }
 0x200   : > { %1850 = vmatpush.xpose.msrb.mxu1 %v1789_v54  ;;  %v1214_v33 = vmul.f32 %v5023_v11, %v1213_v16  ;;  %vm1048_vm2 = vweird.f32 %v4939_v29  ;;  %v1231_v62 = vsel %vm5075_vm0, %v4923_v52, %v1227_v7  ;;  %vm1218_vm5 = vweird.f32 %v4953_v46  ;;  %v5893_v54 = vld [vmem:[#allocation22_spill] sm:$0xff]  ;;  %v5902_v7 = vld [vmem:[#allocation8_spill] sm:$0xff] }
 0x201   : > { %v1384_v47 = vmul.f32 %v5037_v15, %v1383_v35  ;;  %v1045_v9 = vmul.f32 0.5, %v1044_v39  ;;  %v1401_v44 = vsel %vm1400_vm14, %v4942_v38, %v1397_v41  ;;  %vm1389_vm8 = vweird.f32 %v5037_v15  ;;  %vm5100_vm13 = vmor %vm1048_vm2, %vm1049_vm11 }
 0x202   : > { %v1215_v48 = vmul.f32 0.5, %v1214_v33  ;;  %v1757_v56 = vmul.f32 %v1401_v44, %v5878_v59  ;;  %v1691_v52 = vsel %vm5086_vm15, %v4579_v58, %v4774_v3  ;;  %v1645_v29 = vmul.f32 0.5, %v4702_v27  ;;  %vm1220_vm1 = vmor %vm1218_vm5, %vm1219_vm10  ;;  %v5114_v2 = vpop.eup %3113  ;;  %v5885_v58 = vld [vmem:[#allocation55_spill] sm:$0xff] }
 0x203   : > { %v1385_v17 = vmul.f32 0.5, %v1384_v47  ;;  %v1046_v10 = vsub.f32 1.5, %v1045_v9  ;;  %1824 = vmatpush.xpose.msrb.mxu2 %v1741_v8  ;;  %vm1678_vm3 = vweird.f32 %v4270_v20  ;;  %3115 = vrsqrt.f32 %v4665_v42 }
 0x204   : > { %1851 = vmatpush.xpose.msrb.mxu1 %v1788_v14  ;;  %v1216_v36 = vsub.f32 1.5, %v1215_v48  ;;  %1845 = vmatpush.xpose.msrb.mxu3 %v1757_v56  ;;  %vm5118_vm6 = vmor %vm1678_vm3, %vm1679_vm9  ;;  %vm1388_vm12 = vweird.f32 %v4973_v13  ;;  %v1740_v20 = vmul.f32 %v1231_v62, %v5885_v58  ;;  %v1656_v53 = vsub.f32 1.5, %v5886_v22  ;;  %v5890_v13 = vld [vmem:[#allocation33_spill] sm:$0xff]  ;;  %v5895_v14 = vld [vmem:[#allocation6_spill] sm:$0xff] }
 0x205   : > { %v1386_v38 = vsub.f32 1.5, %v1385_v17  ;;  %v1047_v25 = vmul.f32 %v5016_v49, %v1046_v10  ;;  %vm1390_vm7 = vmor %vm1388_vm12, %vm1389_vm8  ;;  %v1786_v34 = vmul.f32 %v1691_v52, %v5887_v31  ;;  %vm1669_vm9 = vweird.f32 %v5890_v13  ;;  %v5905_v17 = vld [vmem:[#allocation35_spill] sm:$0xff]  ;;  %v5911_v52 = vld [vmem:[#allocation38_spill] sm:$0xff]  ;;  %v5208_v31 = vpop.xlane.xlu1 %1008 }
 0x206   : > { %v1217_v23 = vmul.f32 %v5023_v11, %v1216_v36  ;;  %v1624_v37 = vmul.f32 %v5895_v14, %v5894_v61  ;;  %vm1668_vm4 = vweird.f32 %v5896_v12  ;;  %3117 = vrsqrt.f32 %v4792_v28  ;;  %v5174_v36 = vpop.xlane.xlu2 %1012 }
 0x207   : > { %v1387_v46 = vmul.f32 %v5037_v15, %v1386_v38  ;;  %v1051_v27 = vsel %vm5100_vm13, %v5016_v49, %v1047_v25  ;;  %1825 = vmatpush.xpose.msrb.mxu2 %v1740_v20  ;;  %v1681_v49 = vsel %vm5118_vm6, %v4568_v0, %v4770_v45  ;;  %vm5150_vm14 = vmor %vm1668_vm4, %vm1669_vm9  ;;  %v1613_v45 = vmul.f32 %v5114_v2, %v4510_v6  ;;  %v5900_v0 = vld [vmem:[#allocation37_spill] sm:$0xff] }
 0x208   : > { %1852 = vmatpush.xpose.msrb.mxu1 %v1787_v63  ;;  %v1221_v3 = vsel %vm1220_vm1, %v5023_v11, %v1217_v23  ;;  %v1722_v24 = vmul.f32 %v1051_v27, %v5888_v26  ;;  %v5891_v11 = vld [vmem:[#allocation25_spill] sm:$0xff]  ;;  %v1785_v18 = vmul.f32 %v1681_v49, %v5900_v0  ;;  %v1646_v33 = vsub.f32 1.5, %v1645_v29  ;;  %v5910_v23 = vld [vmem:[#allocation32_spill] sm:$0xff]  ;;  %v5912_v27 = vld [vmem:[#allocation11_spill] sm:$0xff] }
 0x209   : > { %v1739_v60 = vmul.f32 %v1221_v3, %v5889_v40  ;;  %v1391_v19 = vsel %vm1390_vm7, %v5037_v15, %v1387_v46  ;;  %v5892_v51 = vsub.f32 1.5, %v5891_v11  ;;  %v5147_v35 = vpop.eup %3115  ;;  %v5897_v15 = vld [vmem:[#allocation29_spill] sm:$0xff]  ;;  %vm1659_vm11 = vweird.f32 %v5901_v55  ;;  %v5193_v46 = vpop.xlane.xlu0 %1010 }
 0x20a   : > { %v1756_v16 = vmul.f32 %v1391_v19, %v5893_v54  ;;  %1806 = vmatmul.f32.vlgmr.msra.gmra.mxu1 %v1722_v24  ;;  %v1635_v39 = vmul.f32 0.5, %v5897_v15  ;;  %v1657_v9 = vmul.f32 %v5901_v55, %v1656_v53  ;;  %v1625_v41 = vmul.f32 0.5, %v1624_v37  ;;  %v5916_v49 = vld [vmem:[#allocation9_spill] sm:$0xff] }
 0x20b   : > { %v1667_v43 = vmul.f32 %v5890_v13, %v5892_v51  ;;  %1826 = vmatmul.f32.vlgmr.msrb.gmra.mxu2 %v1739_v60  ;;  %vm1658_vm0 = vweird.f32 %v5902_v7  ;;  %v1614_v21 = vmul.f32 %v5114_v2, %v1613_v45  ;;  %v1603_v63 = vmul.f32 %v5147_v35, %v4665_v42  ;;  %v5922_v45 = vld [vmem:[#allocation26_spill] sm:$0xff]  ;;  %v5925_v38 = vld [vmem:[#allocation53_spill] sm:$0xff] }
 0x20c   : > { %1853 = vmatpush.xpose.msrb.mxu1 %v1786_v34  ;;  %1846 = vmatmul.f32.vlgmr.msrb.gmra.mxu3 %v1756_v16  ;;  %vm5164_vm10 = vmor %vm1658_vm0, %vm1659_vm11  ;;  %3119 = vrsqrt.f32 %v4874_v1  ;;  %v1636_v44 = vsub.f32 1.5, %v1635_v39  ;;  %vm1649_vm15 = vweird.f32 %v5906_v4  ;;  %v1647_v8 = vmul.f32 %v5906_v4, %v1646_v33  ;;  %v5180_v59 = vpop.eup %3117  ;;  %v5915_v34 = vld [vmem:[#allocation30_spill] sm:$0xff] }
 0x20d   : > { %v1671_v47 = vsel %vm5150_vm14, %v5890_v13, %v1667_v43  ;;  %v1661_v50 = vsel %vm5164_vm10, %v5901_v55, %v1657_v9  ;;  %v1626_v56 = vsub.f32 1.5, %v1625_v41  ;;  %vm1648_vm2 = vweird.f32 %v5907_v57  ;;  %v5919_v43 = vld [vmem:[#allocation28_spill] sm:$0xff] }
 0x20e   : > { %v1784_v10 = vmul.f32 %v1671_v47, %v5905_v17  ;;  %vm5183_vm5 = vmor %vm1648_vm2, %vm1649_vm15  ;;  %v1615_v62 = vmul.f32 0.5, %v1614_v21  ;;  %v1604_v25 = vmul.f32 %v5147_v35, %v1603_v63  ;;  %3121 = vrsqrt.f32 %v5174_v36  ;;  %v5923_v41 = vld [vmem:[#allocation48_spill] sm:$0xff] }
 0x20f   : > { %v1783_v5 = vmul.f32 %v1661_v50, %v5910_v23  ;;  %vm1639_vm8 = vweird.f32 %v5911_v52  ;;  %v1593_v29 = vmul.f32 %v5180_v59, %v4792_v28  ;;  %v1651_v30 = vsel %vm5183_vm5, %v5906_v4, %v1647_v8 }
 0x210   : > { %1854 = vmatpush.xpose.msrb.mxu1 %v1785_v18  ;;  %v1637_v58 = vmul.f32 %v5911_v52, %v1636_v44  ;;  %vm1629_vm13 = vweird.f32 %v5895_v14  ;;  %vm1638_vm3 = vweird.f32 %v5912_v27  ;;  %v1616_v22 = vsub.f32 1.5, %v1615_v62  ;;  %v5924_v44 = vld [vmem:[#allocation51_spill] sm:$0xff]  ;;  %v5928_v27 = vld [vmem:[#allocation13_spill] sm:$0xff] }
 0x211   : > { %vm5203_vm1 = vmor %vm1638_vm3, %vm1639_vm8  ;;  %v1605_v53 = vmul.f32 0.5, %v1604_v25  ;;  %3123 = vrsqrt.f32 %v5193_v46  ;;  %v1782_v26 = vmul.f32 %v1651_v30, %v5915_v34  ;;  %v1594_v24 = vmul.f32 %v5180_v59, %v1593_v29 }
 0x212   : > { %v5199_v20 = vpop.eup %3119  ;;  %v1641_v60 = vsel %vm5203_vm1, %v5911_v52, %v1637_v58  ;;  %v1627_v13 = vmul.f32 %v5895_v14, %v1626_v56  ;;  %vm1628_vm6 = vweird.f32 %v5916_v49  ;;  %3125 = vrsqrt.f32 %v5208_v31  ;;  %v5927_v58 = vld [vmem:[#allocation17_spill] sm:$0xff] }
 0x213   : > { %v1583_v40 = vmul.f32 %v5199_v20, %v4874_v1  ;;  %vm5224_vm12 = vmor %vm1628_vm6, %vm1629_vm13  ;;  %vm1619_vm7 = vweird.f32 %v5114_v2  ;;  %v1606_v51 = vsub.f32 1.5, %v1605_v53  ;;  %v1781_v54 = vmul.f32 %v1641_v60, %v5919_v43  ;;  %v5929_v53 = vld [vmem:[#allocation19_spill] sm:$0xff] }
 0x214   : > { %1855 = vmatpush.xpose.msrb.mxu1 %v1784_v10  ;;  %v5218_v19 = vpop.eup %3121  ;;  %v1617_v16 = vmul.f32 %v5114_v2, %v1616_v22  ;;  %v1595_v61 = vmul.f32 0.5, %v1594_v24  ;;  %v1631_v15 = vsel %vm5224_vm12, %v5895_v14, %v1627_v13  ;;  %vm1618_vm9 = vweird.f32 %v4510_v6 }
 0x215   : > { %v1584_v37 = vmul.f32 %v5199_v20, %v1583_v40  ;;  %v1573_v12 = vmul.f32 %v5218_v19, %v5174_v36  ;;  %vm5241_vm4 = vmor %vm1618_vm9, %vm1619_vm7  ;;  %vm1609_vm14 = vweird.f32 %v5147_v35  ;;  %v1780_v0 = vmul.f32 %v1631_v15, %v5922_v45 }
 0x216   : > { %v1621_v18 = vsel %vm5241_vm4, %v5114_v2, %v1617_v16  ;;  %v1607_v14 = vmul.f32 %v5147_v35, %v1606_v51  ;;  %v1596_v55 = vsub.f32 1.5, %v1595_v61  ;;  %vm1608_vm11 = vweird.f32 %v4665_v42 }
 0x217   : > { %v5237_v39 = vpop.eup %3123  ;;  %v1585_v6 = vmul.f32 0.5, %v1584_v37  ;;  %v1574_v9 = vmul.f32 %v5218_v19, %v1573_v12  ;;  %vm1610_vm0 = vmor %vm1608_vm11, %vm1609_vm14  ;;  %vm1599_vm10 = vweird.f32 %v5180_v59  ;;  %v1779_v7 = vmul.f32 %v1621_v18, %v5923_v41  ;;  %v2987_v12 = vld [vmem:[%s5261_s29] ss:$0 sm:$0xff] }
 0x218   : > { %1856 = vmatpush.xpose.msrb.mxu1 %v1783_v5  ;;  %v3126_v33 = vpop.eup %3125  ;;  %v1563_v47 = vmul.f32 %v5237_v39, %v5193_v46  ;;  %v1611_v48 = vsel %vm1610_vm0, %v5147_v35, %v1607_v14  ;;  %v1597_v42 = vmul.f32 %v5180_v59, %v1596_v55  ;;  %vm1598_vm15 = vweird.f32 %v4792_v28  ;;  %v5926_v5 = vld [vmem:[#allocation54_spill] sm:$0xff] }
 0x219   : > { %v1553_v2 = vmul.f32 %v3126_v33, %v5208_v31  ;;  %v1586_v21 = vsub.f32 1.5, %v1585_v6  ;;  %v1575_v17 = vmul.f32 0.5, %v1574_v9  ;;  %vm1600_vm2 = vmor %vm1598_vm15, %vm1599_vm10  ;;  %vm1589_vm5 = vweird.f32 %v5199_v20 }
 0x21a   : > { %v1564_v63 = vmul.f32 %v5237_v39, %v1563_v47  ;;  %v1778_v4 = vmul.f32 %v1611_v48, %v5924_v44  ;;  %v1601_v56 = vsel %vm1600_vm2, %v5180_v59, %v1597_v42  ;;  %vm1588_vm8 = vweird.f32 %v4874_v1 }
 0x21b   : > { %v1554_v10 = vmul.f32 %v3126_v33, %v1553_v2  ;;  %v1576_v8 = vsub.f32 1.5, %v1575_v17  ;;  %v1587_v35 = vmul.f32 %v5199_v20, %v1586_v21  ;;  %vm1590_vm13 = vmor %vm1588_vm8, %vm1589_vm5  ;;  %v1777_v62 = vmul.f32 %v1601_v56, %v5925_v38 }
 0x21c   : > { %1857 = vmatpush.xpose.msrb.mxu1 %v1782_v26  ;;  %v1565_v50 = vmul.f32 0.5, %v1564_v63  ;;  %vm1579_vm3 = vweird.f32 %v5218_v19  ;;  %vm1578_vm1 = vweird.f32 %v5174_v36  ;;  %vm1569_vm12 = vweird.f32 %v5237_v39 }
 0x21d   : > { %v1555_v57 = vmul.f32 0.5, %v1554_v10  ;;  %v1591_v25 = vsel %vm1590_vm13, %v5199_v20, %v1587_v35  ;;  %v1577_v23 = vmul.f32 %v5218_v19, %v1576_v8  ;;  %vm1580_vm6 = vmor %vm1578_vm1, %vm1579_vm3  ;;  %vm1568_vm7 = vweird.f32 %v5193_v46 }
 0x21e   : > { %v1566_v28 = vsub.f32 1.5, %v1565_v50  ;;  %v1776_v52 = vmul.f32 %v1591_v25, %v5926_v5  ;;  %vm1570_vm9 = vmor %vm1568_vm7, %vm1569_vm12  ;;  %vm1559_vm4 = vweird.f32 %v3126_v33  ;;  %vm1558_vm14 = vweird.f32 %v5208_v31 }
 0x21f   : > { %v1556_v59 = vsub.f32 1.5, %v1555_v57  ;;  %v1581_v1 = vsel %vm1580_vm6, %v5218_v19, %v1577_v23  ;;  %vm1560_vm11 = vmor %vm1558_vm14, %vm1559_vm4  ;;  %vm1952_vm5 = vcmask 7168   ;;  %vm2771_vm8 = vcmask 0  }
 0x220   : > { %1858 = vmatpush.xpose.msrb.mxu1 %v1781_v54  ;;  %v1567_v29 = vmul.f32 %v5237_v39, %v1566_v28  ;;  %v1775_v20 = vmul.f32 %v1581_v1, %v5927_v58 }
 0x221   : > { %v1557_v30 = vmul.f32 %v3126_v33, %v1556_v59 }
 0x222   : > { %v1571_v36 = vsel %vm1570_vm9, %v5237_v39, %v1567_v29 }
 0x223   : > { %v1774_v3 = vmul.f32 %v1571_v36, %v5928_v27  ;;  %v1561_v22 = vsel %vm1560_vm11, %v3126_v33, %v1557_v30 }
 0x224   : > { %1859 = vmatpush.xpose.msrb.mxu1 %v1780_v0  ;;  %v1773_v34 = vmul.f32 %v1561_v22, %v5929_v53  ;;  %v2988_v53 = vld [vmem:[%s5261_s29 + $0x2] ss:$0 sm:$0xff] }
 0x228   : > { %1860 = vmatpush.xpose.msrb.mxu1 %v1779_v7 }
 0x22c   : > { %1861 = vmatpush.xpose.msrb.mxu1 %v1778_v4 }
 0x230   : > { %1862 = vmatpush.xpose.msrb.mxu1 %v1777_v62 }
 0x234   : > { %1863 = vmatpush.xpose.msrb.mxu1 %v1776_v52 }
 0x238   : > { %1864 = vmatpush.xpose.msrb.mxu1 %v1775_v20 }
 0x23c   : > { %1865 = vmatpush.xpose.msrb.mxu1 %v1774_v3 }
 0x23f   : > { %1866 = vmatmul.f32.vlgmr.msrb.gmra.mxu1 %v1773_v34  ;;  %v2989_v34 = vld [vmem:[%s5261_s29 + $0x1] ss:$0 sm:$0xff] }
 0x287   : > { %v1807_v26 = vpop.f32.mrf.mxu1 }
 0x288   : > { %vm1870_vm0 = vcmp.ne.f32.partialorder %v1807_v26, %v1807_v26 }
 0x289   : > { %v1874_v46 = vsel %vm1870_vm0, 0.0, %v1807_v26 }
 0x28a   : > { %v2939_v24 = vadd.f32 -1.0, %v1874_v46  ;;  %v2943_v40 = vadd.f32 -0.1, %v1874_v46  ;;  %v2081_v19 = vmul.f32 20.0, %v1874_v46  ;;  %v2389_v49 = vmul.f32 -20.0, %v1874_v46 }
 0x28c   : > { %v1892_v60 = vmul.f32 %v2939_v24, %v2939_v24  ;;  %v1995_v13 = vmul.f32 %v2943_v40, %v2943_v40  ;;  %v2085_v54 = vmul.f32 1.442695, %v2081_v19  ;;  %v2393_v61 = vmul.f32 1.442695, %v2389_v49 }
 0x28e   : > { %v1896_v31 = vmul.f32 -50000000.0, %v1892_v60  ;;  %v1999_v11 = vmul.f32 -50.0, %v1995_v13  ;;  %v1827_v16 = vpop.f32.mrf.mxu2 }
 0x28f   : > { %v1847_v37 = vpop.f32.mrf.mxu3  ;;  %vm1871_vm10 = vcmp.ne.f32.partialorder %v1827_v16, %v1827_v16 }
 0x290   : > { %v1900_v51 = vmul.f32 1.442695, %v1896_v31  ;;  %v2003_v43 = vmul.f32 1.442695, %v1999_v11  ;;  %vm1872_vm15 = vcmp.ne.f32.partialorder %v1847_v37, %v1847_v37  ;;  %v5291_v15 = vsel %vm1871_vm10, 0.0, %v1827_v16 }
 0x291   : > { %v1876_v39 = vsel %vm1872_vm15, 0.0, %v1847_v37  ;;  %v2940_v0 = vadd.f32 -1.0, %v5291_v15  ;;  %v2944_v17 = vadd.f32 -0.1, %v5291_v15  ;;  %v2082_v27 = vmul.f32 20.0, %v5291_v15 }
 0x292   : > { %3127 = vpow2.f32 %v1900_v51  ;;  %v2941_v33 = vadd.f32 -1.0, %v1876_v39  ;;  %v2945_v47 = vadd.f32 -0.1, %v1876_v39  ;;  %v2083_v29 = vmul.f32 20.0, %v1876_v39 }
 0x293   : > { %3129 = vpow2.f32 %v2003_v43  ;;  %v1893_v41 = vmul.f32 %v2940_v0, %v2940_v0  ;;  %v1996_v35 = vmul.f32 %v2944_v17, %v2944_v17  ;;  %v2087_v46 = vmul.f32 1.442695, %v2082_v27 }
 0x294   : > { %3131 = vpow2.f32 %v2085_v54  ;;  %v1894_v7 = vmul.f32 %v2941_v33, %v2941_v33  ;;  %v1997_v63 = vmul.f32 %v2945_v47, %v2945_v47  ;;  %v2089_v36 = vmul.f32 1.442695, %v2083_v29 }
 0x295   : > { %3133 = vpow2.f32 %v2393_v61  ;;  %v1897_v44 = vmul.f32 -50000000.0, %v1893_v41  ;;  %v2000_v5 = vmul.f32 -50.0, %v1996_v35  ;;  %v2391_v24 = vmul.f32 -20.0, %v1876_v39 }
 0x296   : > { %v1898_v4 = vmul.f32 -50000000.0, %v1894_v7  ;;  %v2001_v56 = vmul.f32 -50.0, %v1997_v63  ;;  %v2390_v19 = vmul.f32 -20.0, %v5291_v15 }
 0x297   : > { %v1902_v62 = vmul.f32 1.442695, %v1897_v44  ;;  %v2005_v58 = vmul.f32 1.442695, %v2000_v5  ;;  %v2397_v31 = vmul.f32 1.442695, %v2391_v24 }
 0x298   : > { %v3128_v32 = vpop.eup %3127  ;;  %v1904_v28 = vmul.f32 1.442695, %v1898_v4  ;;  %v2007_v59 = vmul.f32 1.442695, %v2001_v56  ;;  %v2395_v43 = vmul.f32 1.442695, %v2390_v19 }
 0x299   : > { %v3130_v45 = vpop.eup %3129  ;;  %v1920_v18 = vmul.f32 %v3128_v32, %v2987_v12  ;;  %3135 = vpow2.f32 %v1902_v62  ;;  %v2990_v62 = vld [vmem:[%s5261_s29 + $0x3] ss:$0 sm:$0xff] }
 0x29a   : > { %v3132_v14 = vpop.eup %3131  ;;  %v2011_v55 = vmul.f32 %v3130_v45, %v2987_v12  ;;  %3137 = vpow2.f32 %v1904_v28 }
 0x29b   : > { %v3134_v6 = vpop.eup %3133  ;;  %1924 = vadd.xlane.f32.xlu2 %v1920_v18  ;;  %3139 = vpow2.f32 %v2007_v59 }
 0x29c   : > { %2015 = vadd.xlane.f32.xlu0 %v2011_v55  ;;  %v2401_v9 = vmul.f32 %v3134_v6, %v2011_v55  ;;  %v2093_v2 = vmul.f32 %v3132_v14, %v2011_v55  ;;  %3141 = vpow2.f32 %v2005_v58 }
 0x29d   : > { %3143 = vpow2.f32 %v2089_v36 }
 0x29e   : > { %2405 = vadd.xlane.f32.xlu1 %v2401_v9  ;;  %v2471_v48 = vmul.f32 %v3134_v6, %v2401_v9  ;;  %v2097_v21 = vmul.f32 0.01831564, %v2093_v2  ;;  %3145 = vpow2.f32 %v2087_v46 }
 0x29f   : > { %v3136_v3 = vpop.eup %3135  ;;  %3147 = vpow2.f32 %v2397_v31 }
 0x2a0   : > { %v2475_v42 = vmul.f32 0.01831564, %v2471_v48  ;;  %v2167_v10 = vmul.f32 %v3132_v14, %v2097_v21  ;;  %v3138_v22 = vpop.eup %3137  ;;  %v1921_v60 = vmul.f32 %v3136_v3, %v2989_v34  ;;  %3149 = vpow2.f32 %v2395_v43 }
 0x2a1   : > { %v3140_v26 = vpop.eup %3139  ;;  %v1922_v40 = vmul.f32 %v3138_v22, %v2988_v53 }
 0x2a2   : > { %v2545_v50 = vmul.f32 %v3134_v6, %v2475_v42  ;;  %v2171_v8 = vmul.f32 0.00033546262, %v2167_v10  ;;  %v2013_v13 = vmul.f32 %v3140_v26, %v2988_v53  ;;  %v3142_v49 = vpop.eup %3141 }
 0x2a3   : > { %2479 = vadd.xlane.f32.xlu2 %v2475_v42  ;;  %v3144_v11 = vpop.eup %3143  ;;  %v2012_v16 = vmul.f32 %v3142_v49, %v2989_v34 }
 0x2a4   : > { %v2549_v57 = vmul.f32 0.00033546262, %v2545_v50  ;;  %v2241_v38 = vmul.f32 %v3132_v14, %v2171_v8  ;;  %v2095_v51 = vmul.f32 %v3144_v11, %v2013_v13  ;;  %v3146_v61 = vpop.eup %3145 }
 0x2a5   : > { %v2094_v39 = vmul.f32 %v3146_v61, %v2012_v16  ;;  %v5301_v15 = vpop.eup %3147 }
 0x2a6   : > { %2553 = vadd.xlane.f32.xlu0 %v2549_v57  ;;  %2101 = vadd.xlane.f32.xlu1 %v2097_v21  ;;  %v2619_v25 = vmul.f32 %v3134_v6, %v2549_v57  ;;  %v2245_v23 = vmul.f32 6.1442124e-06, %v2241_v38  ;;  %v2099_v37 = vmul.f32 0.01831564, %v2095_v51  ;;  %v2403_v0 = vmul.f32 %v5301_v15, %v2013_v13  ;;  %v5304_v18 = vpop.eup %3149 }
 0x2a7   : > { %v2098_v45 = vmul.f32 0.01831564, %v2094_v39  ;;  %v2402_v33 = vmul.f32 %v5304_v18, %v2012_v16 }
 0x2a8   : > { %v2623_v52 = vmul.f32 6.1442124e-06, %v2619_v25  ;;  %v2315_v1 = vmul.f32 %v3132_v14, %v2245_v23  ;;  %v2473_v55 = vmul.f32 %v5301_v15, %v2403_v0 }
 0x2a9   : > { %v2168_v9 = vmul.f32 %v3146_v61, %v2098_v45  ;;  %v2472_v63 = vmul.f32 %v5304_v18, %v2402_v33 }
 0x2aa   : > { %v5295_v30 = vmul.f32 %v3134_v6, %v2623_v52  ;;  %v2319_v20 = vmul.f32 1.12535176e-07, %v2315_v1  ;;  %v2169_v6 = vmul.f32 %v3144_v11, %v2099_v37  ;;  %v2477_v2 = vmul.f32 0.01831564, %v2473_v55 }
 0x2ab   : > { %2175 = vadd.xlane.f32.xlu2 %v2171_v8  ;;  %v2172_v48 = vmul.f32 0.00033546262, %v2168_v9  ;;  %v2476_v4 = vmul.f32 0.01831564, %v2472_v63 }
 0x2ac   : > { %v2173_v41 = vmul.f32 0.00033546262, %v2169_v6  ;;  %v2547_v10 = vmul.f32 %v5301_v15, %v2477_v2 }
 0x2ad   : > { %v2546_v57 = vmul.f32 %v5304_v18, %v2476_v4  ;;  %v2242_v38 = vmul.f32 %v3146_v61, %v2172_v48 }
 0x2ae   : > { %2627 = vadd.xlane.f32.xlu1 %v2623_v52  ;;  %2323 = vadd.xlane.f32.xlu0 %v2319_v20  ;;  %v2243_v21 = vmul.f32 %v3144_v11, %v2173_v41  ;;  %v2551_v35 = vmul.f32 0.00033546262, %v2547_v10 }
 0x2af   : > { %v2550_v5 = vmul.f32 0.00033546262, %v2546_v57  ;;  %v2246_v52 = vmul.f32 6.1442124e-06, %v2242_v38 }
 0x2b0   : > { %v2247_v44 = vmul.f32 6.1442124e-06, %v2243_v21 }
 0x2b1   : > { %v2316_v36 = vmul.f32 %v3146_v61, %v2246_v52  ;;  %v2620_v22 = vmul.f32 %v5304_v18, %v2550_v5 }
 0x2b2   : > { %v2317_v59 = vmul.f32 %v3144_v11, %v2247_v44 }
 0x2b3   : > { %2249 = vadd.xlane.f32.xlu2 %v2245_v23  ;;  %v2320_v53 = vmul.f32 1.12535176e-07, %v2316_v36  ;;  %v2624_v46 = vmul.f32 6.1442124e-06, %v2620_v22 }
 0x2b4   : > { %v2321_v20 = vmul.f32 1.12535176e-07, %v2317_v59 }
 0x2b5   : > { %v2694_v39 = vmul.f32 %v5304_v18, %v2624_v46 }
 0x2b6   : > { %1928 = vadd.xlane.f32.xlu1 %v1922_v40  ;;  %1926 = vadd.xlane.f32.xlu0 %v1921_v60 }
 0x2bb   : > { %2019 = vadd.xlane.f32.xlu2 %v2013_v13 }
 0x2bc   : > { %v1867_v54 = vpop.f32.mrf.mxu1 }
 0x2bd   : > { %vm1873_vm2 = vcmp.ne.f32.partialorder %v1867_v54, %v1867_v54 }
 0x2be   : > { %v1877_v12 = vsel %vm1873_vm2, 0.0, %v1867_v54  ;;  %2017 = vadd.xlane.f32.xlu1 %v2012_v16  ;;  %2105 = vadd.xlane.f32.xlu0 %v2099_v37  ;;  %v2621_v16 = vmul.f32 %v5301_v15, %v2551_v35 }
 0x2bf   : > { %v2946_v32 = vadd.f32 -0.1, %v1877_v12  ;;  %v2084_v17 = vmul.f32 20.0, %v1877_v12  ;;  %v2942_v42 = vadd.f32 -1.0, %v1877_v12  ;;  %v2392_v8 = vmul.f32 -20.0, %v1877_v12 }
 0x2c0   : > { %v2625_v37 = vmul.f32 6.1442124e-06, %v2621_v16 }
 0x2c1   : > { %v1998_v14 = vmul.f32 %v2946_v32, %v2946_v32  ;;  %v2091_v50 = vmul.f32 1.442695, %v2084_v17  ;;  %v1895_v56 = vmul.f32 %v2942_v42, %v2942_v42  ;;  %v2399_v25 = vmul.f32 1.442695, %v2392_v8  ;;  %v5324_v17 = vld [vmem:[%s5321_s9] sm:$0xff] }
 0x2c2   : > { %v2697_v32 = vmul.f32 1.12535176e-07, %v5295_v30 }
 0x2c3   : > { %2103 = vadd.xlane.f32.xlu2 %v2098_v45  ;;  %v2002_v47 = vmul.f32 -50.0, %v1998_v14  ;;  %v1899_v23 = vmul.f32 -50000000.0, %v1895_v56  ;;  %v2695_v14 = vmul.f32 %v5301_v15, %v2625_v37 }
 0x2c5   : > { %v2009_v7 = vmul.f32 1.442695, %v2002_v47  ;;  %v1906_v58 = vmul.f32 1.442695, %v1899_v23  ;;  %v2699_v55 = vmul.f32 1.12535176e-07, %v2695_v14 }
 0x2c6   : > { %2409 = vadd.xlane.f32.xlu1 %v2403_v0  ;;  %2407 = vadd.xlane.f32.xlu0 %v2402_v33  ;;  %v2698_v0 = vmul.f32 1.12535176e-07, %v2694_v39 }
 0x2c7   : > { %3151 = vpow2.f32 %v2009_v7 }
 0x2c8   : > { %3153 = vpow2.f32 %v2091_v50 }
 0x2c9   : > { %3155 = vpow2.f32 %v2399_v25 }
 0x2ca   : > { %3157 = vpow2.f32 %v1906_v58 }
 0x2cb   : > { %2483 = vadd.xlane.f32.xlu2 %v2477_v2 }
 0x2cd   : > { %v3152_v28 = vpop.eup %3151 }
 0x2ce   : > { %2179 = vadd.xlane.f32.xlu1 %v2173_v41  ;;  %2177 = vadd.xlane.f32.xlu0 %v2172_v48  ;;  %v2014_v1 = vmul.f32 %v3152_v28, %v2990_v62  ;;  %v3154_v29 = vpop.eup %3153 }
 0x2cf   : > { %v3156_v3 = vpop.eup %3155 }
 0x2d0   : > { %v2096_v27 = vmul.f32 %v3154_v29, %v2014_v1  ;;  %v2404_v26 = vmul.f32 %v3156_v3, %v2014_v1  ;;  %v3158_v60 = vpop.eup %3157 }
 0x2d1   : > { %v1923_v13 = vmul.f32 %v3158_v60, %v2990_v62 }
 0x2d2   : > { %v2100_v34 = vmul.f32 0.01831564, %v2096_v27  ;;  %v2474_v40 = vmul.f32 %v3156_v3, %v2404_v26 }
 0x2d3   : > { %2253 = vadd.xlane.f32.xlu2 %v2247_v44 }
 0x2d4   : > { %v2170_v24 = vmul.f32 %v3154_v29, %v2100_v34  ;;  %v2478_v19 = vmul.f32 0.01831564, %v2474_v40 }
 0x2d6   : > { %2481 = vadd.xlane.f32.xlu1 %v2476_v4  ;;  %2557 = vadd.xlane.f32.xlu0 %v2551_v35  ;;  %v2174_v49 = vmul.f32 0.00033546262, %v2170_v24  ;;  %v2548_v31 = vmul.f32 %v3156_v3, %v2478_v19 }
 0x2d8   : > { %v2244_v11 = vmul.f32 %v3154_v29, %v2174_v49  ;;  %v2552_v51 = vmul.f32 0.00033546262, %v2548_v31 }
 0x2da   : > { %v2248_v43 = vmul.f32 6.1442124e-06, %v2244_v11  ;;  %v2622_v12 = vmul.f32 %v3156_v3, %v2552_v51 }
 0x2db   : > { %2555 = vadd.xlane.f32.xlu2 %v2550_v5 }
 0x2dc   : > { %v2318_v54 = vmul.f32 %v3154_v29, %v2248_v43  ;;  %v2626_v45 = vmul.f32 6.1442124e-06, %v2622_v12 }
 0x2de   : > { %2251 = vadd.xlane.f32.xlu1 %v2246_v52  ;;  %2327 = vadd.xlane.f32.xlu0 %v2321_v20  ;;  %v2322_v61 = vmul.f32 1.12535176e-07, %v2318_v54  ;;  %v2696_v33 = vmul.f32 %v3156_v3, %v2626_v45 }
 0x2e0   : > { %v2700_v6 = vmul.f32 1.12535176e-07, %v2696_v33 }
 0x2e3   : > { %2325 = vadd.xlane.f32.xlu2 %v2320_v53 }
 0x2e6   : > { %2629 = vadd.xlane.f32.xlu0 %v2624_v46  ;;  %2107 = vadd.xlane.f32.xlu1 %v2100_v34 }
 0x2eb   : > { %1930 = vadd.xlane.f32.xlu2 %v1923_v13 }
 0x2ee   : > { %2021 = vadd.xlane.f32.xlu0 %v2014_v1  ;;  %2485 = vadd.xlane.f32.xlu1 %v2478_v19 }
 0x2f3   : > { %2559 = vadd.xlane.f32.xlu2 %v2552_v51 }
 0x2f6   : > { %2411 = vadd.xlane.f32.xlu0 %v2404_v26  ;;  %2255 = vadd.xlane.f32.xlu1 %v2248_v43 }
 0x2fb   : > { %2329 = vadd.xlane.f32.xlu2 %v2322_v61 }
 0x2fe   : > { %2181 = vadd.xlane.f32.xlu0 %v2174_v49  ;;  %2631 = vadd.xlane.f32.xlu1 %v2625_v37  ;;  %v5340_v37 = vstv %s5330_s10 }
 0x303   : > { %2701 = vadd.xlane.f32.xlu2 %v2697_v32 }
 0x306   : > { %2633 = vadd.xlane.f32.xlu0 %v2626_v45  ;;  %2703 = vadd.xlane.f32.xlu1 %v2698_v0 }
 0x30b   : > { %2705 = vadd.xlane.f32.xlu2 %v2699_v55 }
 0x30e   : > { %2707 = vadd.xlane.f32.xlu0 %v2700_v6  ;;  %v1925_v47 = vpop.xlane.xlu2 %1924 }
 0x30f   : > { %v2016_v9 = vpop.xlane.xlu0 %2015  ;;  %v1932_v2 = vmax.f32 %v1925_v47, 1e-10  ;;  %v5347_v47 = vstv %s5333_s11 }
 0x310   : > { %v2023_v41 = vmax.f32 %v2016_v9, 1e-10 }
 0x311   : > { %3159 = vlog2.f32 %v1932_v2  ;;  %v2406_v18 = vpop.xlane.xlu1 %2405  ;;  %v5350_v2 = vstv %s5335_s12 }
 0x312   : > { %3161 = vlog2.f32 %v2023_v41  ;;  %v2413_v30 = vmax.f32 %v2406_v18, 1e-10 }
 0x314   : > { %3163 = vlog2.f32 %v2413_v30 }
 0x316   : > { %v2480_v15 = vpop.xlane.xlu2 %2479 }
 0x317   : > { %v3160_v7 = vpop.eup %3159  ;;  %v2487_v48 = vmax.f32 %v2480_v15, 1e-10 }
 0x318   : > { %v3162_v21 = vpop.eup %3161  ;;  %v1937_v63 = vmul.f32 0.6931472, %v3160_v7 }
 0x319   : > { %v2028_v42 = vmul.f32 0.6931472, %v3162_v21  ;;  %3165 = vlog2.f32 %v2487_v48  ;;  %v2554_v10 = vpop.xlane.xlu0 %2553  ;;  %v2102_v44 = vpop.xlane.xlu1 %2101 }
 0x31a   : > { %v3164_v4 = vpop.eup %3163  ;;  %v1944_v50 = vmul.f32 0.01, %v1937_v63  ;;  %v2561_v8 = vmax.f32 %v2554_v10, 1e-10  ;;  %v2109_v56 = vmax.f32 %v2102_v44, 1e-10 }
 0x31b   : > { %v2035_v35 = vmul.f32 0.01, %v2028_v42  ;;  %v2418_v57 = vmul.f32 0.6931472, %v3164_v4 }
 0x31c   : > { %v1948_v38 = vmul.f32 %v1944_v50, %v5324_v17  ;;  %3167 = vlog2.f32 %v2561_v8 }
 0x31d   : > { %v2039_v62 = vmul.f32 %v2035_v35, %v5324_v17  ;;  %v2425_v28 = vmul.f32 0.01, %v2418_v57  ;;  %3169 = vlog2.f32 %v2109_v56 }
 0x31e   : > { %v1953_v25 = vsel %vm1952_vm5, %v1948_v38, 0.0  ;;  %v2176_v23 = vpop.xlane.xlu2 %2175 }
 0x31f   : > { %v3166_v59 = vpop.eup %3165  ;;  %v2043_v5 = vsel %vm1952_vm5, %v2039_v62, 0.0  ;;  %v1954_v52 = vrot.slane %v1953_v25, 4  ;;  %v2429_v1 = vmul.f32 %v2425_v28, %v5324_v17  ;;  %v2183_v29 = vmax.f32 %v2176_v23, 1e-10 }
 0x320   : > { %v2044_v58 = vrot.slane %v2043_v5, 4  ;;  %v2492_v20 = vmul.f32 0.6931472, %v3166_v59 }
 0x321   : > { %v1955_v36 = vadd.f32 %v1954_v52, %v1953_v25  ;;  %3171 = vlog2.f32 %v2183_v29  ;;  %v2628_v27 = vpop.xlane.xlu1 %2627  ;;  %v2324_v3 = vpop.xlane.xlu0 %2323  ;;  %v2433_v11 = vsel %vm1952_vm5, %v2429_v1, 0.0 }
 0x322   : > { %v3168_v22 = vpop.eup %3167  ;;  %v2045_v53 = vadd.f32 %v2044_v58, %v2043_v5  ;;  %v2499_v34 = vmul.f32 0.01, %v2492_v20  ;;  %v2635_v26 = vmax.f32 %v2628_v27, 1e-10  ;;  %v2331_v60 = vmax.f32 %v2324_v3, 1e-10 }
 0x323   : > { %v3170_v46 = vpop.eup %3169  ;;  %v1956_v24 = vrot.slane %v1955_v36, 2  ;;  %v2566_v40 = vmul.f32 0.6931472, %v3168_v22  ;;  %v2434_v45 = vrot.slane %v2433_v11, 4 }
 0x324   : > { %v2046_v13 = vrot.slane %v2045_v53, 2  ;;  %v2503_v19 = vmul.f32 %v2499_v34, %v5324_v17  ;;  %v2114_v49 = vmul.f32 0.6931472, %v3170_v46  ;;  %3173 = vlog2.f32 %v2635_v26 }
 0x325   : > { %v1957_v31 = vadd.f32 %v1956_v24, %v1955_v36  ;;  %v2573_v51 = vmul.f32 0.01, %v2566_v40  ;;  %3175 = vlog2.f32 %v2331_v60  ;;  %v2435_v48 = vadd.f32 %v2434_v45, %v2433_v11 }
 0x326   : > { %v2047_v43 = vadd.f32 %v2046_v13, %v2045_v53  ;;  %v2121_v54 = vmul.f32 0.01, %v2114_v49  ;;  %v2250_v16 = vpop.xlane.xlu2 %2249  ;;  %v2507_v28 = vsel %vm1952_vm5, %v2503_v19, 0.0  ;;  %v5367_v36 = vstv %s2952_s13 }
 0x327   : > { %v3172_v61 = vpop.eup %3171  ;;  %v1958_v12 = vrot.slane %v1957_v31, 1  ;;  %v5343_v39 = vmul.f32 %v2573_v51, %v5324_v17  ;;  %v2257_v63 = vmax.f32 %v2250_v16, 1e-10  ;;  %v2436_v5 = vrot.slane %v2435_v48, 2 }
 0x328   : > { %v2048_v32 = vrot.slane %v2047_v43, 1  ;;  %v2125_v0 = vmul.f32 %v2121_v54, %v5324_v17  ;;  %v2188_v14 = vmul.f32 0.6931472, %v3172_v61  ;;  %v2508_v27 = vrot.slane %v2507_v28, 4 }
 0x329   : > { %v1959_v33 = vadd.f32 %v1958_v12, %v1957_v31  ;;  %v1929_v55 = vpop.xlane.xlu1 %1928  ;;  %v1927_v6 = vpop.xlane.xlu0 %1926  ;;  %3177 = vlog2.f32 %v2257_v63  ;;  %v5372_v53 = vstv %s5354_s14  ;;  %v2437_v24 = vadd.f32 %v2436_v5, %v2435_v48 }
 0x32a   : > { %v2049_v9 = vadd.f32 %v2048_v32, %v2047_v43  ;;  %v2129_v41 = vsel %vm1952_vm5, %v2125_v0, 0.0  ;;  %v3174_v18 = vpop.eup %3173  ;;  %v2195_v7 = vmul.f32 0.01, %v2188_v14  ;;  %v1934_v1 = vmax.f32 %v1929_v55, 1e-10 }
 0x32b   : > { %v1983_v30 = vmul.f32 %v5340_v37, %v1959_v33  ;;  %v2130_v15 = vrot.slane %v2129_v41, 4  ;;  %v2640_v21 = vmul.f32 0.6931472, %v3174_v18  ;;  %v3176_v42 = vpop.eup %3175  ;;  %v1933_v46 = vmax.f32 %v1927_v6, 1e-10 }
 0x32c   : > { %v2073_v10 = vmul.f32 %v5347_v47, %v2049_v9  ;;  %v2199_v50 = vmul.f32 %v2195_v7, %v5324_v17  ;;  %v2336_v56 = vmul.f32 0.6931472, %v3176_v42  ;;  %3179 = vlog2.f32 %v1934_v1 }
 0x32d   : > { %v1987_v44 = vadd.f32 %v1983_v30, %v5350_v2  ;;  %v2131_v4 = vadd.f32 %v2130_v15, %v2129_v41  ;;  %v2647_v8 = vmul.f32 0.01, %v2640_v21  ;;  %v5378_v19 = vstv %s5359_s15  ;;  %v5391_v21 = vld [vmem:[%s5321_s9 + $0x10] sm:$0xff] }
 0x32e   : > { %v2020_v35 = vpop.xlane.xlu2 %2019  ;;  %v2203_v62 = vsel %vm1952_vm5, %v2199_v50, 0.0  ;;  %v2343_v59 = vmul.f32 0.01, %v2336_v56  ;;  %3181 = vlog2.f32 %v1933_v46  ;;  %v2509_v43 = vadd.f32 %v2508_v27, %v2507_v28 }
 0x32f   : > { %v2077_v57 = vadd.f32 %v2073_v10, %v1987_v44  ;;  %v2132_v38 = vrot.slane %v2131_v4, 2  ;;  %v2204_v25 = vrot.slane %v2203_v62, 4  ;;  %v5364_v23 = vmul.f32 %v2647_v8, %v5324_v17  ;;  %v3178_v51 = vpop.eup %3177 }
 0x330   : > { %v2347_v20 = vmul.f32 %v2343_v59, %v5324_v17  ;;  %v2025_v13 = vmax.f32 %v2020_v35, 1e-10  ;;  %v2262_v12 = vmul.f32 0.6931472, %v3178_v51  ;;  %v2438_v0 = vrot.slane %v2437_v24, 1 }
 0x331   : > { %v2133_v52 = vadd.f32 %v2132_v38, %v2131_v4  ;;  %v2018_v29 = vpop.xlane.xlu1 %2017  ;;  %v2205_v58 = vadd.f32 %v2204_v25, %v2203_v62  ;;  %v2106_v22 = vpop.xlane.xlu0 %2105  ;;  %v2581_v14 = vsel %vm1952_vm5, %v5343_v39, 0.0  ;;  %v5388_v30 = vstv %s5369_s16 }
 0x332   : > { %v2351_v26 = vsel %vm1952_vm5, %v2347_v20, 0.0  ;;  %v2024_v31 = vmax.f32 %v2018_v29, 1e-10  ;;  %3183 = vlog2.f32 %v2025_v13  ;;  %v2111_v32 = vmax.f32 %v2106_v22, 1e-10  ;;  %v3180_v45 = vpop.eup %3179 }
 0x333   : > { %v2134_v3 = vrot.slane %v2133_v52, 1  ;;  %v2206_v34 = vrot.slane %v2205_v58, 2  ;;  %v2352_v60 = vrot.slane %v2351_v26, 4  ;;  %v2269_v41 = vmul.f32 0.01, %v2262_v12 }
 0x334   : > { %3185 = vlog2.f32 %v2024_v31  ;;  %v1941_v18 = vmul.f32 0.6931472, %v3180_v45  ;;  %v3182_v48 = vpop.eup %3181  ;;  %v2582_v63 = vrot.slane %v2581_v14, 4  ;;  %v2510_v4 = vrot.slane %v2509_v43, 2 }
 0x335   : > { %v2135_v40 = vadd.f32 %v2134_v3, %v2133_v52  ;;  %v2207_v49 = vadd.f32 %v2206_v34, %v2205_v58  ;;  %v2353_v16 = vadd.f32 %v2352_v60, %v2351_v26  ;;  %3187 = vlog2.f32 %v2111_v32 }
 0x336   : > { %v2104_v11 = vpop.xlane.xlu2 %2103  ;;  %v2273_v42 = vmul.f32 %v2269_v41, %v5324_v17  ;;  %v1946_v10 = vmul.f32 0.01, %v1941_v18  ;;  %v5396_v50 = vstv %s5375_s17  ;;  %v1939_v8 = vmul.f32 0.6931472, %v3182_v48 }
 0x337   : > { %v2159_v54 = vmul.f32 %v5372_v53, %v2135_v40  ;;  %v2208_v61 = vrot.slane %v2207_v49, 1  ;;  %v2110_v55 = vmax.f32 %v2104_v11, 1e-10  ;;  %v2354_v15 = vrot.slane %v2353_v16, 2 }
 0x338   : > { %v3184_v44 = vpop.eup %3183  ;;  %v2439_v38 = vadd.f32 %v2438_v0, %v2437_v24  ;;  %v2277_v28 = vsel %vm1952_vm5, %v2273_v42, 0.0  ;;  %v1950_v5 = vmul.f32 %v1946_v10, %v5391_v21  ;;  %v1945_v52 = vmul.f32 0.01, %v1939_v8 }
 0x339   : > { %v2163_v33 = vadd.f32 %v2159_v54, %v2077_v57  ;;  %v2410_v6 = vpop.xlane.xlu1 %2409  ;;  %v2209_v9 = vadd.f32 %v2208_v61, %v2207_v49  ;;  %3189 = vlog2.f32 %v2110_v55  ;;  %v2408_v56 = vpop.xlane.xlu0 %2407  ;;  %v5399_v57 = vld [vmem:[%s5321_s9 + $0x8] sm:$0xff]  ;;  %v2032_v25 = vmul.f32 0.6931472, %v3184_v44 }
 0x33a   : > { %v2415_v7 = vmax.f32 %v2410_v6, 1e-10  ;;  %v3186_v35 = vpop.eup %3185  ;;  %v2355_v17 = vadd.f32 %v2354_v15, %v2353_v16  ;;  %v2278_v59 = vrot.slane %v2277_v28, 4  ;;  %v2583_v29 = vadd.f32 %v2582_v63, %v2581_v14 }
 0x33b   : > { %v2233_v39 = vmul.f32 %v5378_v19, %v2209_v9  ;;  %v3188_v1 = vpop.eup %3187  ;;  %v5406_v58 = vstv %s5380_s18  ;;  %v5409_v20 = vstv %s5383_s19  ;;  %v2030_v27 = vmul.f32 0.6931472, %v3186_v35 }
 0x33c   : > { %3191 = vlog2.f32 %v2415_v7  ;;  %v5411_v22 = vadd.f32 %v2510_v4, %v2509_v43  ;;  %v2279_v34 = vadd.f32 %v2278_v59, %v2277_v28  ;;  %v1949_v26 = vmul.f32 %v1945_v52, %v5399_v57 }
 0x33d   : > { %v5401_v62 = vadd.f32 %v2233_v39, %v2163_v33  ;;  %v2037_v46 = vmul.f32 0.01, %v2032_v25  ;;  %v5415_v24 = vmul.f32 %v5367_v36, %v2439_v38  ;;  %v2655_v40 = vsel %vm1952_vm5, %v5364_v23, 0.0 }
 0x33e   : > { %v2036_v60 = vmul.f32 0.01, %v2030_v27  ;;  %v5419_v49 = vpop.xlane.xlu2 %2483  ;;  %v2356_v11 = vrot.slane %v2355_v17, 1  ;;  %v2280_v51 = vrot.slane %v2279_v34, 2  ;;  %v1967_v43 = vsel %vm1952_vm5, %v1950_v5, 0.0 }
 0x33f   : > { %v3190_v3 = vpop.eup %3189  ;;  %v1960_v54 = vsel %vm1952_vm5, %v1949_v26, 0.0  ;;  %v2118_v32 = vmul.f32 0.6931472, %v3188_v1  ;;  %v2414_v45 = vmax.f32 %v2408_v56, 1e-10  ;;  %v2656_v0 = vrot.slane %v2655_v40, 4 }
 0x340   : > { %v2116_v13 = vmul.f32 0.6931472, %v3190_v3  ;;  %v1961_v61 = vrot.slane %v1960_v54, 4  ;;  %v2040_v12 = vmul.f32 %v2036_v60, %v5399_v57  ;;  %v2281_v23 = vadd.f32 %v2280_v51, %v2279_v34 }
 0x341   : > { %v5423_v16 = vpop.xlane.xlu1 %2179  ;;  %v2041_v14 = vmul.f32 %v2037_v46, %v5391_v21  ;;  %v1968_v55 = vrot.slane %v1967_v43, 4  ;;  %v2584_v18 = vrot.slane %v2583_v29, 2  ;;  %v2357_v15 = vadd.f32 %v2356_v11, %v2355_v17  ;;  %v5428_v63 = vpop.xlane.xlu0 %2177 }
 0x342   : > { %v3192_v31 = vpop.eup %3191  ;;  %v2122_v33 = vmul.f32 0.01, %v2116_v13  ;;  %v1962_v6 = vadd.f32 %v1961_v61, %v1960_v54  ;;  %v2050_v9 = vsel %vm1952_vm5, %v2040_v12, 0.0  ;;  %v2282_v7 = vrot.slane %v2281_v23, 1 }
 0x343   : > { %v2422_v41 = vmul.f32 0.6931472, %v3192_v31  ;;  %v2051_v48 = vrot.slane %v2050_v9, 4  ;;  %v2123_v42 = vmul.f32 0.01, %v2118_v32  ;;  %3193 = vlog2.f32 %v2414_v45 }
 0x344   : > { %v1963_v39 = vrot.slane %v1962_v6, 2  ;;  %v2126_v10 = vmul.f32 %v2122_v33, %v5399_v57  ;;  %v2283_v44 = vadd.f32 %v2282_v7, %v2281_v23  ;;  %v2057_v4 = vsel %vm1952_vm5, %v2041_v14, 0.0 }
 0x345   : > { %v2052_v8 = vadd.f32 %v2051_v48, %v2050_v9  ;;  %v2427_v56 = vmul.f32 0.01, %v2422_v41  ;;  %v2657_v35 = vadd.f32 %v2656_v0, %v2655_v40  ;;  %v1969_v38 = vadd.f32 %v1968_v55, %v1967_v43 }
 0x346   : > { %v1964_v28 = vadd.f32 %v1963_v39, %v1962_v6  ;;  %v2136_v25 = vsel %vm1952_vm5, %v2126_v10, 0.0  ;;  %v2512_v17 = vrot.slane %v5411_v22, 1  ;;  %v2585_v59 = vadd.f32 %v2584_v18, %v2583_v29  ;;  %v2254_v26 = vpop.xlane.xlu2 %2253 }
 0x347   : > { %v2307_v5 = vmul.f32 %v5409_v20, %v2283_v44  ;;  %v2053_v52 = vrot.slane %v2052_v8, 2  ;;  %v2058_v27 = vrot.slane %v2057_v4, 4  ;;  %v2127_v3 = vmul.f32 %v2123_v42, %v5391_v21 }
 0x348   : > { %v1965_v1 = vrot.slane %v1964_v28, 1  ;;  %v2137_v34 = vrot.slane %v2136_v25, 4  ;;  %v2381_v46 = vmul.f32 %v5406_v58, %v2357_v15  ;;  %v2431_v13 = vmul.f32 %v2427_v56, %v5391_v21 }
 0x349   : > { %v2311_v40 = vadd.f32 %v2307_v5, %v5401_v62  ;;  %v2054_v60 = vadd.f32 %v2053_v52, %v2052_v8  ;;  %v2482_v31 = vpop.xlane.xlu1 %2481  ;;  %v3194_v11 = vpop.eup %3193  ;;  %v2658_v51 = vrot.slane %v2657_v35, 2  ;;  %v1970_v29 = vrot.slane %v1969_v38, 2 }
 0x34a   : > { %v1966_v43 = vadd.f32 %v1965_v1, %v1964_v28  ;;  %v2138_v54 = vadd.f32 %v2137_v34, %v2136_v25  ;;  %v2513_v61 = vadd.f32 %v2512_v17, %v5411_v22  ;;  %v2489_v45 = vmax.f32 %v5419_v49, 1e-10  ;;  %v5447_v41 = vpop.xlane.xlu0 %2557 }
 0x34b   : > { %v2385_v12 = vadd.f32 %v2381_v46, %v2311_v40  ;;  %v2055_v32 = vrot.slane %v2054_v60, 1  ;;  %v2059_v62 = vadd.f32 %v2058_v27, %v2057_v4  ;;  %v2143_v23 = vsel %vm1952_vm5, %v2127_v3, 0.0 }
 0x34c   : > { %v1984_v0 = vmul.f32 %v5340_v37, %v1966_v43  ;;  %v2139_v14 = vrot.slane %v2138_v54, 2  ;;  %v2447_v6 = vsel %vm1952_vm5, %v2431_v13, 0.0  ;;  %v2420_v9 = vmul.f32 0.6931472, %v3194_v11 }
 0x34d   : > { %v2467_v33 = vadd.f32 %v5415_v24, %v2385_v12  ;;  %v2056_v55 = vadd.f32 %v2055_v32, %v2054_v60  ;;  %v2586_v22 = vrot.slane %v2585_v59, 1  ;;  %v2659_v18 = vadd.f32 %v2658_v51, %v2657_v35 }
 0x34e   : > { %v1971_v15 = vadd.f32 %v1970_v29, %v1969_v38  ;;  %v2140_v49 = vadd.f32 %v2139_v14, %v2138_v54  ;;  %v1988_v7 = vadd.f32 %v1984_v0, %v5350_v2  ;;  %v2426_v39 = vmul.f32 0.01, %v2420_v9  ;;  %v2556_v17 = vpop.xlane.xlu2 %2555 }
 0x34f   : > { %v2074_v48 = vmul.f32 %v5347_v47, %v2056_v55  ;;  %3195 = vlog2.f32 %v2489_v45  ;;  %v2144_v42 = vrot.slane %v2143_v23, 4  ;;  %v2448_v44 = vrot.slane %v2447_v6, 4 }
 0x350   : > { %v2141_v10 = vrot.slane %v2140_v49, 1  ;;  %v2185_v24 = vmax.f32 %v5423_v16, 1e-10  ;;  %v2060_v4 = vrot.slane %v2059_v62, 2  ;;  %v2184_v56 = vmax.f32 %v5428_v63, 1e-10 }
 0x351   : > { %v2078_v8 = vadd.f32 %v2074_v48, %v1988_v7  ;;  %v2259_v28 = vmax.f32 %v2254_v26, 1e-10  ;;  %v2587_v35 = vadd.f32 %v2586_v22, %v2585_v59  ;;  %v2430_v25 = vmul.f32 %v2426_v39, %v5399_v57  ;;  %v2252_v27 = vpop.xlane.xlu1 %2251 }
 0x352   : > { %v2142_v38 = vadd.f32 %v2141_v10, %v2140_v49  ;;  %3197 = vlog2.f32 %v2185_v24  ;;  %v2660_v5 = vrot.slane %v2659_v18, 1  ;;  %v1972_v52 = vrot.slane %v1971_v15, 1  ;;  %v5463_v54 = vpop.xlane.xlu0 %2327 }
 0x353   : > { %3199 = vlog2.f32 %v2184_v56  ;;  %v2488_v1 = vmax.f32 %v2482_v31, 1e-10  ;;  %v5455_v3 = vstv %s5441_s20  ;;  %v2145_v34 = vadd.f32 %v2144_v42, %v2143_v23 }
 0x354   : > { %v2160_v16 = vmul.f32 %v5372_v53, %v2142_v38  ;;  %v2449_v46 = vadd.f32 %v2448_v44, %v2447_v6  ;;  %v2537_v63 = vmul.f32 %v5388_v30, %v2513_v61  ;;  %v2061_v59 = vadd.f32 %v2060_v4, %v2059_v62 }
 0x355   : > { %v3196_v40 = vpop.eup %3195  ;;  %3201 = vlog2.f32 %v2259_v28  ;;  %v2562_v26 = vmax.f32 %v2556_v17, 1e-10  ;;  %v2440_v13 = vsel %vm1952_vm5, %v2430_v25, 0.0  ;;  %v2258_v51 = vmax.f32 %v2252_v27, 1e-10 }
 0x356   : > { %v5459_v60 = vadd.f32 %v2160_v16, %v2078_v8  ;;  %v2496_v11 = vmul.f32 0.6931472, %v3196_v40  ;;  %v2611_v31 = vmul.f32 %v5396_v50, %v2587_v35  ;;  %v2661_v29 = vadd.f32 %v2660_v5, %v2659_v18  ;;  %v2326_v5 = vpop.xlane.xlu2 %2325 }
 0x357   : > { %v1973_v43 = vadd.f32 %v1972_v52, %v1971_v15  ;;  %3203 = vlog2.f32 %v2488_v1  ;;  %v2146_v32 = vrot.slane %v2145_v34, 2  ;;  %v2450_v45 = vrot.slane %v2449_v46, 2 }
 0x358   : > { %v3198_v12 = vpop.eup %3197  ;;  %v2501_v61 = vmul.f32 0.01, %v2496_v11  ;;  %v2541_v0 = vadd.f32 %v2537_v63, %v2467_v33  ;;  %v2441_v23 = vrot.slane %v2440_v13, 4  ;;  %v2563_v55 = vmax.f32 %v5447_v41, 1e-10 }
 0x359   : > { %v3200_v62 = vpop.eup %3199  ;;  %v2192_v14 = vmul.f32 0.6931472, %v3198_v12  ;;  %3205 = vlog2.f32 %v2562_v26  ;;  %v2062_v6 = vrot.slane %v2061_v59, 1  ;;  %v2685_v15 = vmul.f32 %v5455_v3, %v2661_v29  ;;  %v5478_v29 = vpop.xlane.xlu1 %2107 }
 0x35a   : > { %v2505_v9 = vmul.f32 %v2501_v61, %v5391_v21  ;;  %v2190_v22 = vmul.f32 0.6931472, %v3200_v62  ;;  %3207 = vlog2.f32 %v2258_v51  ;;  %v1985_v49 = vmul.f32 %v5340_v37, %v1973_v43  ;;  %v2630_v26 = vpop.xlane.xlu0 %2629 }
 0x35b   : > { %v3202_v18 = vpop.eup %3201  ;;  %v2197_v7 = vmul.f32 0.01, %v2192_v14  ;;  %v2615_v48 = vadd.f32 %v2611_v31, %v2541_v0  ;;  %v2147_v39 = vadd.f32 %v2146_v32, %v2145_v34  ;;  %v2451_v33 = vadd.f32 %v2450_v45, %v2449_v46 }
 0x35c   : > { %v2521_v42 = vsel %vm1952_vm5, %v2505_v9, 0.0  ;;  %v2196_v10 = vmul.f32 0.01, %v2190_v22  ;;  %v2442_v41 = vadd.f32 %v2441_v23, %v2440_v13  ;;  %v2266_v24 = vmul.f32 0.6931472, %v3202_v18 }
 0x35d   : > { %v3204_v44 = vpop.eup %3203  ;;  %3209 = vlog2.f32 %v2563_v55  ;;  %v5470_v4 = vadd.f32 %v2685_v15, %v2615_v48  ;;  %v2063_v8 = vadd.f32 %v2062_v6, %v2061_v59  ;;  %v1989_v38 = vadd.f32 %v1985_v49, %v5350_v2 }
 0x35e   : > { %v2200_v56 = vmul.f32 %v2196_v10, %v5399_v57  ;;  %v2494_v28 = vmul.f32 0.6931472, %v3204_v44  ;;  %v2522_v25 = vrot.slane %v2521_v42, 4  ;;  %v2201_v17 = vmul.f32 %v2197_v7, %v5391_v21 }
 0x35f   : > { %v3206_v35 = vpop.eup %3205  ;;  %v2148_v1 = vrot.slane %v2147_v39, 1  ;;  %v2452_v27 = vrot.slane %v2451_v33, 1  ;;  %v2333_v16 = vmax.f32 %v5463_v54, 1e-10  ;;  %v2443_v46 = vrot.slane %v2442_v41, 2 }
 0x360   : > { %v3208_v52 = vpop.eup %3207  ;;  %v2210_v34 = vsel %vm1952_vm5, %v2200_v56, 0.0  ;;  %v2271_v63 = vmul.f32 0.01, %v2266_v24  ;;  %v2500_v59 = vmul.f32 0.01, %v2494_v28  ;;  %v2075_v13 = vmul.f32 %v5347_v47, %v2063_v8  ;;  %v1931_v56 = vpop.xlane.xlu2 %1930 }
 0x361   : > { %v2211_v40 = vrot.slane %v2210_v34, 4  ;;  %v2568_v11 = vmul.f32 0.6931472, %v3206_v35  ;;  %v2264_v51 = vmul.f32 0.6931472, %v3208_v52  ;;  %v2523_v12 = vadd.f32 %v2522_v25, %v2521_v42 }
 0x362   : > { %v2332_v31 = vmax.f32 %v2326_v5, 1e-10  ;;  %v2217_v32 = vsel %vm1952_vm5, %v2201_v17, 0.0  ;;  %v2504_v61 = vmul.f32 %v2500_v59, %v5399_v57  ;;  %v2149_v54 = vadd.f32 %v2148_v1, %v2147_v39 }
 0x363   : > { %v3210_v43 = vpop.eup %3209  ;;  %v2212_v45 = vadd.f32 %v2211_v40, %v2210_v34  ;;  %v2574_v0 = vmul.f32 0.01, %v2568_v11  ;;  %v2270_v62 = vmul.f32 0.01, %v2264_v51  ;;  %v2636_v23 = vmax.f32 %v2630_v26, 1e-10  ;;  %v2022_v34 = vpop.xlane.xlu0 %2021 }
 0x364   : > { %v2444_v14 = vadd.f32 %v2443_v46, %v2442_v41  ;;  %v2275_v6 = vmul.f32 %v2271_v63, %v5391_v21  ;;  %v2514_v9 = vsel %vm1952_vm5, %v2504_v61, 0.0  ;;  %v2218_v22 = vrot.slane %v2217_v32, 4  ;;  %v2486_v63 = vpop.xlane.xlu1 %2485 }
 0x365   : > { %v2213_v55 = vrot.slane %v2212_v45, 2  ;;  %v2515_v18 = vrot.slane %v2514_v9, 4  ;;  %v2570_v15 = vmul.f32 0.6931472, %v3210_v43  ;;  %3211 = vlog2.f32 %v2333_v16 }
 0x366   : > { %v2524_v49 = vrot.slane %v2523_v12, 2  ;;  %v2578_v48 = vmul.f32 %v2574_v0, %v5399_v57  ;;  %3213 = vlog2.f32 %v2332_v31  ;;  %v2079_v42 = vadd.f32 %v2075_v13, %v1989_v38 }
 0x367   : > { %v2214_v7 = vadd.f32 %v2213_v55, %v2212_v45  ;;  %v2161_v39 = vmul.f32 %v5372_v53, %v2149_v54  ;;  %v2274_v10 = vmul.f32 %v2270_v62, %v5399_v57  ;;  %3215 = vlog2.f32 %v2636_v23 }
 0x368   : > { %v2445_v44 = vrot.slane %v2444_v14, 1  ;;  %v2291_v24 = vsel %vm1952_vm5, %v2275_v6, 0.0  ;;  %v2516_v8 = vadd.f32 %v2515_v18, %v2514_v9  ;;  %v2453_v28 = vadd.f32 %v2452_v27, %v2451_v33 }
 0x369   : > { %v2215_v41 = vrot.slane %v2214_v7, 1  ;;  %v2219_v35 = vadd.f32 %v2218_v22, %v2217_v32  ;;  %v2575_v25 = vmul.f32 0.01, %v2570_v15  ;;  %v2284_v17 = vsel %vm1952_vm5, %v2274_v10, 0.0  ;;  %v2560_v10 = vpop.xlane.xlu2 %2559 }
 0x36a   : > { %v2525_v5 = vadd.f32 %v2524_v49, %v2523_v12  ;;  %v2588_v38 = vsel %vm1952_vm5, %v2578_v48, 0.0  ;;  %v2285_v1 = vrot.slane %v2284_v17, 4  ;;  %v5490_v46 = vadd.f32 %v2161_v39, %v2079_v42 }
 0x36b   : > { %v2216_v52 = vadd.f32 %v2215_v41, %v2214_v7  ;;  %v3212_v16 = vpop.eup %3211  ;;  %v2292_v40 = vrot.slane %v2291_v24, 4  ;;  %v2446_v26 = vadd.f32 %v2445_v44, %v2444_v14  ;;  %v2517_v33 = vrot.slane %v2516_v8, 2 }
 0x36c   : > { %v3214_v59 = vpop.eup %3213  ;;  %v2286_v27 = vadd.f32 %v2285_v1, %v2284_v17  ;;  %v5494_v51 = vmul.f32 %v5367_v36, %v2453_v28  ;;  %v2220_v31 = vrot.slane %v2219_v35, 2  ;;  %v2579_v43 = vmul.f32 %v2575_v25, %v5391_v21  ;;  %v2412_v28 = vpop.xlane.xlu0 %2411 }
 0x36d   : > { %v2234_v13 = vmul.f32 %v5378_v19, %v2216_v52  ;;  %v3216_v11 = vpop.eup %3215  ;;  %v2589_v12 = vrot.slane %v2588_v38, 4  ;;  %v2526_v32 = vrot.slane %v2525_v5, 1  ;;  %v2340_v54 = vmul.f32 0.6931472, %v3212_v16 }
 0x36e   : > { %v2287_v61 = vrot.slane %v2286_v27, 2  ;;  %v2293_v0 = vadd.f32 %v2292_v40, %v2291_v24  ;;  %v2338_v62 = vmul.f32 0.6931472, %v3214_v59  ;;  %v2112_v23 = vmax.f32 %v5478_v29, 1e-10 }
 0x36f   : > { %v2238_v45 = vadd.f32 %v2234_v13, %v5459_v60  ;;  %v1935_v14 = vmax.f32 %v1931_v56, 1e-10  ;;  %v5500_v55 = vmul.f32 %v5367_v36, %v2446_v26  ;;  %v2518_v6 = vadd.f32 %v2517_v33, %v2516_v8 }
 0x370   : > { %v2288_v9 = vadd.f32 %v2287_v61, %v2286_v27  ;;  %v2642_v22 = vmul.f32 0.6931472, %v3216_v11  ;;  %v2221_v18 = vadd.f32 %v2220_v31, %v2219_v35  ;;  %v2595_v15 = vsel %vm1952_vm5, %v2579_v43, 0.0 }
 0x371   : > { %v2590_v49 = vadd.f32 %v2589_v12, %v2588_v38  ;;  %v2344_v7 = vmul.f32 0.01, %v2338_v62  ;;  %v5503_v48 = vadd.f32 %v2526_v32, %v2525_v5  ;;  %v2345_v42 = vmul.f32 0.01, %v2340_v54  ;;  %v2256_v5 = vpop.xlane.xlu1 %2255 }
 0x372   : > { %v2289_v60 = vrot.slane %v2288_v9, 1  ;;  %v2648_v39 = vmul.f32 0.01, %v2642_v22  ;;  %v2294_v44 = vrot.slane %v2293_v0, 2  ;;  %3217 = vlog2.f32 %v2112_v23 }
 0x373   : > { %v2348_v29 = vmul.f32 %v2344_v7, %v5399_v57  ;;  %v2026_v41 = vmax.f32 %v2022_v34, 1e-10  ;;  %v2519_v24 = vrot.slane %v2518_v6, 1  ;;  %3219 = vlog2.f32 %v1935_v14  ;;  %v5514_v14 = vld [vmem:[%s5321_s9 + $0x18] sm:$0xff] }
 0x374   : > { %v2290_v8 = vadd.f32 %v2289_v60, %v2288_v9  ;;  %v2652_v56 = vmul.f32 %v2648_v39, %v5399_v57  ;;  %v2591_v35 = vrot.slane %v2590_v49, 2  ;;  %v2490_v17 = vmax.f32 %v2486_v63, 1e-10 }
 0x375   : > { %v2358_v25 = vsel %vm1952_vm5, %v2348_v29, 0.0  ;;  %3221 = vlog2.f32 %v2026_v41  ;;  %v2349_v38 = vmul.f32 %v2345_v42, %v5391_v21  ;;  %v2564_v40 = vmax.f32 %v2560_v10, 1e-10 }
 0x376   : > { %v2308_v52 = vmul.f32 %v5409_v20, %v2290_v8  ;;  %v2359_v1 = vrot.slane %v2358_v25, 4  ;;  %v2662_v16 = vsel %vm1952_vm5, %v2652_v56, 0.0  ;;  %3223 = vlog2.f32 %v2490_v17  ;;  %v2182_v56 = vpop.xlane.xlu0 %2181 }
 0x377   : > { %v2663_v34 = vrot.slane %v2662_v16, 4  ;;  %v2416_v59 = vmax.f32 %v2412_v28, 1e-10  ;;  %v2596_v26 = vrot.slane %v2595_v15, 4  ;;  %v2260_v27 = vmax.f32 %v2256_v5, 1e-10 }
 0x378   : > { %v2312_v13 = vadd.f32 %v2308_v52, %v2238_v45  ;;  %v2360_v33 = vadd.f32 %v2359_v1, %v2358_v25  ;;  %v3218_v11 = vpop.eup %3217  ;;  %v2222_v31 = vrot.slane %v2221_v18, 1  ;;  %v5511_v63 = vadd.f32 %v2294_v44, %v2293_v0  ;;  %v2330_v0 = vpop.xlane.xlu2 %2329 }
 0x379   : > { %v2592_v43 = vadd.f32 %v2591_v35, %v2590_v49  ;;  %v2664_v12 = vadd.f32 %v2663_v34, %v2662_v16  ;;  %v3220_v32 = vpop.eup %3219  ;;  %v2520_v61 = vadd.f32 %v2519_v24, %v2518_v6  ;;  %v2120_v62 = vmul.f32 0.6931472, %v3218_v11 }
 0x37a   : > { %v2361_v54 = vrot.slane %v2360_v33, 2  ;;  %3225 = vlog2.f32 %v2564_v40  ;;  %v2365_v9 = vsel %vm1952_vm5, %v2349_v38, 0.0  ;;  %v1943_v45 = vmul.f32 0.6931472, %v3220_v32 }
 0x37b   : > { %v3222_v23 = vpop.eup %3221  ;;  %v2665_v22 = vrot.slane %v2664_v12, 2  ;;  %3227 = vlog2.f32 %v2416_v59  ;;  %v2124_v60 = vmul.f32 0.01, %v2120_v62  ;;  %v5517_v39 = vadd.f32 %v2596_v26, %v2595_v15 }
 0x37c   : > { %v2362_v7 = vadd.f32 %v2361_v54, %v2360_v33  ;;  %v2034_v42 = vmul.f32 0.6931472, %v3222_v23  ;;  %3229 = vlog2.f32 %v2260_v27  ;;  %v3224_v49 = vpop.eup %3223  ;;  %v2593_v6 = vrot.slane %v2592_v43, 1 }
 0x37d   : > { %v2666_v10 = vadd.f32 %v2665_v22, %v2664_v12  ;;  %v1947_v44 = vmul.f32 0.01, %v1943_v45  ;;  %v2223_v29 = vadd.f32 %v2222_v31, %v2221_v18  ;;  %v2128_v24 = vmul.f32 %v2124_v60, %v5514_v14 }
 0x37e   : > { %v2363_v41 = vrot.slane %v2362_v7, 1  ;;  %v2038_v8 = vmul.f32 0.01, %v2034_v42  ;;  %v2366_v28 = vrot.slane %v2365_v9, 4  ;;  %v2498_v25 = vmul.f32 0.6931472, %v3224_v49 }
 0x37f   : > { %v1951_v35 = vmul.f32 %v1947_v44, %v5514_v14  ;;  %v2334_v17 = vmax.f32 %v2330_v0, 1e-10  ;;  %v2296_v52 = vrot.slane %v5511_v63, 1  ;;  %v2538_v15 = vmul.f32 %v5388_v30, %v2520_v61 }
 0x380   : > { %v3226_v5 = vpop.eup %3225  ;;  %v2364_v38 = vadd.f32 %v2363_v41, %v2362_v7  ;;  %v2042_v1 = vmul.f32 %v2038_v8, %v5514_v14  ;;  %v2594_v18 = vadd.f32 %v2593_v6, %v2592_v43  ;;  %v2667_v34 = vrot.slane %v2666_v10, 1 }
 0x381   : > { %v3228_v16 = vpop.eup %3227  ;;  %v1974_v40 = vsel %vm1952_vm5, %v1951_v35, 0.0  ;;  %v2186_v59 = vmax.f32 %v2182_v56, 1e-10  ;;  %v2150_v27 = vsel %vm1952_vm5, %v2128_v24, 0.0  ;;  %v2367_v12 = vadd.f32 %v2366_v28, %v2365_v9 }
 0x382   : > { %v3230_v26 = vpop.eup %3229  ;;  %v2382_v33 = vmul.f32 %v5406_v58, %v2364_v38  ;;  %v1975_v11 = vrot.slane %v1974_v40, 4  ;;  %v2064_v31 = vsel %vm1952_vm5, %v2042_v1, 0.0  ;;  %v2502_v61 = vmul.f32 0.01, %v2498_v25 }
 0x383   : > { %v2065_v32 = vrot.slane %v2064_v31, 4  ;;  %3231 = vlog2.f32 %v2334_v17  ;;  %v2572_v23 = vmul.f32 0.6931472, %v3226_v5  ;;  %v2424_v43 = vmul.f32 0.6931472, %v3228_v16 }
 0x384   : > { %v2386_v54 = vadd.f32 %v2382_v33, %v2312_v13  ;;  %v1976_v62 = vadd.f32 %v1975_v11, %v1974_v40  ;;  %v2151_v22 = vrot.slane %v2150_v27, 4  ;;  %v2268_v7 = vmul.f32 0.6931472, %v3230_v26 }
 0x385   : > { %v2066_v45 = vadd.f32 %v2065_v32, %v2064_v31  ;;  %3233 = vlog2.f32 %v2186_v59  ;;  %v2668_v42 = vadd.f32 %v2667_v34, %v2666_v10  ;;  %v2576_v49 = vmul.f32 0.01, %v2572_v23  ;;  %v2632_v59 = vpop.xlane.xlu1 %2631 }
 0x386   : > { %v2468_v60 = vadd.f32 %v5500_v55, %v2386_v54  ;;  %v1977_v0 = vrot.slane %v1976_v62, 2  ;;  %v2506_v44 = vmul.f32 %v2502_v61, %v5514_v14  ;;  %v2428_v9 = vmul.f32 0.01, %v2424_v43 }
 0x387   : > { %v2067_v6 = vrot.slane %v2066_v45, 2  ;;  %v2272_v41 = vmul.f32 0.01, %v2268_v7  ;;  %v2598_v24 = vrot.slane %v5517_v39, 2  ;;  %v2612_v13 = vmul.f32 %v5396_v50, %v2594_v18 }
 0x388   : > { %v2542_v8 = vadd.f32 %v2538_v15, %v2468_v60  ;;  %v1978_v56 = vadd.f32 %v1977_v0, %v1976_v62  ;;  %v2368_v35 = vrot.slane %v2367_v12, 2  ;;  %v2152_v25 = vadd.f32 %v2151_v22, %v2150_v27  ;;  %v2634_v27 = vpop.xlane.xlu0 %2633 }
 0x389   : > { %v3232_v28 = vpop.eup %3231  ;;  %v2432_v17 = vmul.f32 %v2428_v9, %v5514_v14  ;;  %v2276_v55 = vmul.f32 %v2272_v41, %v5514_v14  ;;  %v2235_v10 = vmul.f32 %v5378_v19, %v2223_v29  ;;  %v2297_v5 = vadd.f32 %v2296_v52, %v5511_v63  ;;  %v2702_v52 = vpop.xlane.xlu2 %2701 }
 0x38a   : > { %v2616_v38 = vadd.f32 %v2612_v13, %v2542_v8  ;;  %v2686_v1 = vmul.f32 %v5455_v3, %v2668_v42  ;;  %v2068_v34 = vadd.f32 %v2067_v6, %v2066_v45  ;;  %v2528_v18 = vsel %vm1952_vm5, %v2506_v44, 0.0 }
 0x38b   : > { %v3234_v16 = vpop.eup %3233  ;;  %v2580_v15 = vmul.f32 %v2576_v49, %v5514_v14  ;;  %v2454_v40 = vsel %vm1952_vm5, %v2432_v17, 0.0  ;;  %v5542_v26 = vmul.f32 %v5388_v30, %v5503_v48  ;;  %v1979_v29 = vrot.slane %v1978_v56, 1 }
 0x38c   : > { %v5544_v33 = vadd.f32 %v2686_v1, %v2616_v38  ;;  %v2455_v63 = vrot.slane %v2454_v40, 4  ;;  %v5547_v11 = vadd.f32 %v2598_v24, %v5517_v39  ;;  %v2369_v31 = vadd.f32 %v2368_v35, %v2367_v12 }
 0x38d   : > { %v2153_v32 = vrot.slane %v2152_v25, 2  ;;  %v2298_v61 = vsel %vm1952_vm5, %v2276_v55, 0.0  ;;  %v2239_v54 = vadd.f32 %v2235_v10, %v5490_v46  ;;  %v2309_v62 = vmul.f32 %v5409_v20, %v2297_v5  ;;  %v2704_v1 = vpop.xlane.xlu1 %2703 }
 0x38e   : > { %v2529_v23 = vrot.slane %v2528_v18, 4  ;;  %v2299_v48 = vrot.slane %v2298_v61, 4  ;;  %v2069_v43 = vrot.slane %v2068_v34, 1  ;;  %v2602_v22 = vsel %vm1952_vm5, %v2580_v15, 0.0 }
 0x38f   : > { %v2342_v45 = vmul.f32 0.6931472, %v3232_v28  ;;  %v2194_v7 = vmul.f32 0.6931472, %v3234_v16  ;;  %v1980_v60 = vadd.f32 %v1979_v29, %v1978_v56  ;;  %v2456_v42 = vadd.f32 %v2455_v63, %v2454_v40 }
 0x390   : > { %v2300_v0 = vadd.f32 %v2299_v48, %v2298_v61  ;;  %v2637_v39 = vmax.f32 %v2632_v59, 1e-10  ;;  %v2370_v49 = vrot.slane %v2369_v31, 1  ;;  %v2154_v12 = vadd.f32 %v2153_v32, %v2152_v25  ;;  %v2708_v59 = vpop.xlane.xlu0 %2707 }
 0x391   : > { %v2346_v6 = vmul.f32 0.01, %v2342_v45  ;;  %v2198_v44 = vmul.f32 0.01, %v2194_v7  ;;  %v2600_v9 = vrot.slane %v5547_v11, 1  ;;  %v2530_v46 = vadd.f32 %v2529_v23, %v2528_v18  ;;  %v2706_v40 = vpop.xlane.xlu2 %2705 }
 0x392   : > { %v2603_v41 = vrot.slane %v2602_v22, 4  ;;  %v2709_v24 = vmax.f32 %v2702_v52, 1e-10  ;;  %v2070_v13 = vadd.f32 %v2069_v43, %v2068_v34  ;;  %v2301_v8 = vrot.slane %v2300_v0, 2 }
 0x393   : > { %v2350_v35 = vmul.f32 %v2346_v6, %v5514_v14  ;;  %v2202_v28 = vmul.f32 %v2198_v44, %v5514_v14  ;;  %v2313_v17 = vadd.f32 %v2309_v62, %v2239_v54  ;;  %v1986_v56 = vmul.f32 %v5340_v37, %v1980_v60 }
 0x394   : > { %v2457_v55 = vrot.slane %v2456_v42, 2  ;;  %3235 = vlog2.f32 %v2637_v39  ;;  %v2371_v10 = vadd.f32 %v2370_v49, %v2369_v31  ;;  %v2155_v25 = vrot.slane %v2154_v12, 1 }
 0x395   : > { %v2372_v5 = vsel %vm1952_vm5, %v2350_v35, 0.0  ;;  %v2224_v38 = vsel %vm1952_vm5, %v2202_v28, 0.0  ;;  %v2531_v16 = vrot.slane %v2530_v46, 2  ;;  %v2604_v18 = vadd.f32 %v2603_v41, %v2602_v22 }
 0x396   : > { %v2373_v34 = vrot.slane %v2372_v5, 4  ;;  %v2225_v15 = vrot.slane %v2224_v38, 4  ;;  %v2076_v29 = vmul.f32 %v5347_v47, %v2070_v13  ;;  %v2302_v63 = vadd.f32 %v2301_v8, %v2300_v0 }
 0x397   : > { %3237 = vlog2.f32 %v2709_v24  ;;  %v2638_v37 = vmax.f32 %v2634_v27, 1e-10  ;;  %v1990_v52 = vadd.f32 %v1986_v56, %v5350_v2  ;;  %v2458_v31 = vadd.f32 %v2457_v55, %v2456_v42 }
 0x398   : > { %v2374_v32 = vadd.f32 %v2373_v34, %v2372_v5  ;;  %v2226_v61 = vadd.f32 %v2225_v15, %v2224_v38  ;;  %v2710_v54 = vmax.f32 %v2704_v1, 1e-10  ;;  %v2711_v62 = vmax.f32 %v2706_v40, 1e-10  ;;  %v3256_v40 = vld [vmem:[%s5321_s9] sm:$0xff] }
 0x399   : > { %3239 = vlog2.f32 %v2638_v37  ;;  %v2712_v23 = vmax.f32 %v2708_v59, 1e-10  ;;  %v2383_v43 = vmul.f32 %v5406_v58, %v2371_v10  ;;  %v2156_v22 = vadd.f32 %v2155_v25, %v2154_v12 }
 0x39a   : > { %v3236_v48 = vpop.eup %3235  ;;  %v2375_v45 = vrot.slane %v2374_v32, 2  ;;  %v2227_v7 = vrot.slane %v2226_v61, 2  ;;  %v5562_v60 = vadd.f32 %v2531_v16, %v2530_v46  ;;  %v2303_v47 = vrot.slane %v2302_v63, 1 }
 0x39b   : > { %v2644_v0 = vmul.f32 0.6931472, %v3236_v48  ;;  %3241 = vlog2.f32 %v2710_v54  ;;  %v2605_v27 = vrot.slane %v2604_v18, 2  ;;  %v2080_v49 = vadd.f32 %v2076_v29, %v1990_v52 }
 0x39c   : > { %v2376_v2 = vadd.f32 %v2375_v45, %v2374_v32  ;;  %v2228_v42 = vadd.f32 %v2227_v7, %v2226_v61  ;;  %3243 = vlog2.f32 %v2711_v62  ;;  %v2459_v6 = vrot.slane %v2458_v31, 1 }
 0x39d   : > { %v3238_v39 = vpop.eup %3237  ;;  %v2649_v44 = vmul.f32 0.01, %v2644_v0  ;;  %3245 = vlog2.f32 %v2712_v23  ;;  %v5565_v41 = vadd.f32 %v2600_v9, %v5547_v11  ;;  %v2387_v8 = vadd.f32 %v2383_v43, %v2313_v17 }
 0x39e   : > { %v2377_v12 = vrot.slane %v2376_v2, 1  ;;  %v2229_v24 = vrot.slane %v2228_v42, 1  ;;  %v2714_v13 = vmul.f32 0.6931472, %v3238_v39  ;;  %v2162_v35 = vmul.f32 %v5372_v53, %v2156_v22 }
 0x39f   : > { %v3240_v46 = vpop.eup %3239  ;;  %v2304_v28 = vadd.f32 %v2303_v47, %v2302_v63  ;;  %v2653_v56 = vmul.f32 %v2649_v44, %v5391_v21  ;;  %v2533_v55 = vrot.slane %v5562_v60, 1  ;;  %v2606_v1 = vadd.f32 %v2605_v27, %v2604_v18 }
 0x3a0   : > { %v2230_v10 = vadd.f32 %v2229_v24, %v2228_v42  ;;  %v2721_v25 = vmul.f32 0.01, %v2714_v13  ;;  %v2646_v5 = vmul.f32 0.6931472, %v3240_v46  ;;  %v2460_v11 = vadd.f32 %v2459_v6, %v2458_v31 }
 0x3a1   : > { %v3242_v38 = vpop.eup %3241  ;;  %v2166_v9 = vadd.f32 %v2162_v35, %v2080_v49  ;;  %v2669_v16 = vsel %vm1952_vm5, %v2653_v56, 0.0  ;;  %v2378_v15 = vadd.f32 %v2377_v12, %v2376_v2  ;;  %v2310_v63 = vmul.f32 %v5409_v20, %v2304_v28 }
 0x3a2   : > { %v3244_v34 = vpop.eup %3243  ;;  %v2236_v17 = vmul.f32 %v5378_v19, %v2230_v10  ;;  %v2670_v53 = vrot.slane %v2669_v16, 4  ;;  %v2725_v59 = vmul.f32 %v3256_v40, %v2721_v25  ;;  %v2650_v37 = vmul.f32 0.01, %v2646_v5 }
 0x3a3   : > { %v3246_v29 = vpop.eup %3245  ;;  %v2716_v52 = vmul.f32 0.6931472, %v3242_v38  ;;  %v2718_v32 = vmul.f32 0.6931472, %v3244_v34  ;;  %v2384_v19 = vmul.f32 %v5406_v58, %v2378_v15  ;;  %v2607_v2 = vrot.slane %v2606_v1, 1 }
 0x3a4   : > { %v2240_v61 = vadd.f32 %v2236_v17, %v2166_v9  ;;  %v2671_v54 = vadd.f32 %v2670_v53, %v2669_v16  ;;  %v2729_v18 = vsel %vm1952_vm5, %v2725_v59, 0.0  ;;  %v2720_v31 = vmul.f32 0.6931472, %v3246_v29 }
 0x3a5   : > { %v2730_v62 = vrot.slane %v2729_v18, 4  ;;  %v2654_v23 = vmul.f32 %v2650_v37, %v5514_v14  ;;  %v2722_v48 = vmul.f32 0.01, %v2716_v52  ;;  %v2723_v43 = vmul.f32 0.01, %v2718_v32 }
 0x3a6   : > { %v2314_v22 = vadd.f32 %v2310_v63, %v2240_v61  ;;  %v2672_v45 = vrot.slane %v2671_v54, 2  ;;  %v2724_v20 = vmul.f32 0.01, %v2720_v31  ;;  %v2534_v24 = vadd.f32 %v2533_v55, %v5562_v60 }
 0x3a7   : > { %v2731_v7 = vadd.f32 %v2730_v62, %v2729_v18  ;;  %v2676_v47 = vsel %vm1952_vm5, %v2654_v23, 0.0  ;;  %v2726_v0 = vmul.f32 %v2722_v48, %v5399_v57  ;;  %v2727_v27 = vmul.f32 %v2723_v43, %v5391_v21 }
 0x3a8   : > { %v2673_v42 = vadd.f32 %v2672_v45, %v2671_v54  ;;  %v2677_v39 = vrot.slane %v2676_v47, 4  ;;  %v2728_v49 = vmul.f32 %v2724_v20, %v5514_v14  ;;  %v2388_v6 = vadd.f32 %v2384_v19, %v2314_v22 }
 0x3a9   : > { %v2732_v44 = vrot.slane %v2731_v7, 2  ;;  %v2736_v58 = vsel %vm1952_vm5, %v2726_v0, 0.0  ;;  %v2743_v12 = vsel %vm1952_vm5, %v2727_v27, 0.0  ;;  %v2466_v57 = vmul.f32 %v5367_v36, %v2460_v11 }
 0x3aa   : > { %v2674_v13 = vrot.slane %v2673_v42, 1  ;;  %v2678_v46 = vadd.f32 %v2677_v39, %v2676_v47  ;;  %v2737_v35 = vrot.slane %v2736_v58, 4  ;;  %v2744_v28 = vrot.slane %v2743_v12, 4 }
 0x3ab   : > { %v2733_v21 = vadd.f32 %v2732_v44, %v2731_v7  ;;  %v2750_v56 = vsel %vm1952_vm5, %v2728_v49, 0.0  ;;  %v2469_v14 = vadd.f32 %v5494_v51, %v2387_v8  ;;  %v2608_v10 = vadd.f32 %v2607_v2, %v2606_v1 }
 0x3ac   : > { %v2679_v25 = vrot.slane %v2678_v46, 2  ;;  %v2738_v5 = vadd.f32 %v2737_v35, %v2736_v58  ;;  %v2470_v9 = vadd.f32 %v2466_v57, %v2388_v6  ;;  %v2745_v16 = vadd.f32 %v2744_v28, %v2743_v12 }
 0x3ad   : > { %v2734_v38 = vrot.slane %v2733_v21, 1  ;;  %v2751_v34 = vrot.slane %v2750_v56, 4  ;;  %v2675_v60 = vadd.f32 %v2674_v13, %v2673_v42  ;;  %v2758_v55 = vstv %s5577_s21 }
 0x3ae   : > { %v2680_v15 = vadd.f32 %v2679_v25, %v2678_v46  ;;  %v2739_v17 = vrot.slane %v2738_v5, 2  ;;  %v2540_v53 = vmul.f32 %v5388_v30, %v2534_v24  ;;  %v2746_v11 = vrot.slane %v2745_v16, 2 }
 0x3af   : > { %v2735_v36 = vadd.f32 %v2734_v38, %v2733_v21  ;;  %v2752_v40 = vadd.f32 %v2751_v34, %v2750_v56  ;;  %v2543_v59 = vadd.f32 %v5542_v26, %v2469_v14  ;;  %v2613_v52 = vmul.f32 %v5396_v50, %v5565_v41 }
 0x3b0   : > { %v2681_v29 = vrot.slane %v2680_v15, 1  ;;  %v2740_v51 = vadd.f32 %v2739_v17, %v2738_v5  ;;  %v2544_v1 = vadd.f32 %v2540_v53, %v2470_v9  ;;  %v2747_v63 = vadd.f32 %v2746_v11, %v2745_v16 }
 0x3b1   : > { %v2759_v8 = vmul.f32 %v2758_v55, %v2735_v36  ;;  %v2753_v37 = vrot.slane %v2752_v40, 2  ;;  %v2614_v32 = vmul.f32 %v5396_v50, %v2608_v10  ;;  %v2687_v61 = vmul.f32 %v5455_v3, %v2675_v60 }
 0x3b2   : > { %v2741_v54 = vrot.slane %v2740_v51, 1  ;;  %v2682_v18 = vadd.f32 %v2681_v29, %v2680_v15  ;;  %v2748_v31 = vrot.slane %v2747_v63, 1  ;;  %v2617_v62 = vadd.f32 %v2613_v52, %v2543_v59 }
 0x3b3   : > { %v2763_v30 = vadd.f32 %v2759_v8, %v5470_v4  ;;  %v2754_v26 = vadd.f32 %v2753_v37, %v2752_v40  ;;  %v2618_v48 = vadd.f32 %v2614_v32, %v2544_v1 }
 0x3b4   : > { %v2742_v23 = vadd.f32 %v2741_v54, %v2740_v51  ;;  %v2749_v43 = vadd.f32 %v2748_v31, %v2747_v63  ;;  %v2691_v45 = vadd.f32 %v2687_v61, %v2617_v62  ;;  %v2688_v41 = vmul.f32 %v5455_v3, %v2682_v18 }
 0x3b5   : > { %3247 = vtanh.f32 %v2763_v30  ;;  %v2755_v19 = vrot.slane %v2754_v26, 1 }
 0x3b6   : > { %v2760_v22 = vmul.f32 %v2758_v55, %v2742_v23  ;;  %v2761_v50 = vmul.f32 %v2758_v55, %v2749_v43  ;;  %v2692_v4 = vadd.f32 %v2688_v41, %v2618_v48 }
 0x3b7   : > { %v2756_v20 = vadd.f32 %v2755_v19, %v2754_v26 }
 0x3b8   : > { %v2764_v7 = vadd.f32 %v2760_v22, %v5544_v33  ;;  %v2765_v47 = vadd.f32 %v2761_v50, %v2691_v45 }
 0x3b9   : > { %v2762_v0 = vmul.f32 %v2758_v55, %v2756_v20 }
 0x3ba   : > { %3249 = vtanh.f32 %v2764_v7 }
 0x3bb   : > { %v3248_v27 = vpop.eup %3247  ;;  %3251 = vtanh.f32 %v2765_v47  ;;  %v2766_v2 = vadd.f32 %v2762_v0, %v2692_v4 }
 0x3bc   : > { %2772 = vst.msk [vmem:[%s334_s24] sm:$0x1] %vm2771_vm8, %v3248_v27 }
 0x3bd   : > { %3253 = vtanh.f32 %v2766_v2 }
 0x3c0   : > { %v3250_v42 = vpop.eup %3249 }
 0x3c1   : > { %v3252_v3 = vpop.eup %3251  ;;  %2773 = vst.msk [vmem:[%s334_s24 + $0x1] sm:$0x1] %vm2771_vm8, %v3250_v42 }
 0x3c2   : > { %2774 = vst.msk [vmem:[%s334_s24 + $0x2] sm:$0x1] %vm2771_vm8, %v3252_v3 }
 0x3c3   : > { %v3254_v39 = vpop.eup %3253 }
 0x3c4   : > { %2775 = vst.msk [vmem:[%s334_s24 + $0x3] sm:$0x1] %vm2771_vm8, %v3254_v39 }
 0x3c5 PF: > { %s19_s26 = sadd.s32 1, %s3282_s26  }
 0x3c6   : > { %p16_p8 = scmp.ge.s32.totalorder %s19_s26, 4  }
 0x3c8   :  { %18 = sbr.rel (!%p16_p8) target bundleno = 3 (0x3), region = 89 }
 0x3cd   :  { %2796 = vsyncpa [#allocation4], 1 }
 0x3ce   :  { %2798 = vsyncpa [#allocation4 + $0x1], 1 }

</bundles_post_ra>
